<compile_context>
chip_gen: v7x
topology: tpu7x:2x2x1
jax: 0.10.0
libtpu: 0.0.40
codegen_flags: <defaults>
</compile_context>

<pallas_src>
import math

import numpy as np
import jax
import jax.numpy as jnp
from jax.experimental import pallas as pl
from jax.experimental.pallas import tpu as pltpu


# ----------------------------------------------------------------------------
# The fused VPBlock kernel (one batch *group* of Bt elements per grid step)
# ----------------------------------------------------------------------------
def _make_vp_kernel(q, num_heads, D):
    dh = D // num_heads

    def kernel(x_ref, compw_ref, compb_ref, dw_ref, mats_ref, bmask_ref,
               attnw_ref, attnb_ref, outw_ref, outb_ref, o_ref):
        W = x_ref.shape[2]                      # packed lane width = Bt * L
        bf = jnp.bfloat16

        def mm(a, b):
            # bf16 MXU matmul with f32 accumulation
            return jnp.dot(a.astype(bf), b.astype(bf),
                           preferred_element_type=jnp.float32)

        def taps(c):
            # dw_ref is (4, D, n_conv): taps 0..2 + bias for conv column c
            return (dw_ref[0, :, c:c + 1], dw_ref[1, :, c:c + 1],
                    dw_ref[2, :, c:c + 1], dw_ref[3, :, c:c + 1])

        def dw_same(h, c, scale):
            # depthwise k=3 stride-1 'same' conv on a (D, W) tile; segment
            # boundaries (between packed batch elements / scale padding) are
            # zeroed with precomputed keep-masks.
            w0, w1, w2, b = taps(c)
            kp = bmask_ref[scale, 0]            # (1, W) keep-mask for x[l-1]
            kn = bmask_ref[scale, 1]            # (1, W) keep-mask for x[l+1]
            z = jnp.zeros((D, 1), jnp.float32)
            h_prev = jnp.concatenate([z, h[:, :-1]], axis=1) * kp
            h_next = jnp.concatenate([h[:, 1:], z], axis=1) * kn
            return w0 * h_prev + w1 * h + w2 * h_next + b

        x = x_ref[0]                            # (Cv_p, W) f32

        # --- 1) 1x1 compression conv -----------------------------------------
        h = mm(compw_ref[...], x) + compb_ref[...]          # (D, W)

        # --- 2) compression phases (i==0 same/stride1, i>0 valid/stride2) ----
        compressed = []
        for i in range(q):
            if i == 0:
                h = dw_same(h, 0, 0)
            else:
                w0, w1, w2, b = taps(i)
                t1 = jnp.concatenate(
                    [h[:, 1:], jnp.zeros((D, 1), jnp.float32)], axis=1)
                t2 = jnp.concatenate(
                    [h[:, 2:], jnp.zeros((D, 2), jnp.float32)], axis=1)
                y = w0 * h + w1 * t1 + w2 * t2
                # single 0/1 selection matmul performs the stride-2 gather
                h = mm(y, mats_ref[i]) + b
            compressed.append(h)

        # --- 3) adaptive-avg-pool fusion (exact f32 pool weights) ------------
        fused = h
        for i in range(q - 1):
            fused = fused + jnp.dot(compressed[i], mats_ref[q + i],
                                    preferred_element_type=jnp.float32)

        # --- 4) MHSA on the most-compressed representation --------------------
        wqkv = attnw_ref[0:3 * D]               # (3D, D)   (scale folded in wq)
        wo = attnw_ref[3 * D:4 * D]             # (D, D)
        bqkv = attnb_ref[0:3 * D]               # (3D, 1)
        bo = attnb_ref[3 * D:4 * D]             # (D, 1)

        qkv = mm(wqkv, fused) + bqkv            # (3D, W) f32
        qkv = qkv.reshape(3, num_heads, dh, W)
        qh, kh, vh = qkv[0], qkv[1], qkv[2]     # (H, dh, W)

        s = jnp.einsum('hdq,hdk->hqk', qh.astype(bf), kh.astype(bf),
                       preferred_element_type=jnp.float32)   # (H, W, W)
        s = s + mats_ref[0][None]               # additive cross-segment mask
        s = s - jnp.max(s, axis=-1, keepdims=True)
        p = jnp.exp(s)
        p = p * pl.reciprocal(jnp.sum(p, axis=-1, keepdims=True), approx=True)
        ctx = jnp.einsum('hdk,hqk->hdq', vh.astype(bf), p.astype(bf),
                         preferred_element_type=jnp.float32)  # (H, dh, W)
        attention = mm(wo, ctx.reshape(D, W)) + bo + fused     # residual

        # --- 5+6) interleaved forward / backward TFAR chains ------------------
        def tfar(m, n, conv_base, scale_m, scale_n, g_idx):
            w1b = jax.nn.sigmoid(dw_same(n, conv_base + 0, scale_n))
            w2b = dw_same(m, conv_base + 1, scale_m)
            w3b = dw_same(n, conv_base + 2, scale_n)
            if g_idx is None:                   # same length: interp == identity
                w1u, w3u = w1b, w3b
            else:
                w13 = jnp.concatenate([w1b, w3b], axis=0)     # (2D, W)
                w13u = mm(w13, mats_ref[g_idx])               # one interp matmul
                w1u, w3u = w13u[:D], w13u[D:]
            return w1u * w2b + w3u

        # forward TFAR at the most-compressed scale (no interpolation)
        up = tfar(compressed[q - 1], attention, q + 3 * (q - 1),
                  q - 1, q - 1, None)
        # backward chain; forward TFAR i is computed lazily right before use
        for j, i in enumerate(range(q - 2, -1, -1)):
            ups_i = tfar(compressed[i], attention, q + 3 * i,
                         i, q - 1, 2 * q - 1 + i)
            up = tfar(ups_i, up, 4 * q + 3 * j,
                      i, i + 1, 3 * q - 2 + j) + compressed[i]

        # --- 7) output 1x1 conv + residual with the input video ---------------
        o_ref[0] = mm(outw_ref[...], up) + outb_ref[...] + x

    return kernel


# ----------------------------------------------------------------------------
# Host-side constant matrices (resampling expressed as tiny matmuls)
# ----------------------------------------------------------------------------
def _adaptive_pool_matrix(l_in, l_out):
    P = np.zeros((l_in, l_out), np.float32)
    for i in range(l_out):
        s = (i * l_in) // l_out
        e = -((-(i + 1) * l_in) // l_out)       # ceil((i+1)*l_in/l_out)
        P[s:e, i] = 1.0 / (e - s)
    return P


def _nearest_matrix(l_in, l_out):
    G = np.zeros((l_in, l_out), np.float32)
    for i in range(l_out):
        G[(i * l_in) // l_out, i] = 1.0
    return G


# ----------------------------------------------------------------------------
# Wrapper: builds the single fused pallas_call
# ----------------------------------------------------------------------------
def vp_block_forward(video, params):
    B, Cv, L = video.shape
    D = params["hidden_dim"]
    q = params["q"]
    H = params["num_heads"]
    assert D % H == 0

    # per-scale sequence lengths
    lengths = [L]
    for _ in range(1, q):
        lengths.append((lengths[-1] - 3) // 2 + 1)
    Lc = lengths[-1]
    assert Lc >= 1, "sequence too short for this compression multiplier"

    # ---- batch packing: Bt elements side-by-side on the lane axis -----------
    bt_cap = max(1, -(-128 // L))               # elements for a 128-lane slab
    if B >= 2 * bt_cap:
        Bt = bt_cap                             # lane-dense AND >=2 grid steps
    elif B >= 2:
        Bt = -(-B // 2)                         # keep 2 grid steps (v7x megacore)
    else:
        Bt = 1
    G = -(-B // Bt)
    W = Bt * L
    Cv_p = -(-Cv // 8) * 8                      # sublane-pad video channels

    vid = video.astype(jnp.float32)
    vid = jnp.pad(vid, ((0, G * Bt - B), (0, Cv_p - Cv), (0, 0)))
    x_packed = vid.reshape(G, Bt, Cv_p, L).transpose(0, 2, 1, 3).reshape(G, Cv_p, W)

    # ---- constant mask / resampling matrix pack (one stacked input) ---------
    def place(base, l_in, l_out):
        Z = np.zeros((W, W), np.float32)
        for b in range(Bt):
            Z[b * l_in:b * l_in + l_in, b * l_out:b * l_out + l_out] = base
        return Z

    mats = np.zeros((4 * q - 3, W, W), np.float32)
    seg = np.arange(W) // Lc                    # attention segments (per batch elem)
    mats[0] = np.where(seg[:, None] == seg[None, :], 0.0, -1e9)
    for i in range(1, q):                       # stride-2 tap-0 selectors
        li, lo = lengths[i - 1], lengths[i]
        base = np.zeros((li, lo), np.float32)
        base[2 * np.arange(lo), np.arange(lo)] = 1.0
        mats[i] = place(base, li, lo)
    for i in range(q - 1):                      # adaptive pool + forward interp
        mats[q + i] = place(_adaptive_pool_matrix(lengths[i], Lc), lengths[i], Lc)
        mats[2 * q - 1 + i] = place(_nearest_matrix(Lc, lengths[i]), Lc, lengths[i])
    for j in range(q - 1):                      # backward interp
        i = q - 2 - j
        mats[3 * q - 2 + j] = place(_nearest_matrix(lengths[i + 1], lengths[i]),
                                    lengths[i + 1], lengths[i])
    mats = jnp.asarray(mats)

    # ---- depthwise-conv segment-boundary keep-masks per scale ----------------
    bmask = np.zeros((q, 2, 1, W), np.float32)
    for i, li in enumerate(lengths):
        pos = np.arange(W) % li
        bmask[i, 0, 0] = (pos != 0).astype(np.float32)        # keep for x[l-1]
        bmask[i, 1, 0] = (pos != li - 1).astype(np.float32)   # keep for x[l+1]
    bmask = jnp.asarray(bmask)

    # ---- channel-pad the 1x1 convs so in/out slabs are (Cv_p, W) --------------
    comp_w = jnp.pad(params["comp_w"], ((0, 0), (0, Cv_p - Cv)))
    out_w = jnp.pad(params["out_w"], ((0, Cv_p - Cv), (0, 0)))
    out_b = jnp.pad(params["out_b"], ((0, Cv_p - Cv), (0, 0)))

    args = (x_packed, comp_w, params["comp_b"], params["dwpack"], mats, bmask,
            params["attn_w"], params["attn_b"], out_w, out_b)

    def _whole(a):
        nd = a.ndim
        return pl.BlockSpec(a.shape, lambda g, _n=nd: (0,) * _n)

    in_specs = [pl.BlockSpec((1, Cv_p, W), lambda g: (g, 0, 0))]
    in_specs += [_whole(a) for a in args[1:]]

    kernel = _make_vp_kernel(q, H, D)

    out_packed = pl.pallas_call(
        kernel,
        out_shape=jax.ShapeDtypeStruct((G, Cv_p, W), jnp.float32),
        grid=(G,),
        in_specs=in_specs,
        out_specs=pl.BlockSpec((1, Cv_p, W), lambda g: (g, 0, 0)),
        compiler_params=pltpu.CompilerParams(
            dimension_semantics=("parallel",),      # shards batch groups on v7x
            vmem_limit_bytes=32 * 1024 * 1024),     # bumps v5e's 16 MiB default
    )(*args)

    out = out_packed.reshape(G, Cv_p, Bt, L).transpose(0, 2, 1, 3)
    return out.reshape(G * Bt, Cv_p, L)[:B, :Cv]


# ----------------------------------------------------------------------------
# Deterministic parameter construction (BatchNorm folded, packed layouts)
# ----------------------------------------------------------------------------
def init_params(key, Cv, D, q, num_heads):
    keys = iter(jax.random.split(key, 1024))

    def nk():
        return next(keys)

    def dw_taps():
        w = 0.2 * jax.random.normal(nk(), (D, 3), jnp.float32)
        b = 0.05 * jax.random.normal(nk(), (D, 1), jnp.float32)
        return w, b

    def bn_fold(w, b):
        # fold inference-mode BatchNorm1d (with its running stats) into taps/bias
        gamma = 1.0 + 0.1 * jax.random.normal(nk(), (D, 1), jnp.float32)
        beta = 0.05 * jax.random.normal(nk(), (D, 1), jnp.float32)
        mean = 0.05 * jax.random.normal(nk(), (D, 1), jnp.float32)
        var = 1.0 + 0.1 * jax.random.uniform(nk(), (D, 1), jnp.float32)
        g = gamma / jnp.sqrt(var + 1e-5)
        return g * w, g * b + beta - g * mean

    def pack(w, b):
        # (D,3) taps + (D,1) bias -> (4, D) column for the stacked conv pack
        return jnp.concatenate([w.T, b.T], axis=0)

    packs = []
    for _ in range(q):                           # compression phases (no BN)
        packs.append(pack(*dw_taps()))
    for _ in range(2 * q - 1):                   # q forward + (q-1) backward TFARs
        for _ in range(3):                       # branch order: w1, w2, w3
            w, b = dw_taps()
            wf, bfold = bn_fold(w, b)
            packs.append(pack(wf, bfold))
    dwpack = jnp.stack(packs, axis=-1)           # (4, D, q + 3*(2q-1))

    def dense(o, i, s=0.15):
        return s * jax.random.normal(nk(), (o, i), jnp.float32)

    def col(o, s=0.05):
        return s * jax.random.normal(nk(), (o, 1), jnp.float32)

    comp_w, comp_b = dense(D, Cv, 0.1), col(D)
    out_w, out_b = dense(Cv, D, 0.1), col(Cv)

    dh = D // num_heads
    scale = 1.0 / math.sqrt(dh)                  # folded into wq / bq
    wq, wk, wv, wo = dense(D, D), dense(D, D), dense(D, D), dense(D, D)
    bq, bk, bv, bo = col(D), col(D), col(D), col(D)
    attn_w = jnp.concatenate([wq * scale, wk, wv, wo], axis=0)   # (4D, D)
    attn_b = jnp.concatenate([bq * scale, bk, bv, bo], axis=0)   # (4D, 1)

    return dict(hidden_dim=D, q=q, num_heads=num_heads,
                comp_w=comp_w, comp_b=comp_b, dwpack=dwpack,
                attn_w=attn_w, attn_b=attn_b, out_w=out_w, out_b=out_b)


# ----------------------------------------------------------------------------
if __name__ == "__main__":
    B, Cv, L = 4, 4, 32          # (batch, video channels, sequence length)
    D = 32                       # hidden_dim
    q = 2                        # compression_multiplier
    num_heads = 4

    key = jax.random.PRNGKey(0)
    k_video, k_params = jax.random.split(key)
    video = jax.random.normal(k_video, (B, Cv, L), jnp.float32)
    params = init_params(k_params, Cv, D, q, num_heads)

    out = vp_block_forward(video, params)
    out = jax.block_until_ready(out)
    assert out.shape == (B, Cv, L), out.shape
    assert bool(jnp.all(jnp.isfinite(out))), "non-finite output"
    print("KERNEL_OK")
</pallas_src>

<mosaic_0001>
module attributes {stable_mosaic.version = 11 : i64} {
  func.func @kernel(%arg0: i32, %arg1: memref<1x8x64xf32, #tpu.memory_space<vmem>>, %arg2: memref<32x8xf32, #tpu.memory_space<vmem>>, %arg3: memref<32x1xf32, #tpu.memory_space<vmem>>, %arg4: memref<4x32x11xf32, #tpu.memory_space<vmem>>, %arg5: memref<5x64x64xf32, #tpu.memory_space<vmem>>, %arg6: memref<2x2x1x64xf32, #tpu.memory_space<vmem>>, %arg7: memref<128x32xf32, #tpu.memory_space<vmem>>, %arg8: memref<128x1xf32, #tpu.memory_space<vmem>>, %arg9: memref<8x32xf32, #tpu.memory_space<vmem>>, %arg10: memref<8x1xf32, #tpu.memory_space<vmem>>, %arg11: memref<1x8x64xf32, #tpu.memory_space<vmem>>) attributes {dimension_semantics = [#tpu.dimension_semantics<parallel>], iteration_bounds = array<i64: 2>, scalar_prefetch = 0 : i64, scratch_operands = 0 : i64, tpu.core_type = #tpu.core_type<tc>, window_params = [{transform_indices = @transform_0, window_bounds = array<i64: 1, 8, 64>}, {pipeline_mode = #tpu.pipeline_mode<synchronous>, transform_indices = @transform_1, window_bounds = array<i64: 32, 8>}, {pipeline_mode = #tpu.pipeline_mode<synchronous>, transform_indices = @transform_2, window_bounds = array<i64: 32, 1>}, {pipeline_mode = #tpu.pipeline_mode<synchronous>, transform_indices = @transform_3, window_bounds = array<i64: 4, 32, 11>}, {pipeline_mode = #tpu.pipeline_mode<synchronous>, transform_indices = @transform_4, window_bounds = array<i64: 5, 64, 64>}, {pipeline_mode = #tpu.pipeline_mode<synchronous>, transform_indices = @transform_5, window_bounds = array<i64: 2, 2, 1, 64>}, {pipeline_mode = #tpu.pipeline_mode<synchronous>, transform_indices = @transform_6, window_bounds = array<i64: 128, 32>}, {pipeline_mode = #tpu.pipeline_mode<synchronous>, transform_indices = @transform_7, window_bounds = array<i64: 128, 1>}, {pipeline_mode = #tpu.pipeline_mode<synchronous>, transform_indices = @transform_8, window_bounds = array<i64: 8, 32>}, {pipeline_mode = #tpu.pipeline_mode<synchronous>, transform_indices = @transform_9, window_bounds = array<i64: 8, 1>}, {transform_indices = @transform_10, window_bounds = array<i64: 1, 8, 64>}]} {
    %c0 = arith.constant 0 : index
    %c0_0 = arith.constant 0 : index
    %c0_1 = arith.constant 0 : index
    %0 = vector.load %arg1[%c0, %c0_0, %c0_1] : memref<1x8x64xf32, #tpu.memory_space<vmem>>, vector<1x8x64xf32>
    %1 = vector.shape_cast %0 : vector<1x8x64xf32> to vector<8x64xf32>
    %c0_2 = arith.constant 0 : index
    %c0_3 = arith.constant 0 : index
    %2 = vector.load %arg2[%c0_2, %c0_3] : memref<32x8xf32, #tpu.memory_space<vmem>>, vector<32x8xf32>
    %3 = arith.truncf %2 : vector<32x8xf32> to vector<32x8xbf16>
    %4 = arith.truncf %1 : vector<8x64xf32> to vector<8x64xbf16>
    %cst = arith.constant dense<0.000000e+00> : vector<32x64xf32>
    %5 = tpu.matmul %3, %4, %cst {dimension_numbers = #tpu.dot_dimension_numbers<[1], [0], [0], [1], [0, 0, 1, 1], [], []>} : vector<32x8xbf16>, vector<8x64xbf16>, vector<32x64xf32> -> vector<32x64xf32>
    %c0_4 = arith.constant 0 : index
    %c0_5 = arith.constant 0 : index
    %6 = vector.load %arg3[%c0_4, %c0_5] : memref<32x1xf32, #tpu.memory_space<vmem>>, vector<32x1xf32>
    %7 = vector.broadcast %6 : vector<32x1xf32> to vector<32x64xf32>
    %8 = arith.addf %5, %7 : vector<32x64xf32>
    %c0_6 = arith.constant 0 : index
    %c0_7 = arith.constant 0 : index
    %c0_8 = arith.constant 0 : index
    %9 = vector.load %arg4[%c0_6, %c0_7, %c0_8] : memref<4x32x11xf32, #tpu.memory_space<vmem>>, vector<1x32x1xf32>
    %10 = vector.shape_cast %9 : vector<1x32x1xf32> to vector<32x1xf32>
    %c1 = arith.constant 1 : index
    %c0_9 = arith.constant 0 : index
    %c0_10 = arith.constant 0 : index
    %11 = vector.load %arg4[%c1, %c0_9, %c0_10] : memref<4x32x11xf32, #tpu.memory_space<vmem>>, vector<1x32x1xf32>
    %12 = vector.shape_cast %11 : vector<1x32x1xf32> to vector<32x1xf32>
    %c2 = arith.constant 2 : index
    %c0_11 = arith.constant 0 : index
    %c0_12 = arith.constant 0 : index
    %13 = vector.load %arg4[%c2, %c0_11, %c0_12] : memref<4x32x11xf32, #tpu.memory_space<vmem>>, vector<1x32x1xf32>
    %14 = vector.shape_cast %13 : vector<1x32x1xf32> to vector<32x1xf32>
    %c3 = arith.constant 3 : index
    %c0_13 = arith.constant 0 : index
    %c0_14 = arith.constant 0 : index
    %15 = vector.load %arg4[%c3, %c0_13, %c0_14] : memref<4x32x11xf32, #tpu.memory_space<vmem>>, vector<1x32x1xf32>
    %16 = vector.shape_cast %15 : vector<1x32x1xf32> to vector<32x1xf32>
    %c0_15 = arith.constant 0 : index
    %c0_16 = arith.constant 0 : index
    %c0_17 = arith.constant 0 : index
    %c0_18 = arith.constant 0 : index
    %17 = vector.load %arg6[%c0_15, %c0_16, %c0_17, %c0_18] : memref<2x2x1x64xf32, #tpu.memory_space<vmem>>, vector<1x1x1x64xf32>
    %18 = vector.shape_cast %17 : vector<1x1x1x64xf32> to vector<1x64xf32>
    %c0_19 = arith.constant 0 : index
    %c1_20 = arith.constant 1 : index
    %c0_21 = arith.constant 0 : index
    %c0_22 = arith.constant 0 : index
    %19 = vector.load %arg6[%c0_19, %c1_20, %c0_21, %c0_22] : memref<2x2x1x64xf32, #tpu.memory_space<vmem>>, vector<1x1x1x64xf32>
    %20 = vector.shape_cast %19 : vector<1x1x1x64xf32> to vector<1x64xf32>
    %cst_23 = arith.constant 0.000000e+00 : f32
    %21 = vector.broadcast %cst_23 : f32 to vector<32x1xf32>
    %22 = vector.extract_strided_slice %8 {offsets = [0, 0], sizes = [32, 63], strides = [1, 1]} : vector<32x64xf32> to vector<32x63xf32>
    %23 = tpu.concatenate %21, %22 in 1 : vector<32x1xf32>, vector<32x63xf32> -> vector<32x64xf32>
    %24 = vector.broadcast %18 : vector<1x64xf32> to vector<32x64xf32>
    %25 = arith.mulf %23, %24 : vector<32x64xf32>
    %26 = vector.extract_strided_slice %8 {offsets = [0, 1], sizes = [32, 63], strides = [1, 1]} : vector<32x64xf32> to vector<32x63xf32>
    %27 = tpu.concatenate %26, %21 in 1 : vector<32x63xf32>, vector<32x1xf32> -> vector<32x64xf32>
    %28 = vector.broadcast %20 : vector<1x64xf32> to vector<32x64xf32>
    %29 = arith.mulf %27, %28 : vector<32x64xf32>
    %30 = vector.broadcast %10 : vector<32x1xf32> to vector<32x64xf32>
    %31 = arith.mulf %30, %25 : vector<32x64xf32>
    %32 = vector.broadcast %12 : vector<32x1xf32> to vector<32x64xf32>
    %33 = arith.mulf %32, %8 : vector<32x64xf32>
    %34 = arith.addf %31, %33 : vector<32x64xf32>
    %35 = vector.broadcast %14 : vector<32x1xf32> to vector<32x64xf32>
    %36 = arith.mulf %35, %29 : vector<32x64xf32>
    %37 = arith.addf %34, %36 : vector<32x64xf32>
    %38 = vector.broadcast %16 : vector<32x1xf32> to vector<32x64xf32>
    %39 = arith.addf %37, %38 : vector<32x64xf32>
    %c0_24 = arith.constant 0 : index
    %c0_25 = arith.constant 0 : index
    %c1_26 = arith.constant 1 : index
    %40 = vector.load %arg4[%c0_24, %c0_25, %c1_26] : memref<4x32x11xf32, #tpu.memory_space<vmem>>, vector<1x32x1xf32>
    %41 = vector.shape_cast %40 : vector<1x32x1xf32> to vector<32x1xf32>
    %c1_27 = arith.constant 1 : index
    %c0_28 = arith.constant 0 : index
    %c1_29 = arith.constant 1 : index
    %42 = vector.load %arg4[%c1_27, %c0_28, %c1_29] : memref<4x32x11xf32, #tpu.memory_space<vmem>>, vector<1x32x1xf32>
    %43 = vector.shape_cast %42 : vector<1x32x1xf32> to vector<32x1xf32>
    %c2_30 = arith.constant 2 : index
    %c0_31 = arith.constant 0 : index
    %c1_32 = arith.constant 1 : index
    %44 = vector.load %arg4[%c2_30, %c0_31, %c1_32] : memref<4x32x11xf32, #tpu.memory_space<vmem>>, vector<1x32x1xf32>
    %45 = vector.shape_cast %44 : vector<1x32x1xf32> to vector<32x1xf32>
    %c3_33 = arith.constant 3 : index
    %c0_34 = arith.constant 0 : index
    %c1_35 = arith.constant 1 : index
    %46 = vector.load %arg4[%c3_33, %c0_34, %c1_35] : memref<4x32x11xf32, #tpu.memory_space<vmem>>, vector<1x32x1xf32>
    %47 = vector.shape_cast %46 : vector<1x32x1xf32> to vector<32x1xf32>
    %48 = vector.extract_strided_slice %39 {offsets = [0, 1], sizes = [32, 63], strides = [1, 1]} : vector<32x64xf32> to vector<32x63xf32>
    %cst_36 = arith.constant 0.000000e+00 : f32
    %49 = vector.broadcast %cst_36 : f32 to vector<32x1xf32>
    %50 = tpu.concatenate %48, %49 in 1 : vector<32x63xf32>, vector<32x1xf32> -> vector<32x64xf32>
    %51 = vector.extract_strided_slice %39 {offsets = [0, 2], sizes = [32, 62], strides = [1, 1]} : vector<32x64xf32> to vector<32x62xf32>
    %cst_37 = arith.constant 0.000000e+00 : f32
    %52 = vector.broadcast %cst_37 : f32 to vector<32x2xf32>
    %53 = tpu.concatenate %51, %52 in 1 : vector<32x62xf32>, vector<32x2xf32> -> vector<32x64xf32>
    %54 = vector.broadcast %41 : vector<32x1xf32> to vector<32x64xf32>
    %55 = arith.mulf %54, %39 : vector<32x64xf32>
    %56 = vector.broadcast %43 : vector<32x1xf32> to vector<32x64xf32>
    %57 = arith.mulf %56, %50 : vector<32x64xf32>
    %58 = arith.addf %55, %57 : vector<32x64xf32>
    %59 = vector.broadcast %45 : vector<32x1xf32> to vector<32x64xf32>
    %60 = arith.mulf %59, %53 : vector<32x64xf32>
    %61 = arith.addf %58, %60 : vector<32x64xf32>
    %c1_38 = arith.constant 1 : index
    %c0_39 = arith.constant 0 : index
    %c0_40 = arith.constant 0 : index
    %62 = vector.load %arg5[%c1_38, %c0_39, %c0_40] : memref<5x64x64xf32, #tpu.memory_space<vmem>>, vector<1x64x64xf32>
    %63 = vector.shape_cast %62 : vector<1x64x64xf32> to vector<64x64xf32>
    %64 = arith.truncf %61 : vector<32x64xf32> to vector<32x64xbf16>
    %65 = arith.truncf %63 : vector<64x64xf32> to vector<64x64xbf16>
    %cst_41 = arith.constant dense<0.000000e+00> : vector<32x64xf32>
    %66 = tpu.matmul %64, %65, %cst_41 {dimension_numbers = #tpu.dot_dimension_numbers<[1], [0], [0], [1], [0, 0, 1, 1], [], []>} : vector<32x64xbf16>, vector<64x64xbf16>, vector<32x64xf32> -> vector<32x64xf32>
    %67 = vector.broadcast %47 : vector<32x1xf32> to vector<32x64xf32>
    %68 = arith.addf %66, %67 : vector<32x64xf32>
    %c2_42 = arith.constant 2 : index
    %c0_43 = arith.constant 0 : index
    %c0_44 = arith.constant 0 : index
    %69 = vector.load %arg5[%c2_42, %c0_43, %c0_44] : memref<5x64x64xf32, #tpu.memory_space<vmem>>, vector<1x64x64xf32>
    %70 = vector.shape_cast %69 : vector<1x64x64xf32> to vector<64x64xf32>
    %cst_45 = arith.constant dense<0.000000e+00> : vector<32x64xf32>
    %71 = tpu.matmul %39, %70, %cst_45 {dimension_numbers = #tpu.dot_dimension_numbers<[1], [0], [0], [1], [0, 0, 1, 1], [], []>} : vector<32x64xf32>, vector<64x64xf32>, vector<32x64xf32> -> vector<32x64xf32>
    %72 = arith.addf %68, %71 : vector<32x64xf32>
    %c0_46 = arith.constant 0 : index
    %c0_47 = arith.constant 0 : index
    %73 = vector.load %arg7[%c0_46, %c0_47] : memref<128x32xf32, #tpu.memory_space<vmem>>, vector<96x32xf32>
    %c96 = arith.constant 96 : index
    %c0_48 = arith.constant 0 : index
    %74 = vector.load %arg7[%c96, %c0_48] : memref<128x32xf32, #tpu.memory_space<vmem>>, vector<32x32xf32>
    %c0_49 = arith.constant 0 : index
    %c0_50 = arith.constant 0 : index
    %75 = vector.load %arg8[%c0_49, %c0_50] : memref<128x1xf32, #tpu.memory_space<vmem>>, vector<96x1xf32>
    %c96_51 = arith.constant 96 : index
    %c0_52 = arith.constant 0 : index
    %76 = vector.load %arg8[%c96_51, %c0_52] : memref<128x1xf32, #tpu.memory_space<vmem>>, vector<32x1xf32>
    %77 = arith.truncf %73 : vector<96x32xf32> to vector<96x32xbf16>
    %78 = arith.truncf %72 : vector<32x64xf32> to vector<32x64xbf16>
    %cst_53 = arith.constant dense<0.000000e+00> : vector<96x64xf32>
    %79 = tpu.matmul %77, %78, %cst_53 {dimension_numbers = #tpu.dot_dimension_numbers<[1], [0], [0], [1], [0, 0, 1, 1], [], []>} : vector<96x32xbf16>, vector<32x64xbf16>, vector<96x64xf32> -> vector<96x64xf32>
    %80 = vector.broadcast %75 : vector<96x1xf32> to vector<96x64xf32>
    %81 = arith.addf %79, %80 : vector<96x64xf32>
    %82 = vector.shape_cast %81 : vector<96x64xf32> to vector<3x4x8x64xf32>
    %83 = vector.extract_strided_slice %82 {offsets = [0, 0, 0, 0], sizes = [1, 4, 8, 64], strides = [1, 1, 1, 1]} : vector<3x4x8x64xf32> to vector<1x4x8x64xf32>
    %84 = vector.shape_cast %83 : vector<1x4x8x64xf32> to vector<4x8x64xf32>
    %85 = vector.extract_strided_slice %82 {offsets = [1, 0, 0, 0], sizes = [1, 4, 8, 64], strides = [1, 1, 1, 1]} : vector<3x4x8x64xf32> to vector<1x4x8x64xf32>
    %86 = vector.shape_cast %85 : vector<1x4x8x64xf32> to vector<4x8x64xf32>
    %87 = vector.extract_strided_slice %82 {offsets = [2, 0, 0, 0], sizes = [1, 4, 8, 64], strides = [1, 1, 1, 1]} : vector<3x4x8x64xf32> to vector<1x4x8x64xf32>
    %88 = vector.shape_cast %87 : vector<1x4x8x64xf32> to vector<4x8x64xf32>
    %89 = arith.truncf %84 : vector<4x8x64xf32> to vector<4x8x64xbf16>
    %90 = arith.truncf %86 : vector<4x8x64xf32> to vector<4x8x64xbf16>
    "tpu.trace_start"() <{level = 10 : i32, message = "hdq,hdk->hqk"}> : () -> ()
    %cst_54 = arith.constant dense<0.000000e+00> : vector<4x64x64xf32>
    %91 = tpu.matmul %89, %90, %cst_54 {dimension_numbers = #tpu.dot_dimension_numbers<[1], [1], [2], [2], [0, 0, 0, 2, 1, 2], [0], [0]>} : vector<4x8x64xbf16>, vector<4x8x64xbf16>, vector<4x64x64xf32> -> vector<4x64x64xf32>
    "tpu.trace_stop"() : () -> ()
    %c0_55 = arith.constant 0 : index
    %c0_56 = arith.constant 0 : index
    %c0_57 = arith.constant 0 : index
    %92 = vector.load %arg5[%c0_55, %c0_56, %c0_57] : memref<5x64x64xf32, #tpu.memory_space<vmem>>, vector<1x64x64xf32>
    %93 = vector.shape_cast %92 : vector<1x64x64xf32> to vector<64x64xf32>
    %94 = vector.shape_cast %93 : vector<64x64xf32> to vector<1x64x64xf32>
    %95 = vector.broadcast %94 : vector<1x64x64xf32> to vector<4x64x64xf32>
    %96 = arith.addf %91, %95 : vector<4x64x64xf32>
    %cst_58 = arith.constant dense<0xFF800000> : vector<4x64xf32>
    %97 = vector.multi_reduction <maximumf>, %96, %cst_58 [2] : vector<4x64x64xf32> to vector<4x64xf32>
    %98 = vector.shape_cast %97 : vector<4x64xf32> to vector<4x64x1xf32>
    %99 = vector.broadcast %98 : vector<4x64x1xf32> to vector<4x64x64xf32>
    %100 = arith.subf %96, %99 : vector<4x64x64xf32>
    %101 = math.exp %100 : vector<4x64x64xf32>
    %cst_59 = arith.constant dense<0.000000e+00> : vector<4x64xf32>
    %102 = vector.multi_reduction <add>, %101, %cst_59 [2] : vector<4x64x64xf32> to vector<4x64xf32>
    %103 = vector.shape_cast %102 : vector<4x64xf32> to vector<4x64x1xf32>
    %104 = tpu.reciprocal %103 {approx = true} : vector<4x64x1xf32> -> vector<4x64x1xf32>
    %105 = vector.broadcast %104 : vector<4x64x1xf32> to vector<4x64x64xf32>
    %106 = arith.mulf %101, %105 : vector<4x64x64xf32>
    %107 = arith.truncf %88 : vector<4x8x64xf32> to vector<4x8x64xbf16>
    %108 = arith.truncf %106 : vector<4x64x64xf32> to vector<4x64x64xbf16>
    "tpu.trace_start"() <{level = 10 : i32, message = "hdk,hqk->hdq"}> : () -> ()
    %cst_60 = arith.constant dense<0.000000e+00> : vector<4x8x64xf32>
    %109 = tpu.matmul %107, %108, %cst_60 {dimension_numbers = #tpu.dot_dimension_numbers<[2], [2], [1], [1], [0, 0, 0, 1, 1, 1], [0], [0]>} : vector<4x8x64xbf16>, vector<4x64x64xbf16>, vector<4x8x64xf32> -> vector<4x8x64xf32>
    "tpu.trace_stop"() : () -> ()
    %110 = vector.shape_cast %109 : vector<4x8x64xf32> to vector<32x64xf32>
    %111 = arith.truncf %74 : vector<32x32xf32> to vector<32x32xbf16>
    %112 = arith.truncf %110 : vector<32x64xf32> to vector<32x64xbf16>
    %cst_61 = arith.constant dense<0.000000e+00> : vector<32x64xf32>
    %113 = tpu.matmul %111, %112, %cst_61 {dimension_numbers = #tpu.dot_dimension_numbers<[1], [0], [0], [1], [0, 0, 1, 1], [], []>} : vector<32x32xbf16>, vector<32x64xbf16>, vector<32x64xf32> -> vector<32x64xf32>
    %114 = vector.broadcast %76 : vector<32x1xf32> to vector<32x64xf32>
    %115 = arith.addf %113, %114 : vector<32x64xf32>
    %116 = arith.addf %115, %72 : vector<32x64xf32>
    %c0_62 = arith.constant 0 : index
    %c0_63 = arith.constant 0 : index
    %c5 = arith.constant 5 : index
    %117 = vector.load %arg4[%c0_62, %c0_63, %c5] : memref<4x32x11xf32, #tpu.memory_space<vmem>>, vector<1x32x1xf32>
    %118 = vector.shape_cast %117 : vector<1x32x1xf32> to vector<32x1xf32>
    %c1_64 = arith.constant 1 : index
    %c0_65 = arith.constant 0 : index
    %c5_66 = arith.constant 5 : index
    %119 = vector.load %arg4[%c1_64, %c0_65, %c5_66] : memref<4x32x11xf32, #tpu.memory_space<vmem>>, vector<1x32x1xf32>
    %120 = vector.shape_cast %119 : vector<1x32x1xf32> to vector<32x1xf32>
    %c2_67 = arith.constant 2 : index
    %c0_68 = arith.constant 0 : index
    %c5_69 = arith.constant 5 : index
    %121 = vector.load %arg4[%c2_67, %c0_68, %c5_69] : memref<4x32x11xf32, #tpu.memory_space<vmem>>, vector<1x32x1xf32>
    %122 = vector.shape_cast %121 : vector<1x32x1xf32> to vector<32x1xf32>
    %c3_70 = arith.constant 3 : index
    %c0_71 = arith.constant 0 : index
    %c5_72 = arith.constant 5 : index
    %123 = vector.load %arg4[%c3_70, %c0_71, %c5_72] : memref<4x32x11xf32, #tpu.memory_space<vmem>>, vector<1x32x1xf32>
    %124 = vector.shape_cast %123 : vector<1x32x1xf32> to vector<32x1xf32>
    %c1_73 = arith.constant 1 : index
    %c0_74 = arith.constant 0 : index
    %c0_75 = arith.constant 0 : index
    %c0_76 = arith.constant 0 : index
    %125 = vector.load %arg6[%c1_73, %c0_74, %c0_75, %c0_76] : memref<2x2x1x64xf32, #tpu.memory_space<vmem>>, vector<1x1x1x64xf32>
    %126 = vector.shape_cast %125 : vector<1x1x1x64xf32> to vector<1x64xf32>
    %c1_77 = arith.constant 1 : index
    %c1_78 = arith.constant 1 : index
    %c0_79 = arith.constant 0 : index
    %c0_80 = arith.constant 0 : index
    %127 = vector.load %arg6[%c1_77, %c1_78, %c0_79, %c0_80] : memref<2x2x1x64xf32, #tpu.memory_space<vmem>>, vector<1x1x1x64xf32>
    %128 = vector.shape_cast %127 : vector<1x1x1x64xf32> to vector<1x64xf32>
    %cst_81 = arith.constant 0.000000e+00 : f32
    %129 = vector.broadcast %cst_81 : f32 to vector<32x1xf32>
    %130 = vector.extract_strided_slice %116 {offsets = [0, 0], sizes = [32, 63], strides = [1, 1]} : vector<32x64xf32> to vector<32x63xf32>
    %131 = tpu.concatenate %129, %130 in 1 : vector<32x1xf32>, vector<32x63xf32> -> vector<32x64xf32>
    %132 = vector.broadcast %126 : vector<1x64xf32> to vector<32x64xf32>
    %133 = arith.mulf %131, %132 : vector<32x64xf32>
    %134 = vector.extract_strided_slice %116 {offsets = [0, 1], sizes = [32, 63], strides = [1, 1]} : vector<32x64xf32> to vector<32x63xf32>
    %135 = tpu.concatenate %134, %129 in 1 : vector<32x63xf32>, vector<32x1xf32> -> vector<32x64xf32>
    %136 = vector.broadcast %128 : vector<1x64xf32> to vector<32x64xf32>
    %137 = arith.mulf %135, %136 : vector<32x64xf32>
    %138 = vector.broadcast %118 : vector<32x1xf32> to vector<32x64xf32>
    %139 = arith.mulf %138, %133 : vector<32x64xf32>
    %140 = vector.broadcast %120 : vector<32x1xf32> to vector<32x64xf32>
    %141 = arith.mulf %140, %116 : vector<32x64xf32>
    %142 = arith.addf %139, %141 : vector<32x64xf32>
    %143 = vector.broadcast %122 : vector<32x1xf32> to vector<32x64xf32>
    %144 = arith.mulf %143, %137 : vector<32x64xf32>
    %145 = arith.addf %142, %144 : vector<32x64xf32>
    %146 = vector.broadcast %124 : vector<32x1xf32> to vector<32x64xf32>
    %147 = arith.addf %145, %146 : vector<32x64xf32>
    %148 = arith.negf %147 : vector<32x64xf32>
    %149 = math.exp %148 : vector<32x64xf32>
    %cst_82 = arith.constant 1.000000e+00 : f32
    %150 = vector.broadcast %cst_82 : f32 to vector<32x64xf32>
    %151 = arith.addf %150, %149 : vector<32x64xf32>
    %152 = arith.divf %150, %151 : vector<32x64xf32>
    %c0_83 = arith.constant 0 : index
    %c0_84 = arith.constant 0 : index
    %c6 = arith.constant 6 : index
    %153 = vector.load %arg4[%c0_83, %c0_84, %c6] : memref<4x32x11xf32, #tpu.memory_space<vmem>>, vector<1x32x1xf32>
    %154 = vector.shape_cast %153 : vector<1x32x1xf32> to vector<32x1xf32>
    %c1_85 = arith.constant 1 : index
    %c0_86 = arith.constant 0 : index
    %c6_87 = arith.constant 6 : index
    %155 = vector.load %arg4[%c1_85, %c0_86, %c6_87] : memref<4x32x11xf32, #tpu.memory_space<vmem>>, vector<1x32x1xf32>
    %156 = vector.shape_cast %155 : vector<1x32x1xf32> to vector<32x1xf32>
    %c2_88 = arith.constant 2 : index
    %c0_89 = arith.constant 0 : index
    %c6_90 = arith.constant 6 : index
    %157 = vector.load %arg4[%c2_88, %c0_89, %c6_90] : memref<4x32x11xf32, #tpu.memory_space<vmem>>, vector<1x32x1xf32>
    %158 = vector.shape_cast %157 : vector<1x32x1xf32> to vector<32x1xf32>
    %c3_91 = arith.constant 3 : index
    %c0_92 = arith.constant 0 : index
    %c6_93 = arith.constant 6 : index
    %159 = vector.load %arg4[%c3_91, %c0_92, %c6_93] : memref<4x32x11xf32, #tpu.memory_space<vmem>>, vector<1x32x1xf32>
    %160 = vector.shape_cast %159 : vector<1x32x1xf32> to vector<32x1xf32>
    %c1_94 = arith.constant 1 : index
    %c0_95 = arith.constant 0 : index
    %c0_96 = arith.constant 0 : index
    %c0_97 = arith.constant 0 : index
    %161 = vector.load %arg6[%c1_94, %c0_95, %c0_96, %c0_97] : memref<2x2x1x64xf32, #tpu.memory_space<vmem>>, vector<1x1x1x64xf32>
    %162 = vector.shape_cast %161 : vector<1x1x1x64xf32> to vector<1x64xf32>
    %c1_98 = arith.constant 1 : index
    %c1_99 = arith.constant 1 : index
    %c0_100 = arith.constant 0 : index
    %c0_101 = arith.constant 0 : index
    %163 = vector.load %arg6[%c1_98, %c1_99, %c0_100, %c0_101] : memref<2x2x1x64xf32, #tpu.memory_space<vmem>>, vector<1x1x1x64xf32>
    %164 = vector.shape_cast %163 : vector<1x1x1x64xf32> to vector<1x64xf32>
    %cst_102 = arith.constant 0.000000e+00 : f32
    %165 = vector.broadcast %cst_102 : f32 to vector<32x1xf32>
    %166 = vector.extract_strided_slice %68 {offsets = [0, 0], sizes = [32, 63], strides = [1, 1]} : vector<32x64xf32> to vector<32x63xf32>
    %167 = tpu.concatenate %165, %166 in 1 : vector<32x1xf32>, vector<32x63xf32> -> vector<32x64xf32>
    %168 = vector.broadcast %162 : vector<1x64xf32> to vector<32x64xf32>
    %169 = arith.mulf %167, %168 : vector<32x64xf32>
    %170 = vector.extract_strided_slice %68 {offsets = [0, 1], sizes = [32, 63], strides = [1, 1]} : vector<32x64xf32> to vector<32x63xf32>
    %171 = tpu.concatenate %170, %165 in 1 : vector<32x63xf32>, vector<32x1xf32> -> vector<32x64xf32>
    %172 = vector.broadcast %164 : vector<1x64xf32> to vector<32x64xf32>
    %173 = arith.mulf %171, %172 : vector<32x64xf32>
    %174 = vector.broadcast %154 : vector<32x1xf32> to vector<32x64xf32>
    %175 = arith.mulf %174, %169 : vector<32x64xf32>
    %176 = vector.broadcast %156 : vector<32x1xf32> to vector<32x64xf32>
    %177 = arith.mulf %176, %68 : vector<32x64xf32>
    %178 = arith.addf %175, %177 : vector<32x64xf32>
    %179 = vector.broadcast %158 : vector<32x1xf32> to vector<32x64xf32>
    %180 = arith.mulf %179, %173 : vector<32x64xf32>
    %181 = arith.addf %178, %180 : vector<32x64xf32>
    %182 = vector.broadcast %160 : vector<32x1xf32> to vector<32x64xf32>
    %183 = arith.addf %181, %182 : vector<32x64xf32>
    %c0_103 = arith.constant 0 : index
    %c0_104 = arith.constant 0 : index
    %c7 = arith.constant 7 : index
    %184 = vector.load %arg4[%c0_103, %c0_104, %c7] : memref<4x32x11xf32, #tpu.memory_space<vmem>>, vector<1x32x1xf32>
    %185 = vector.shape_cast %184 : vector<1x32x1xf32> to vector<32x1xf32>
    %c1_105 = arith.constant 1 : index
    %c0_106 = arith.constant 0 : index
    %c7_107 = arith.constant 7 : index
    %186 = vector.load %arg4[%c1_105, %c0_106, %c7_107] : memref<4x32x11xf32, #tpu.memory_space<vmem>>, vector<1x32x1xf32>
    %187 = vector.shape_cast %186 : vector<1x32x1xf32> to vector<32x1xf32>
    %c2_108 = arith.constant 2 : index
    %c0_109 = arith.constant 0 : index
    %c7_110 = arith.constant 7 : index
    %188 = vector.load %arg4[%c2_108, %c0_109, %c7_110] : memref<4x32x11xf32, #tpu.memory_space<vmem>>, vector<1x32x1xf32>
    %189 = vector.shape_cast %188 : vector<1x32x1xf32> to vector<32x1xf32>
    %c3_111 = arith.constant 3 : index
    %c0_112 = arith.constant 0 : index
    %c7_113 = arith.constant 7 : index
    %190 = vector.load %arg4[%c3_111, %c0_112, %c7_113] : memref<4x32x11xf32, #tpu.memory_space<vmem>>, vector<1x32x1xf32>
    %191 = vector.shape_cast %190 : vector<1x32x1xf32> to vector<32x1xf32>
    %c1_114 = arith.constant 1 : index
    %c0_115 = arith.constant 0 : index
    %c0_116 = arith.constant 0 : index
    %c0_117 = arith.constant 0 : index
    %192 = vector.load %arg6[%c1_114, %c0_115, %c0_116, %c0_117] : memref<2x2x1x64xf32, #tpu.memory_space<vmem>>, vector<1x1x1x64xf32>
    %193 = vector.shape_cast %192 : vector<1x1x1x64xf32> to vector<1x64xf32>
    %c1_118 = arith.constant 1 : index
    %c1_119 = arith.constant 1 : index
    %c0_120 = arith.constant 0 : index
    %c0_121 = arith.constant 0 : index
    %194 = vector.load %arg6[%c1_118, %c1_119, %c0_120, %c0_121] : memref<2x2x1x64xf32, #tpu.memory_space<vmem>>, vector<1x1x1x64xf32>
    %195 = vector.shape_cast %194 : vector<1x1x1x64xf32> to vector<1x64xf32>
    %cst_122 = arith.constant 0.000000e+00 : f32
    %196 = vector.broadcast %cst_122 : f32 to vector<32x1xf32>
    %197 = vector.extract_strided_slice %116 {offsets = [0, 0], sizes = [32, 63], strides = [1, 1]} : vector<32x64xf32> to vector<32x63xf32>
    %198 = tpu.concatenate %196, %197 in 1 : vector<32x1xf32>, vector<32x63xf32> -> vector<32x64xf32>
    %199 = vector.broadcast %193 : vector<1x64xf32> to vector<32x64xf32>
    %200 = arith.mulf %198, %199 : vector<32x64xf32>
    %201 = vector.extract_strided_slice %116 {offsets = [0, 1], sizes = [32, 63], strides = [1, 1]} : vector<32x64xf32> to vector<32x63xf32>
    %202 = tpu.concatenate %201, %196 in 1 : vector<32x63xf32>, vector<32x1xf32> -> vector<32x64xf32>
    %203 = vector.broadcast %195 : vector<1x64xf32> to vector<32x64xf32>
    %204 = arith.mulf %202, %203 : vector<32x64xf32>
    %205 = vector.broadcast %185 : vector<32x1xf32> to vector<32x64xf32>
    %206 = arith.mulf %205, %200 : vector<32x64xf32>
    %207 = vector.broadcast %187 : vector<32x1xf32> to vector<32x64xf32>
    %208 = arith.mulf %207, %116 : vector<32x64xf32>
    %209 = arith.addf %206, %208 : vector<32x64xf32>
    %210 = vector.broadcast %189 : vector<32x1xf32> to vector<32x64xf32>
    %211 = arith.mulf %210, %204 : vector<32x64xf32>
    %212 = arith.addf %209, %211 : vector<32x64xf32>
    %213 = vector.broadcast %191 : vector<32x1xf32> to vector<32x64xf32>
    %214 = arith.addf %212, %213 : vector<32x64xf32>
    %215 = arith.mulf %152, %183 : vector<32x64xf32>
    %216 = arith.addf %215, %214 : vector<32x64xf32>
    %c0_123 = arith.constant 0 : index
    %c0_124 = arith.constant 0 : index
    %c2_125 = arith.constant 2 : index
    %217 = vector.load %arg4[%c0_123, %c0_124, %c2_125] : memref<4x32x11xf32, #tpu.memory_space<vmem>>, vector<1x32x1xf32>
    %218 = vector.shape_cast %217 : vector<1x32x1xf32> to vector<32x1xf32>
    %c1_126 = arith.constant 1 : index
    %c0_127 = arith.constant 0 : index
    %c2_128 = arith.constant 2 : index
    %219 = vector.load %arg4[%c1_126, %c0_127, %c2_128] : memref<4x32x11xf32, #tpu.memory_space<vmem>>, vector<1x32x1xf32>
    %220 = vector.shape_cast %219 : vector<1x32x1xf32> to vector<32x1xf32>
    %c2_129 = arith.constant 2 : index
    %c0_130 = arith.constant 0 : index
    %c2_131 = arith.constant 2 : index
    %221 = vector.load %arg4[%c2_129, %c0_130, %c2_131] : memref<4x32x11xf32, #tpu.memory_space<vmem>>, vector<1x32x1xf32>
    %222 = vector.shape_cast %221 : vector<1x32x1xf32> to vector<32x1xf32>
    %c3_132 = arith.constant 3 : index
    %c0_133 = arith.constant 0 : index
    %c2_134 = arith.constant 2 : index
    %223 = vector.load %arg4[%c3_132, %c0_133, %c2_134] : memref<4x32x11xf32, #tpu.memory_space<vmem>>, vector<1x32x1xf32>
    %224 = vector.shape_cast %223 : vector<1x32x1xf32> to vector<32x1xf32>
    %c1_135 = arith.constant 1 : index
    %c0_136 = arith.constant 0 : index
    %c0_137 = arith.constant 0 : index
    %c0_138 = arith.constant 0 : index
    %225 = vector.load %arg6[%c1_135, %c0_136, %c0_137, %c0_138] : memref<2x2x1x64xf32, #tpu.memory_space<vmem>>, vector<1x1x1x64xf32>
    %226 = vector.shape_cast %225 : vector<1x1x1x64xf32> to vector<1x64xf32>
    %c1_139 = arith.constant 1 : index
    %c1_140 = arith.constant 1 : index
    %c0_141 = arith.constant 0 : index
    %c0_142 = arith.constant 0 : index
    %227 = vector.load %arg6[%c1_139, %c1_140, %c0_141, %c0_142] : memref<2x2x1x64xf32, #tpu.memory_space<vmem>>, vector<1x1x1x64xf32>
    %228 = vector.shape_cast %227 : vector<1x1x1x64xf32> to vector<1x64xf32>
    %cst_143 = arith.constant 0.000000e+00 : f32
    %229 = vector.broadcast %cst_143 : f32 to vector<32x1xf32>
    %230 = vector.extract_strided_slice %116 {offsets = [0, 0], sizes = [32, 63], strides = [1, 1]} : vector<32x64xf32> to vector<32x63xf32>
    %231 = tpu.concatenate %229, %230 in 1 : vector<32x1xf32>, vector<32x63xf32> -> vector<32x64xf32>
    %232 = vector.broadcast %226 : vector<1x64xf32> to vector<32x64xf32>
    %233 = arith.mulf %231, %232 : vector<32x64xf32>
    %234 = vector.extract_strided_slice %116 {offsets = [0, 1], sizes = [32, 63], strides = [1, 1]} : vector<32x64xf32> to vector<32x63xf32>
    %235 = tpu.concatenate %234, %229 in 1 : vector<32x63xf32>, vector<32x1xf32> -> vector<32x64xf32>
    %236 = vector.broadcast %228 : vector<1x64xf32> to vector<32x64xf32>
    %237 = arith.mulf %235, %236 : vector<32x64xf32>
    %238 = vector.broadcast %218 : vector<32x1xf32> to vector<32x64xf32>
    %239 = arith.mulf %238, %233 : vector<32x64xf32>
    %240 = vector.broadcast %220 : vector<32x1xf32> to vector<32x64xf32>
    %241 = arith.mulf %240, %116 : vector<32x64xf32>
    %242 = arith.addf %239, %241 : vector<32x64xf32>
    %243 = vector.broadcast %222 : vector<32x1xf32> to vector<32x64xf32>
    %244 = arith.mulf %243, %237 : vector<32x64xf32>
    %245 = arith.addf %242, %244 : vector<32x64xf32>
    %246 = vector.broadcast %224 : vector<32x1xf32> to vector<32x64xf32>
    %247 = arith.addf %245, %246 : vector<32x64xf32>
    %248 = arith.negf %247 : vector<32x64xf32>
    %249 = math.exp %248 : vector<32x64xf32>
    %cst_144 = arith.constant 1.000000e+00 : f32
    %250 = vector.broadcast %cst_144 : f32 to vector<32x64xf32>
    %251 = arith.addf %250, %249 : vector<32x64xf32>
    %252 = arith.divf %250, %251 : vector<32x64xf32>
    %c0_145 = arith.constant 0 : index
    %c0_146 = arith.constant 0 : index
    %c3_147 = arith.constant 3 : index
    %253 = vector.load %arg4[%c0_145, %c0_146, %c3_147] : memref<4x32x11xf32, #tpu.memory_space<vmem>>, vector<1x32x1xf32>
    %254 = vector.shape_cast %253 : vector<1x32x1xf32> to vector<32x1xf32>
    %c1_148 = arith.constant 1 : index
    %c0_149 = arith.constant 0 : index
    %c3_150 = arith.constant 3 : index
    %255 = vector.load %arg4[%c1_148, %c0_149, %c3_150] : memref<4x32x11xf32, #tpu.memory_space<vmem>>, vector<1x32x1xf32>
    %256 = vector.shape_cast %255 : vector<1x32x1xf32> to vector<32x1xf32>
    %c2_151 = arith.constant 2 : index
    %c0_152 = arith.constant 0 : index
    %c3_153 = arith.constant 3 : index
    %257 = vector.load %arg4[%c2_151, %c0_152, %c3_153] : memref<4x32x11xf32, #tpu.memory_space<vmem>>, vector<1x32x1xf32>
    %258 = vector.shape_cast %257 : vector<1x32x1xf32> to vector<32x1xf32>
    %c3_154 = arith.constant 3 : index
    %c0_155 = arith.constant 0 : index
    %c3_156 = arith.constant 3 : index
    %259 = vector.load %arg4[%c3_154, %c0_155, %c3_156] : memref<4x32x11xf32, #tpu.memory_space<vmem>>, vector<1x32x1xf32>
    %260 = vector.shape_cast %259 : vector<1x32x1xf32> to vector<32x1xf32>
    %c0_157 = arith.constant 0 : index
    %c0_158 = arith.constant 0 : index
    %c0_159 = arith.constant 0 : index
    %c0_160 = arith.constant 0 : index
    %261 = vector.load %arg6[%c0_157, %c0_158, %c0_159, %c0_160] : memref<2x2x1x64xf32, #tpu.memory_space<vmem>>, vector<1x1x1x64xf32>
    %262 = vector.shape_cast %261 : vector<1x1x1x64xf32> to vector<1x64xf32>
    %c0_161 = arith.constant 0 : index
    %c1_162 = arith.constant 1 : index
    %c0_163 = arith.constant 0 : index
    %c0_164 = arith.constant 0 : index
    %263 = vector.load %arg6[%c0_161, %c1_162, %c0_163, %c0_164] : memref<2x2x1x64xf32, #tpu.memory_space<vmem>>, vector<1x1x1x64xf32>
    %264 = vector.shape_cast %263 : vector<1x1x1x64xf32> to vector<1x64xf32>
    %cst_165 = arith.constant 0.000000e+00 : f32
    %265 = vector.broadcast %cst_165 : f32 to vector<32x1xf32>
    %266 = vector.extract_strided_slice %39 {offsets = [0, 0], sizes = [32, 63], strides = [1, 1]} : vector<32x64xf32> to vector<32x63xf32>
    %267 = tpu.concatenate %265, %266 in 1 : vector<32x1xf32>, vector<32x63xf32> -> vector<32x64xf32>
    %268 = vector.broadcast %262 : vector<1x64xf32> to vector<32x64xf32>
    %269 = arith.mulf %267, %268 : vector<32x64xf32>
    %270 = vector.extract_strided_slice %39 {offsets = [0, 1], sizes = [32, 63], strides = [1, 1]} : vector<32x64xf32> to vector<32x63xf32>
    %271 = tpu.concatenate %270, %265 in 1 : vector<32x63xf32>, vector<32x1xf32> -> vector<32x64xf32>
    %272 = vector.broadcast %264 : vector<1x64xf32> to vector<32x64xf32>
    %273 = arith.mulf %271, %272 : vector<32x64xf32>
    %274 = vector.broadcast %254 : vector<32x1xf32> to vector<32x64xf32>
    %275 = arith.mulf %274, %269 : vector<32x64xf32>
    %276 = vector.broadcast %256 : vector<32x1xf32> to vector<32x64xf32>
    %277 = arith.mulf %276, %39 : vector<32x64xf32>
    %278 = arith.addf %275, %277 : vector<32x64xf32>
    %279 = vector.broadcast %258 : vector<32x1xf32> to vector<32x64xf32>
    %280 = arith.mulf %279, %273 : vector<32x64xf32>
    %281 = arith.addf %278, %280 : vector<32x64xf32>
    %282 = vector.broadcast %260 : vector<32x1xf32> to vector<32x64xf32>
    %283 = arith.addf %281, %282 : vector<32x64xf32>
    %c0_166 = arith.constant 0 : index
    %c0_167 = arith.constant 0 : index
    %c4 = arith.constant 4 : index
    %284 = vector.load %arg4[%c0_166, %c0_167, %c4] : memref<4x32x11xf32, #tpu.memory_space<vmem>>, vector<1x32x1xf32>
    %285 = vector.shape_cast %284 : vector<1x32x1xf32> to vector<32x1xf32>
    %c1_168 = arith.constant 1 : index
    %c0_169 = arith.constant 0 : index
    %c4_170 = arith.constant 4 : index
    %286 = vector.load %arg4[%c1_168, %c0_169, %c4_170] : memref<4x32x11xf32, #tpu.memory_space<vmem>>, vector<1x32x1xf32>
    %287 = vector.shape_cast %286 : vector<1x32x1xf32> to vector<32x1xf32>
    %c2_171 = arith.constant 2 : index
    %c0_172 = arith.constant 0 : index
    %c4_173 = arith.constant 4 : index
    %288 = vector.load %arg4[%c2_171, %c0_172, %c4_173] : memref<4x32x11xf32, #tpu.memory_space<vmem>>, vector<1x32x1xf32>
    %289 = vector.shape_cast %288 : vector<1x32x1xf32> to vector<32x1xf32>
    %c3_174 = arith.constant 3 : index
    %c0_175 = arith.constant 0 : index
    %c4_176 = arith.constant 4 : index
    %290 = vector.load %arg4[%c3_174, %c0_175, %c4_176] : memref<4x32x11xf32, #tpu.memory_space<vmem>>, vector<1x32x1xf32>
    %291 = vector.shape_cast %290 : vector<1x32x1xf32> to vector<32x1xf32>
    %c1_177 = arith.constant 1 : index
    %c0_178 = arith.constant 0 : index
    %c0_179 = arith.constant 0 : index
    %c0_180 = arith.constant 0 : index
    %292 = vector.load %arg6[%c1_177, %c0_178, %c0_179, %c0_180] : memref<2x2x1x64xf32, #tpu.memory_space<vmem>>, vector<1x1x1x64xf32>
    %293 = vector.shape_cast %292 : vector<1x1x1x64xf32> to vector<1x64xf32>
    %c1_181 = arith.constant 1 : index
    %c1_182 = arith.constant 1 : index
    %c0_183 = arith.constant 0 : index
    %c0_184 = arith.constant 0 : index
    %294 = vector.load %arg6[%c1_181, %c1_182, %c0_183, %c0_184] : memref<2x2x1x64xf32, #tpu.memory_space<vmem>>, vector<1x1x1x64xf32>
    %295 = vector.shape_cast %294 : vector<1x1x1x64xf32> to vector<1x64xf32>
    %cst_185 = arith.constant 0.000000e+00 : f32
    %296 = vector.broadcast %cst_185 : f32 to vector<32x1xf32>
    %297 = vector.extract_strided_slice %116 {offsets = [0, 0], sizes = [32, 63], strides = [1, 1]} : vector<32x64xf32> to vector<32x63xf32>
    %298 = tpu.concatenate %296, %297 in 1 : vector<32x1xf32>, vector<32x63xf32> -> vector<32x64xf32>
    %299 = vector.broadcast %293 : vector<1x64xf32> to vector<32x64xf32>
    %300 = arith.mulf %298, %299 : vector<32x64xf32>
    %301 = vector.extract_strided_slice %116 {offsets = [0, 1], sizes = [32, 63], strides = [1, 1]} : vector<32x64xf32> to vector<32x63xf32>
    %302 = tpu.concatenate %301, %296 in 1 : vector<32x63xf32>, vector<32x1xf32> -> vector<32x64xf32>
    %303 = vector.broadcast %295 : vector<1x64xf32> to vector<32x64xf32>
    %304 = arith.mulf %302, %303 : vector<32x64xf32>
    %305 = vector.broadcast %285 : vector<32x1xf32> to vector<32x64xf32>
    %306 = arith.mulf %305, %300 : vector<32x64xf32>
    %307 = vector.broadcast %287 : vector<32x1xf32> to vector<32x64xf32>
    %308 = arith.mulf %307, %116 : vector<32x64xf32>
    %309 = arith.addf %306, %308 : vector<32x64xf32>
    %310 = vector.broadcast %289 : vector<32x1xf32> to vector<32x64xf32>
    %311 = arith.mulf %310, %304 : vector<32x64xf32>
    %312 = arith.addf %309, %311 : vector<32x64xf32>
    %313 = vector.broadcast %291 : vector<32x1xf32> to vector<32x64xf32>
    %314 = arith.addf %312, %313 : vector<32x64xf32>
    %315 = tpu.concatenate %252, %314 in 0 : vector<32x64xf32>, vector<32x64xf32> -> vector<64x64xf32>
    %c3_186 = arith.constant 3 : index
    %c0_187 = arith.constant 0 : index
    %c0_188 = arith.constant 0 : index
    %316 = vector.load %arg5[%c3_186, %c0_187, %c0_188] : memref<5x64x64xf32, #tpu.memory_space<vmem>>, vector<1x64x64xf32>
    %317 = vector.shape_cast %316 : vector<1x64x64xf32> to vector<64x64xf32>
    %318 = arith.truncf %315 : vector<64x64xf32> to vector<64x64xbf16>
    %319 = arith.truncf %317 : vector<64x64xf32> to vector<64x64xbf16>
    %cst_189 = arith.constant dense<0.000000e+00> : vector<64x64xf32>
    %320 = tpu.matmul %318, %319, %cst_189 {dimension_numbers = #tpu.dot_dimension_numbers<[1], [0], [0], [1], [0, 0, 1, 1], [], []>} : vector<64x64xbf16>, vector<64x64xbf16>, vector<64x64xf32> -> vector<64x64xf32>
    %321 = vector.extract_strided_slice %320 {offsets = [0, 0], sizes = [32, 64], strides = [1, 1]} : vector<64x64xf32> to vector<32x64xf32>
    %322 = vector.extract_strided_slice %320 {offsets = [32, 0], sizes = [32, 64], strides = [1, 1]} : vector<64x64xf32> to vector<32x64xf32>
    %323 = arith.mulf %321, %283 : vector<32x64xf32>
    %324 = arith.addf %323, %322 : vector<32x64xf32>
    %c0_190 = arith.constant 0 : index
    %c0_191 = arith.constant 0 : index
    %c8 = arith.constant 8 : index
    %325 = vector.load %arg4[%c0_190, %c0_191, %c8] : memref<4x32x11xf32, #tpu.memory_space<vmem>>, vector<1x32x1xf32>
    %326 = vector.shape_cast %325 : vector<1x32x1xf32> to vector<32x1xf32>
    %c1_192 = arith.constant 1 : index
    %c0_193 = arith.constant 0 : index
    %c8_194 = arith.constant 8 : index
    %327 = vector.load %arg4[%c1_192, %c0_193, %c8_194] : memref<4x32x11xf32, #tpu.memory_space<vmem>>, vector<1x32x1xf32>
    %328 = vector.shape_cast %327 : vector<1x32x1xf32> to vector<32x1xf32>
    %c2_195 = arith.constant 2 : index
    %c0_196 = arith.constant 0 : index
    %c8_197 = arith.constant 8 : index
    %329 = vector.load %arg4[%c2_195, %c0_196, %c8_197] : memref<4x32x11xf32, #tpu.memory_space<vmem>>, vector<1x32x1xf32>
    %330 = vector.shape_cast %329 : vector<1x32x1xf32> to vector<32x1xf32>
    %c3_198 = arith.constant 3 : index
    %c0_199 = arith.constant 0 : index
    %c8_200 = arith.constant 8 : index
    %331 = vector.load %arg4[%c3_198, %c0_199, %c8_200] : memref<4x32x11xf32, #tpu.memory_space<vmem>>, vector<1x32x1xf32>
    %332 = vector.shape_cast %331 : vector<1x32x1xf32> to vector<32x1xf32>
    %c1_201 = arith.constant 1 : index
    %c0_202 = arith.constant 0 : index
    %c0_203 = arith.constant 0 : index
    %c0_204 = arith.constant 0 : index
    %333 = vector.load %arg6[%c1_201, %c0_202, %c0_203, %c0_204] : memref<2x2x1x64xf32, #tpu.memory_space<vmem>>, vector<1x1x1x64xf32>
    %334 = vector.shape_cast %333 : vector<1x1x1x64xf32> to vector<1x64xf32>
    %c1_205 = arith.constant 1 : index
    %c1_206 = arith.constant 1 : index
    %c0_207 = arith.constant 0 : index
    %c0_208 = arith.constant 0 : index
    %335 = vector.load %arg6[%c1_205, %c1_206, %c0_207, %c0_208] : memref<2x2x1x64xf32, #tpu.memory_space<vmem>>, vector<1x1x1x64xf32>
    %336 = vector.shape_cast %335 : vector<1x1x1x64xf32> to vector<1x64xf32>
    %cst_209 = arith.constant 0.000000e+00 : f32
    %337 = vector.broadcast %cst_209 : f32 to vector<32x1xf32>
    %338 = vector.extract_strided_slice %216 {offsets = [0, 0], sizes = [32, 63], strides = [1, 1]} : vector<32x64xf32> to vector<32x63xf32>
    %339 = tpu.concatenate %337, %338 in 1 : vector<32x1xf32>, vector<32x63xf32> -> vector<32x64xf32>
    %340 = vector.broadcast %334 : vector<1x64xf32> to vector<32x64xf32>
    %341 = arith.mulf %339, %340 : vector<32x64xf32>
    %342 = vector.extract_strided_slice %216 {offsets = [0, 1], sizes = [32, 63], strides = [1, 1]} : vector<32x64xf32> to vector<32x63xf32>
    %343 = tpu.concatenate %342, %337 in 1 : vector<32x63xf32>, vector<32x1xf32> -> vector<32x64xf32>
    %344 = vector.broadcast %336 : vector<1x64xf32> to vector<32x64xf32>
    %345 = arith.mulf %343, %344 : vector<32x64xf32>
    %346 = vector.broadcast %326 : vector<32x1xf32> to vector<32x64xf32>
    %347 = arith.mulf %346, %341 : vector<32x64xf32>
    %348 = vector.broadcast %328 : vector<32x1xf32> to vector<32x64xf32>
    %349 = arith.mulf %348, %216 : vector<32x64xf32>
    %350 = arith.addf %347, %349 : vector<32x64xf32>
    %351 = vector.broadcast %330 : vector<32x1xf32> to vector<32x64xf32>
    %352 = arith.mulf %351, %345 : vector<32x64xf32>
    %353 = arith.addf %350, %352 : vector<32x64xf32>
    %354 = vector.broadcast %332 : vector<32x1xf32> to vector<32x64xf32>
    %355 = arith.addf %353, %354 : vector<32x64xf32>
    %356 = arith.negf %355 : vector<32x64xf32>
    %357 = math.exp %356 : vector<32x64xf32>
    %cst_210 = arith.constant 1.000000e+00 : f32
    %358 = vector.broadcast %cst_210 : f32 to vector<32x64xf32>
    %359 = arith.addf %358, %357 : vector<32x64xf32>
    %360 = arith.divf %358, %359 : vector<32x64xf32>
    %c0_211 = arith.constant 0 : index
    %c0_212 = arith.constant 0 : index
    %c9 = arith.constant 9 : index
    %361 = vector.load %arg4[%c0_211, %c0_212, %c9] : memref<4x32x11xf32, #tpu.memory_space<vmem>>, vector<1x32x1xf32>
    %362 = vector.shape_cast %361 : vector<1x32x1xf32> to vector<32x1xf32>
    %c1_213 = arith.constant 1 : index
    %c0_214 = arith.constant 0 : index
    %c9_215 = arith.constant 9 : index
    %363 = vector.load %arg4[%c1_213, %c0_214, %c9_215] : memref<4x32x11xf32, #tpu.memory_space<vmem>>, vector<1x32x1xf32>
    %364 = vector.shape_cast %363 : vector<1x32x1xf32> to vector<32x1xf32>
    %c2_216 = arith.constant 2 : index
    %c0_217 = arith.constant 0 : index
    %c9_218 = arith.constant 9 : index
    %365 = vector.load %arg4[%c2_216, %c0_217, %c9_218] : memref<4x32x11xf32, #tpu.memory_space<vmem>>, vector<1x32x1xf32>
    %366 = vector.shape_cast %365 : vector<1x32x1xf32> to vector<32x1xf32>
    %c3_219 = arith.constant 3 : index
    %c0_220 = arith.constant 0 : index
    %c9_221 = arith.constant 9 : index
    %367 = vector.load %arg4[%c3_219, %c0_220, %c9_221] : memref<4x32x11xf32, #tpu.memory_space<vmem>>, vector<1x32x1xf32>
    %368 = vector.shape_cast %367 : vector<1x32x1xf32> to vector<32x1xf32>
    %c0_222 = arith.constant 0 : index
    %c0_223 = arith.constant 0 : index
    %c0_224 = arith.constant 0 : index
    %c0_225 = arith.constant 0 : index
    %369 = vector.load %arg6[%c0_222, %c0_223, %c0_224, %c0_225] : memref<2x2x1x64xf32, #tpu.memory_space<vmem>>, vector<1x1x1x64xf32>
    %370 = vector.shape_cast %369 : vector<1x1x1x64xf32> to vector<1x64xf32>
    %c0_226 = arith.constant 0 : index
    %c1_227 = arith.constant 1 : index
    %c0_228 = arith.constant 0 : index
    %c0_229 = arith.constant 0 : index
    %371 = vector.load %arg6[%c0_226, %c1_227, %c0_228, %c0_229] : memref<2x2x1x64xf32, #tpu.memory_space<vmem>>, vector<1x1x1x64xf32>
    %372 = vector.shape_cast %371 : vector<1x1x1x64xf32> to vector<1x64xf32>
    %cst_230 = arith.constant 0.000000e+00 : f32
    %373 = vector.broadcast %cst_230 : f32 to vector<32x1xf32>
    %374 = vector.extract_strided_slice %324 {offsets = [0, 0], sizes = [32, 63], strides = [1, 1]} : vector<32x64xf32> to vector<32x63xf32>
    %375 = tpu.concatenate %373, %374 in 1 : vector<32x1xf32>, vector<32x63xf32> -> vector<32x64xf32>
    %376 = vector.broadcast %370 : vector<1x64xf32> to vector<32x64xf32>
    %377 = arith.mulf %375, %376 : vector<32x64xf32>
    %378 = vector.extract_strided_slice %324 {offsets = [0, 1], sizes = [32, 63], strides = [1, 1]} : vector<32x64xf32> to vector<32x63xf32>
    %379 = tpu.concatenate %378, %373 in 1 : vector<32x63xf32>, vector<32x1xf32> -> vector<32x64xf32>
    %380 = vector.broadcast %372 : vector<1x64xf32> to vector<32x64xf32>
    %381 = arith.mulf %379, %380 : vector<32x64xf32>
    %382 = vector.broadcast %362 : vector<32x1xf32> to vector<32x64xf32>
    %383 = arith.mulf %382, %377 : vector<32x64xf32>
    %384 = vector.broadcast %364 : vector<32x1xf32> to vector<32x64xf32>
    %385 = arith.mulf %384, %324 : vector<32x64xf32>
    %386 = arith.addf %383, %385 : vector<32x64xf32>
    %387 = vector.broadcast %366 : vector<32x1xf32> to vector<32x64xf32>
    %388 = arith.mulf %387, %381 : vector<32x64xf32>
    %389 = arith.addf %386, %388 : vector<32x64xf32>
    %390 = vector.broadcast %368 : vector<32x1xf32> to vector<32x64xf32>
    %391 = arith.addf %389, %390 : vector<32x64xf32>
    %c0_231 = arith.constant 0 : index
    %c0_232 = arith.constant 0 : index
    %c10 = arith.constant 10 : index
    %392 = vector.load %arg4[%c0_231, %c0_232, %c10] : memref<4x32x11xf32, #tpu.memory_space<vmem>>, vector<1x32x1xf32>
    %393 = vector.shape_cast %392 : vector<1x32x1xf32> to vector<32x1xf32>
    %c1_233 = arith.constant 1 : index
    %c0_234 = arith.constant 0 : index
    %c10_235 = arith.constant 10 : index
    %394 = vector.load %arg4[%c1_233, %c0_234, %c10_235] : memref<4x32x11xf32, #tpu.memory_space<vmem>>, vector<1x32x1xf32>
    %395 = vector.shape_cast %394 : vector<1x32x1xf32> to vector<32x1xf32>
    %c2_236 = arith.constant 2 : index
    %c0_237 = arith.constant 0 : index
    %c10_238 = arith.constant 10 : index
    %396 = vector.load %arg4[%c2_236, %c0_237, %c10_238] : memref<4x32x11xf32, #tpu.memory_space<vmem>>, vector<1x32x1xf32>
    %397 = vector.shape_cast %396 : vector<1x32x1xf32> to vector<32x1xf32>
    %c3_239 = arith.constant 3 : index
    %c0_240 = arith.constant 0 : index
    %c10_241 = arith.constant 10 : index
    %398 = vector.load %arg4[%c3_239, %c0_240, %c10_241] : memref<4x32x11xf32, #tpu.memory_space<vmem>>, vector<1x32x1xf32>
    %399 = vector.shape_cast %398 : vector<1x32x1xf32> to vector<32x1xf32>
    %c1_242 = arith.constant 1 : index
    %c0_243 = arith.constant 0 : index
    %c0_244 = arith.constant 0 : index
    %c0_245 = arith.constant 0 : index
    %400 = vector.load %arg6[%c1_242, %c0_243, %c0_244, %c0_245] : memref<2x2x1x64xf32, #tpu.memory_space<vmem>>, vector<1x1x1x64xf32>
    %401 = vector.shape_cast %400 : vector<1x1x1x64xf32> to vector<1x64xf32>
    %c1_246 = arith.constant 1 : index
    %c1_247 = arith.constant 1 : index
    %c0_248 = arith.constant 0 : index
    %c0_249 = arith.constant 0 : index
    %402 = vector.load %arg6[%c1_246, %c1_247, %c0_248, %c0_249] : memref<2x2x1x64xf32, #tpu.memory_space<vmem>>, vector<1x1x1x64xf32>
    %403 = vector.shape_cast %402 : vector<1x1x1x64xf32> to vector<1x64xf32>
    %cst_250 = arith.constant 0.000000e+00 : f32
    %404 = vector.broadcast %cst_250 : f32 to vector<32x1xf32>
    %405 = vector.extract_strided_slice %216 {offsets = [0, 0], sizes = [32, 63], strides = [1, 1]} : vector<32x64xf32> to vector<32x63xf32>
    %406 = tpu.concatenate %404, %405 in 1 : vector<32x1xf32>, vector<32x63xf32> -> vector<32x64xf32>
    %407 = vector.broadcast %401 : vector<1x64xf32> to vector<32x64xf32>
    %408 = arith.mulf %406, %407 : vector<32x64xf32>
    %409 = vector.extract_strided_slice %216 {offsets = [0, 1], sizes = [32, 63], strides = [1, 1]} : vector<32x64xf32> to vector<32x63xf32>
    %410 = tpu.concatenate %409, %404 in 1 : vector<32x63xf32>, vector<32x1xf32> -> vector<32x64xf32>
    %411 = vector.broadcast %403 : vector<1x64xf32> to vector<32x64xf32>
    %412 = arith.mulf %410, %411 : vector<32x64xf32>
    %413 = vector.broadcast %393 : vector<32x1xf32> to vector<32x64xf32>
    %414 = arith.mulf %413, %408 : vector<32x64xf32>
    %415 = vector.broadcast %395 : vector<32x1xf32> to vector<32x64xf32>
    %416 = arith.mulf %415, %216 : vector<32x64xf32>
    %417 = arith.addf %414, %416 : vector<32x64xf32>
    %418 = vector.broadcast %397 : vector<32x1xf32> to vector<32x64xf32>
    %419 = arith.mulf %418, %412 : vector<32x64xf32>
    %420 = arith.addf %417, %419 : vector<32x64xf32>
    %421 = vector.broadcast %399 : vector<32x1xf32> to vector<32x64xf32>
    %422 = arith.addf %420, %421 : vector<32x64xf32>
    %423 = tpu.concatenate %360, %422 in 0 : vector<32x64xf32>, vector<32x64xf32> -> vector<64x64xf32>
    %c4_251 = arith.constant 4 : index
    %c0_252 = arith.constant 0 : index
    %c0_253 = arith.constant 0 : index
    %424 = vector.load %arg5[%c4_251, %c0_252, %c0_253] : memref<5x64x64xf32, #tpu.memory_space<vmem>>, vector<1x64x64xf32>
    %425 = vector.shape_cast %424 : vector<1x64x64xf32> to vector<64x64xf32>
    %426 = arith.truncf %423 : vector<64x64xf32> to vector<64x64xbf16>
    %427 = arith.truncf %425 : vector<64x64xf32> to vector<64x64xbf16>
    %cst_254 = arith.constant dense<0.000000e+00> : vector<64x64xf32>
    %428 = tpu.matmul %426, %427, %cst_254 {dimension_numbers = #tpu.dot_dimension_numbers<[1], [0], [0], [1], [0, 0, 1, 1], [], []>} : vector<64x64xbf16>, vector<64x64xbf16>, vector<64x64xf32> -> vector<64x64xf32>
    %429 = vector.extract_strided_slice %428 {offsets = [0, 0], sizes = [32, 64], strides = [1, 1]} : vector<64x64xf32> to vector<32x64xf32>
    %430 = vector.extract_strided_slice %428 {offsets = [32, 0], sizes = [32, 64], strides = [1, 1]} : vector<64x64xf32> to vector<32x64xf32>
    %431 = arith.mulf %429, %391 : vector<32x64xf32>
    %432 = arith.addf %431, %430 : vector<32x64xf32>
    %433 = arith.addf %432, %39 : vector<32x64xf32>
    %c0_255 = arith.constant 0 : index
    %c0_256 = arith.constant 0 : index
    %434 = vector.load %arg9[%c0_255, %c0_256] : memref<8x32xf32, #tpu.memory_space<vmem>>, vector<8x32xf32>
    %435 = arith.truncf %434 : vector<8x32xf32> to vector<8x32xbf16>
    %436 = arith.truncf %433 : vector<32x64xf32> to vector<32x64xbf16>
    %cst_257 = arith.constant dense<0.000000e+00> : vector<8x64xf32>
    %437 = tpu.matmul %435, %436, %cst_257 {dimension_numbers = #tpu.dot_dimension_numbers<[1], [0], [0], [1], [0, 0, 1, 1], [], []>} : vector<8x32xbf16>, vector<32x64xbf16>, vector<8x64xf32> -> vector<8x64xf32>
    %c0_258 = arith.constant 0 : index
    %c0_259 = arith.constant 0 : index
    %438 = vector.load %arg10[%c0_258, %c0_259] : memref<8x1xf32, #tpu.memory_space<vmem>>, vector<8x1xf32>
    %439 = vector.broadcast %438 : vector<8x1xf32> to vector<8x64xf32>
    %440 = arith.addf %437, %439 : vector<8x64xf32>
    %441 = arith.addf %440, %1 : vector<8x64xf32>
    %c0_260 = arith.constant 0 : index
    %c0_261 = arith.constant 0 : index
    %c0_262 = arith.constant 0 : index
    %442 = vector.load %arg11[%c0_260, %c0_261, %c0_262] : memref<1x8x64xf32, #tpu.memory_space<vmem>>, vector<1x8x64xf32>
    %443 = vector.shape_cast %442 : vector<1x8x64xf32> to vector<8x64xf32>
    %444 = vector.shape_cast %441 : vector<8x64xf32> to vector<1x8x64xf32>
    tpu.vector_store %arg11[%c0_260, %c0_261, %c0_262], %444 {strides = array<i32>} : memref<1x8x64xf32, #tpu.memory_space<vmem>>, vector<1x8x64xf32>,
    return
  }
  func.func @transform_0(%arg0: i32) -> (i32, i32, i32) {
    %c0_i32 = arith.constant 0 : i32
    %c0_i32_0 = arith.constant 0 : i32
    %c0_i32_1 = arith.constant 0 : i32
    return %arg0, %c0_i32, %c0_i32_0 : i32, i32, i32
  }
  func.func @transform_1(%arg0: i32) -> (i32, i32) {
    %c0_i32 = arith.constant 0 : i32
    %c0_i32_0 = arith.constant 0 : i32
    %c0_i32_1 = arith.constant 0 : i32
    return %c0_i32, %c0_i32_0 : i32, i32
  }
  func.func @transform_2(%arg0: i32) -> (i32, i32) {
    %c0_i32 = arith.constant 0 : i32
    %c0_i32_0 = arith.constant 0 : i32
    %c0_i32_1 = arith.constant 0 : i32
    return %c0_i32, %c0_i32_0 : i32, i32
  }
  func.func @transform_3(%arg0: i32) -> (i32, i32, i32) {
    %c0_i32 = arith.constant 0 : i32
    %c0_i32_0 = arith.constant 0 : i32
    %c0_i32_1 = arith.constant 0 : i32
    %c0_i32_2 = arith.constant 0 : i32
    return %c0_i32, %c0_i32_0, %c0_i32_1 : i32, i32, i32
  }
  func.func @transform_4(%arg0: i32) -> (i32, i32, i32) {
    %c0_i32 = arith.constant 0 : i32
    %c0_i32_0 = arith.constant 0 : i32
    %c0_i32_1 = arith.constant 0 : i32
    %c0_i32_2 = arith.constant 0 : i32
    return %c0_i32, %c0_i32_0, %c0_i32_1 : i32, i32, i32
  }
  func.func @transform_5(%arg0: i32) -> (i32, i32, i32, i32) {
    %c0_i32 = arith.constant 0 : i32
    %c0_i32_0 = arith.constant 0 : i32
    %c0_i32_1 = arith.constant 0 : i32
    %c0_i32_2 = arith.constant 0 : i32
    %c0_i32_3 = arith.constant 0 : i32
    return %c0_i32, %c0_i32_0, %c0_i32_1, %c0_i32_2 : i32, i32, i32, i32
  }
  func.func @transform_6(%arg0: i32) -> (i32, i32) {
    %c0_i32 = arith.constant 0 : i32
    %c0_i32_0 = arith.constant 0 : i32
    %c0_i32_1 = arith.constant 0 : i32
    return %c0_i32, %c0_i32_0 : i32, i32
  }
  func.func @transform_7(%arg0: i32) -> (i32, i32) {
    %c0_i32 = arith.constant 0 : i32
    %c0_i32_0 = arith.constant 0 : i32
    %c0_i32_1 = arith.constant 0 : i32
    return %c0_i32, %c0_i32_0 : i32, i32
  }
  func.func @transform_8(%arg0: i32) -> (i32, i32) {
    %c0_i32 = arith.constant 0 : i32
    %c0_i32_0 = arith.constant 0 : i32
    %c0_i32_1 = arith.constant 0 : i32
    return %c0_i32, %c0_i32_0 : i32, i32
  }
  func.func @transform_9(%arg0: i32) -> (i32, i32) {
    %c0_i32 = arith.constant 0 : i32
    %c0_i32_0 = arith.constant 0 : i32
    %c0_i32_1 = arith.constant 0 : i32
    return %c0_i32, %c0_i32_0 : i32, i32
  }
  func.func @transform_10(%arg0: i32) -> (i32, i32, i32) {
    %c0_i32 = arith.constant 0 : i32
    %c0_i32_0 = arith.constant 0 : i32
    %c0_i32_1 = arith.constant 0 : i32
    return %arg0, %c0_i32, %c0_i32_0 : i32, i32, i32
  }
}

</mosaic_0001>

<bundles_post_ra>
// kernel: tpu_custom_call.1
= control target key start
LH: loop header
LB: loop body
LE: loop exit
PB: predicated region body
PF: predicated region fallthrough
CT: control target
= control target key end

     0   :  { %15 = vsyncpa [#allocation3], 0  ;;  %s6453_s0 = inlined_call_operand.vmem [shape: f32[2,8,64], index: 0, kind: input, shape index: {}]   ;;  %s6454_s1 = inlined_call_operand.vmem [shape: f32[32,8], index: 1, kind: input, shape index: {}]   ;;  %s6455_s2 = inlined_call_operand.vmem [shape: f32[32,1], index: 2, kind: input, shape index: {}]   ;;  %s6456_s3 = inlined_call_operand.vmem [shape: f32[4,32,11], index: 3, kind: input, shape index: {}]   ;;  %s6457_s4 = inlined_call_operand.vmem [shape: f32[5,64,64], index: 4, kind: input, shape index: {}]   ;;  %s6458_s5 = inlined_call_operand.vmem [shape: f32[2,2,1,64], index: 5, kind: input, shape index: {}]   ;;  %s6459_s6 = inlined_call_operand.vmem [shape: f32[128,32], index: 6, kind: input, shape index: {}]   ;;  %s6460_s7 = inlined_call_operand.vmem [shape: f32[128,1], index: 7, kind: input, shape index: {}]   ;;  %s6461_s8 = inlined_call_operand.vmem [shape: f32[8,32], index: 8, kind: input, shape index: {}]   ;;  %s6462_s9 = inlined_call_operand.vmem [shape: f32[8,1], index: 9, kind: input, shape index: {}]   ;;  %s6463_s10 = inlined_call_operand.hbm [shape: f32[2,8,64], index: 10, kind: output, shape index: {}]  }
   0x1   :  { %17 = vsyncpa [#allocation3 + $0x1], 0  ;;  %s4536_s13 = smov 0   ;;  %s4538_s14 = smov 0  }
   0x2   :  { %s4540_s15 = smov 0   ;;  %s4542_s16 = smov 0  }
   0x3 LB: > { %s4557_s17 = sadd.s32 4294967295, %s4462_s16   ;;  %s3675_s18 = sadd.s32 4294967294, %s4462_s16   ;;  %s4462_s16 = sphi %s4542_s16, %s6600_s16   ;;  %s4458_s15 = sphi %s4540_s15, %s6599_s15   ;;  %s4454_s14 = sphi %s4538_s14, %s6598_s14   ;;  %s4450_s13 = sphi %s4536_s13, %s6597_s13  }
   0x4   : > { %s4561_s19 = sadd.s32 1, %s4462_s16   ;;  %s245_s20 = sadd.s32 1, %s4458_s15 }
   0x5   : > { %s242_s21 = ssub.s32 %s4462_s16, %s4561_s19  ;;  %p255_p0 = scmp.ne.s32.totalorder %s4458_s15, %s4454_s14 }
   0x6   : > { %p243_p1 = scmp.eq.s32.totalorder %s242_s21, 0  ;;  %p256_p2 = scmp.eq.s32.totalorder %s4557_s17, 1 }
   0x7   : > { %p261_p3 = scmp.ne.s32.totalorder %s4454_s14, %s4450_s13  ;;  %p262_p4 = scmp.eq.s32.totalorder %s3675_s18, 1 }
   0x8   : > { %s4572_s22 = scalar_select %p243_p1, %s4458_s15, %s245_s20  }
   0x9   : > { %p4574_p5 = por %p256_p2, %p255_p0  ;;  %p4578_p6 = por %p262_p4, %p261_p3 }
   0xa   : > { %p3678_p7 = scmp.ge.s32.totalorder %s4462_s16, 1  ;;  %p314_p8 = scmp.lt.s32.totalorder %s4462_s16, 3 }
   0xc   : > { %p315_p9 = pnand %p3678_p7, %p314_p8 }
   0xe   : > { %318 = sbr.rel (%p315_p9) target bundleno = 2997 (0xbb5), region = 60 }
  0x15   : > { %p351_p10 = scmp.lt.s32.totalorder %s4557_s17, 1  ;;  %v357_v0 = vld [vmem:[%s6454_s1] sm:$0xff]  ;;  %v358_v1 = vld [vmem:[%s6454_s1 + $0x8] sm:$0xff]  ;;  %vm388_vm0 = vcmask 64512   ;;  %v366_v3 = vld [vmem:[%s6455_s2 + $0x10] sm:$0xff]  ;;  %v6468_v4 = vmov 0  }
  0x16   : > { %v361_v2 = vpack.c.bf16 %v358_v1, %v357_v0  ;;  %4169 = vset.pattern.permute.xlu1 %v6468_v4  ;;  %4168 = vset.pattern.permute.xlu0 %v6468_v4  ;;  %v364_v5 = vld [vmem:[%s6455_s2] sm:$0xff]  ;;  %v367_v6 = vld [vmem:[%s6455_s2 + $0x18] sm:$0xff]  ;;  %v365_v7 = vld [vmem:[%s6455_s2 + $0x8] sm:$0xff]  ;;  %vm395_vm1 = vcmask 1043456   ;;  %s6466_s25 = smov 1   ;;  %s6464_s30 = smov 127  }
  0x17   : > { %s352_s11 = scalar_select %p351_p10, %s4557_s17, 1  ;;  %380 = vperm.xlu1 %4169, %v366_v3   ;;  %370 = vperm.xlu0 %4168, %v364_v5   ;;  %v359_v9 = vld [vmem:[%s6454_s1 + $0x10] sm:$0xff]  ;;  %v360_v10 = vld [vmem:[%s6454_s1 + $0x18] sm:$0xff]  ;;  %v4622_v12 = vld [vmem:[%s6456_s3 + $0x8] sm:$0xff]  ;;  %v4467_v54 = vmov 1   ;;  %vm486_vm2 = vcmask 7168  }
  0x18   : > { %3902 = vmatprep.mubr.msk.bf16.mxu0 %vm388_vm0, %v361_v2  ;;  %v362_v14 = vpack.c.bf16 %v360_v10, %v359_v9  ;;  %v4629_v15 = vld [vmem:[%s6456_s3] sm:$0xff]  ;;  %v4635_v16 = vld [vmem:[%s6456_s3 + $0x28] sm:$0xff]  ;;  %v4648_v18 = vld [vmem:[%s6456_s3 + $0x18] sm:$0xff]  ;;  %vm513_vm3 = vcmask 515072   ;;  %vm768_vm4 = vcmask 523264   ;;  %s4468_s12 = smov 126  }
  0x19   : > { %s3680_s20 = sshll.u32 %s352_s11, 3  ;;  %v4642_v17 = vld [vmem:[%s6456_s3 + $0x20] sm:$0xff]  ;;  %v4654_v19 = vld [vmem:[%s6456_s3 + $0x10] sm:$0xff]  ;;  %v4660_v20 = vld [vmem:[%s6456_s3 + $0x38] sm:$0xff]  ;;  %vm664_vm5 = vcmask 506880   ;;  %vm1030_vm6 = vcmask 261120  }
  0x1a   : > { %s4607_s28 = scalar_lea.vmem %s6453_s0, %s3680_s20  ;;  %v4666_v21 = vld [vmem:[%s6456_s3 + $0x30] sm:$0xff]  ;;  %v4672_v22 = vld [vmem:[%s6456_s3 + $0x48] sm:$0xff]  ;;  %v4678_v23 = vld [vmem:[%s6456_s3 + $0x40] sm:$0xff]  ;;  %vm4470_vm7 = vmmov 0   ;;  %s6527_s26 = smov 1  }
  0x1b   : > { %v356_v8 = vld [vmem:[%s4607_s28] sm:$0xff]  ;;  %385 = vperm.xlu1 %4169, %v367_v6   ;;  %375 = vperm.xlu0 %4168, %v365_v7   ;;  %v4684_v24 = vld [vmem:[%s6456_s3 + $0x58] sm:$0xff]  ;;  %v4690_v25 = vld [vmem:[%s6456_s3 + $0x50] sm:$0xff]  ;;  %s6528_s27 = smov 127  }
  0x1c   : > { %v363_v11 = vpack.c.bf16 %v356_v8, %v356_v8  ;;  %v4696_v26 = vld [vmem:[%s6456_s3 + $0x68] sm:$0xff]  ;;  %v4702_v27 = vld [vmem:[%s6456_s3 + $0x60] sm:$0xff]  ;;  %v3710_v32 = vld [vmem:[%s6457_s4 + $0x90] sm:$0xff] }
  0x1d   : > { %v3708_v28 = vld [vmem:[%s6457_s4 + $0x80] sm:$0xff]  ;;  %v3709_v29 = vld [vmem:[%s6457_s4 + $0x88] sm:$0xff]  ;;  %v3711_v33 = vld [vmem:[%s6457_s4 + $0x98] sm:$0xff] }
  0x1e   : > { %4108 = vmatprep.subr.msk.bf16.mxu0 %vm395_vm1, %v363_v11  ;;  %v397_v13 = vsel %vm395_vm1, %v363_v11, 0  ;;  %v4092_v30 = vpack.c.bf16 %v3709_v29, %v3708_v28  ;;  %v4096_v34 = vpack.c.bf16 %v3711_v33, %v3710_v32  ;;  %v3712_v40 = vld [vmem:[%s6457_s4 + $0xa0] sm:$0xff]  ;;  %v3713_v41 = vld [vmem:[%s6457_s4 + $0xa8] sm:$0xff]  ;;  %v3714_v46 = vld [vmem:[%s6457_s4 + $0xb0] sm:$0xff] }
  0x1f   : > { %3901 = vmatpush3.bf16.msra.mxu0 %v397_v13  ;;  %535 = vperm.xlu1 %4169, %v4622_v12   ;;  %v4100_v44 = vpack.c.bf16 %v3713_v41, %v3712_v40  ;;  %v3715_v47 = vld [vmem:[%s6457_s4 + $0xb8] sm:$0xff]  ;;  %v4748_v52 = vld [vmem:[%s6456_s3 + $0x70] sm:$0xff]  ;;  %v3696_v11 = vld [vmem:[%s6458_s5] ss:$0 sm:$0xff] }
  0x20   : > { %530 = vperm.xlu0 %4168, %v4629_v15   ;;  %4093 = vmatprep.subr.bf16.mxu0 %v4092_v30  ;;  %v4104_v48 = vpack.c.bf16 %v3715_v47, %v3714_v46  ;;  %v4754_v53 = vld [vmem:[%s6456_s3 + $0x78] sm:$0xff]  ;;  %v3698_v46 = vld [vmem:[%s6457_s4 + $0x40] sm:$0xff]  ;;  %v3699_v47 = vld [vmem:[%s6457_s4 + $0x48] sm:$0xff] }
  0x22   : > { %3903 = vmatmul.mubr.msk.bf16.vlgmr.msra.gmra.mrb[0].mxu0 %vm388_vm0, %v362_v14 }
  0x23   : > { %559 = vperm.xlu1 %4169, %v4635_v16   ;;  %4095 = vmatpush3.bf16.msra.mxu0 %v4092_v30 }
  0x24   : > { %554 = vperm.xlu0 %4168, %v4642_v17   ;;  %4097 = vmatprep.subr.bf16.mxu0 %v4096_v34 }
  0x27   : > { %545 = vperm.xlu1 %4169, %v4648_v18   ;;  %4099 = vmatpush3.bf16.msra.mxu0 %v4096_v34 }
  0x28   : > { %540 = vperm.xlu0 %4168, %v4654_v19   ;;  %4101 = vmatprep.subr.bf16.mxu0 %v4100_v44 }
  0x2b   : > { %569 = vperm.xlu1 %4169, %v4660_v20   ;;  %4103 = vmatpush3.bf16.msra.mxu0 %v4100_v44 }
  0x2c   : > { %564 = vperm.xlu0 %4168, %v4666_v21   ;;  %4105 = vmatprep.subr.bf16.mxu0 %v4104_v48 }
  0x2f   : > { %587 = vperm.xlu1 %4169, %v4672_v22   ;;  %4107 = vmatpush3.bf16.msra.mxu0 %v4104_v48 }
  0x30   : > { %582 = vperm.xlu0 %4168, %v4678_v23  }
  0x33   : > { %597 = vperm.xlu1 %4169, %v4684_v24  }
  0x34   : > { %592 = vperm.xlu0 %4168, %v4690_v25  }
  0x37   : > { %615 = vperm.xlu1 %4169, %v4696_v26  }
  0x38   : > { %610 = vperm.xlu0 %4168, %v4702_v27  }
  0x96   : > { %v381_v31 = vpop.permute.xlu1 %380  ;;  %v371_v45 = vpop.permute.xlu0 %370 }
  0x9a   : > { %v386_v38 = vpop.permute.xlu1 %385  ;;  %v376_v50 = vpop.permute.xlu0 %375 }
  0x9e   : > { %v536_v56 = vpop.permute.xlu1 %535 }
  0x9f   : > { %v531_v55 = vpop.permute.xlu0 %530 }
  0xa2   : > { %v560_v58 = vpop.permute.xlu1 %559 }
  0xa3   : > { %v555_v57 = vpop.permute.xlu0 %554 }
  0xa6   : > { %v546_v60 = vpop.permute.xlu1 %545 }
  0xa7   : > { %v541_v59 = vpop.permute.xlu0 %540 }
  0xaa   : > { %v570_v62 = vpop.permute.xlu1 %569 }
  0xab   : > { %v565_v61 = vpop.permute.xlu0 %564 }
  0xae   : > { %v588_v0 = vpop.permute.xlu1 %587 }
  0xaf   : > { %v583_v63 = vpop.permute.xlu0 %582 }
  0xb2   : > { %v598_v2 = vpop.permute.xlu1 %597 }
  0xb3   : > { %v593_v1 = vpop.permute.xlu0 %592 }
  0xb6   : > { %v616_v5 = vpop.permute.xlu1 %615 }
  0xb7   : > { %v611_v3 = vpop.permute.xlu0 %610 }
  0xf5   : > { %v3904_v35 = vpop.f32.mrb[0].mxu0 }
  0xf6   : > { %v4718_v36 = vadd.f32 %v3904_v35, %v381_v31  ;;  %v433_v37 = vpop.f32.mrb[1].mxu0 }
  0xf7   : > { %v3905_v39 = vpop.f32.mrb[2].mxu0  ;;  %v434_v49 = vadd.f32 %v433_v37, %v371_v45 }
  0xf8   : > { %v4726_v42 = vadd.f32 %v3905_v39, %v386_v38  ;;  %478 = vrot.lane.b32.xlu0 %v4718_v36, %s6466_s25  ;;  %v436_v43 = vpop.f32.mrb[3].mxu0 }
  0xf9   : > { %v437_v51 = vadd.f32 %v436_v43, %v376_v50 }
  0xfa   : > { %480 = vrot.lane.b32.xlu1 %v4726_v42, %s6466_s25 }
  0xfb   : > { %v573_v29 = vmul.f32 %v560_v58, %v437_v51  ;;  %v3701_v58 = vld [vmem:[%s6457_s4 + $0x58] sm:$0xff] }
  0xfc   : > { %505 = vrot.lane.b32.xlu0 %v4718_v36, %s6464_s30 }
  0xfe   : > { %507 = vrot.lane.b32.xlu1 %v4726_v42, %s6464_s30 }
 0x100   : > { %474 = vrot.lane.b32.xlu0 %v434_v49, %s6466_s25 }
 0x102   : > { %476 = vrot.lane.b32.xlu1 %v437_v51, %s6466_s25  ;;  %s3805_s25 = sshll.u32 %s4557_s17, 7 }
 0x104   : > { %501 = vrot.lane.b32.xlu0 %v434_v49, %s6464_s30 }
 0x106   : > { %503 = vrot.lane.b32.xlu1 %v437_v51, %s6464_s30  ;;  %v748_v51 = vpack.c.bf16 %v3699_v47, %v3698_v46 }
 0x108   : > { %620 = vperm.xlu0 %4168, %v4748_v52   ;;  %3906 = vmatprep.subr.bf16.mxu1 %v748_v51 }
 0x109   : > { %3907 = vmatpush3.bf16.msra.mxu1 %v748_v51 }
 0x10a   : > { %625 = vperm.xlu1 %4169, %v4754_v53  }
 0x10c   : > { %4170 = vset.pattern.permute.xlu0 %v4467_v54 }
 0x10d   : > { %670 = vperm.xlu0 %4170, %v4629_v15  }
 0x10e   : > { %4171 = vset.pattern.permute.xlu1 %v4467_v54  ;;  %v574_v54 = vmul.f32 %v565_v61, %v4718_v36 }
 0x10f   : > { %674 = vperm.xlu1 %4171, %v4622_v12  }
 0x111   : > { %694 = vperm.xlu0 %4170, %v4635_v16  }
 0x113   : > { %690 = vperm.xlu1 %4171, %v4642_v17  }
 0x115   : > { %682 = vperm.xlu0 %4170, %v4648_v18  }
 0x117   : > { %678 = vperm.xlu1 %4171, %v4654_v19   ;;  %v3697_v19 = vld [vmem:[%s6458_s5 + $0x1] ss:$0 sm:$0xff] }
 0x119   : > { %702 = vperm.xlu0 %4170, %v4660_v20  }
 0x11b   : > { %698 = vperm.xlu1 %4171, %v4666_v21   ;;  %v572_v21 = vmul.f32 %v555_v57, %v434_v49  ;;  %v3700_v57 = vld [vmem:[%s6457_s4 + $0x50] sm:$0xff] }
 0x11c   : > { %v749_v36 = vpack.c.bf16 %v3701_v58, %v3700_v57 }
 0x11d   : > { %718 = vperm.xlu0 %4170, %v4672_v22  }
 0x11e   : > { %3908 = vmatprep.subr.bf16.mxu1 %v749_v36 }
 0x11f   : > { %714 = vperm.xlu1 %4171, %v4678_v23   ;;  %3909 = vmatpush3.bf16.msra.mxu1 %v749_v36 }
 0x121   : > { %726 = vperm.xlu0 %4170, %v4684_v24  }
 0x123   : > { %722 = vperm.xlu1 %4171, %v4690_v25  }
 0x16a   : > { %v479_v6 = vpop.permute.xlu0 %478 }
 0x16b   : > { %v489_v25 = vsel %vm486_vm2, 0.0, %v479_v6 }
 0x16c   : > { %v481_v7 = vpop.permute.xlu1 %480  ;;  %v499_v35 = vmul.f32 %v3696_v11, %v489_v25 }
 0x16d   : > { %v490_v33 = vsel %vm486_vm2, 0.0, %v481_v7 }
 0x16e   : > { %v506_v8 = vpop.permute.xlu0 %505  ;;  %v500_v41 = vmul.f32 %v3696_v11, %v490_v33  ;;  %v550_v48 = vmul.f32 %v541_v59, %v499_v35  ;;  %v575_v59 = vmul.f32 %v570_v62, %v4726_v42 }
 0x16f   : > { %v516_v34 = vsel %vm513_vm3, %v506_v8, 0.0  ;;  %v3704_v8 = vld [vmem:[%s6457_s4 + $0x70] sm:$0xff] }
 0x170   : > { %v508_v9 = vpop.permute.xlu1 %507  ;;  %v526_v43 = vmul.f32 %v3697_v19, %v516_v34 }
 0x171   : > { %v517_v40 = vsel %vm513_vm3, %v508_v9, 0.0  ;;  %v3705_v9 = vld [vmem:[%s6457_s4 + $0x78] sm:$0xff] }
 0x172   : > { %v475_v10 = vpop.permute.xlu0 %474  ;;  %v527_v49 = vmul.f32 %v3697_v19, %v517_v40 }
 0x173   : > { %v487_v12 = vsel %vm486_vm2, 0.0, %v475_v10  ;;  %v751_v10 = vpack.c.bf16 %v3705_v9, %v3704_v8  ;;  %v946_v9 = vld [vmem:[%s6460_s7] sm:$0xff] }
 0x174   : > { %v497_v13 = vmul.f32 %v3696_v11, %v487_v12  ;;  %v477_v14 = vpop.permute.xlu1 %476 }
 0x175   : > { %v488_v15 = vsel %vm486_vm2, 0.0, %v477_v14 }
 0x176   : > { %v548_v16 = vmul.f32 %v531_v55, %v497_v13  ;;  %v498_v17 = vmul.f32 %v3696_v11, %v488_v15  ;;  %v502_v18 = vpop.permute.xlu0 %501  ;;  %v551_v55 = vmul.f32 %v546_v60, %v500_v41 }
 0x177   : > { %v514_v20 = vsel %vm513_vm3, %v502_v18, 0.0 }
 0x178   : > { %v549_v22 = vmul.f32 %v536_v56, %v498_v17  ;;  %v524_v23 = vmul.f32 %v3697_v19, %v514_v20  ;;  %v504_v24 = vpop.permute.xlu1 %503  ;;  %v576_v30 = vadd.f32 %v572_v21, %v548_v16  ;;  %v602_v56 = vmul.f32 %v593_v1, %v526_v43 }
 0x179   : > { %v515_v28 = vsel %vm513_vm3, %v504_v24, 0.0  ;;  %v579_v61 = vadd.f32 %v575_v59, %v551_v55 }
 0x17a   : > { %v600_v31 = vmul.f32 %v583_v63, %v524_v23  ;;  %v525_v32 = vmul.f32 %v3697_v19, %v515_v28  ;;  %v577_v37 = vadd.f32 %v573_v29, %v549_v22  ;;  %v603_v63 = vmul.f32 %v598_v2, %v527_v49 }
 0x17c   : > { %v604_v38 = vadd.f32 %v600_v31, %v576_v30  ;;  %v601_v39 = vmul.f32 %v588_v0, %v525_v32  ;;  %v578_v0 = vadd.f32 %v574_v54, %v550_v48  ;;  %v607_v7 = vadd.f32 %v603_v63, %v579_v61 }
 0x17e   : > { %v4784_v44 = vadd.f32 %v611_v3, %v604_v38  ;;  %v605_v45 = vadd.f32 %v601_v39, %v577_v37  ;;  %v606_v60 = vadd.f32 %v602_v56, %v578_v0  ;;  %v3702_v3 = vld [vmem:[%s6457_s4 + $0x60] sm:$0xff] }
 0x180   : > { %6503 = vst [vmem:[#allocation5_spill] sm:$0xff] %v4784_v44  ;;  %v4792_v50 = vadd.f32 %v616_v5, %v605_v45  ;;  %3934 = vmatprep.mubr.msk.f32.mxu0 %vm768_vm4, %v4784_v44  ;;  %v3703_v5 = vld [vmem:[%s6457_s4 + $0x68] sm:$0xff] }
 0x181   : > { %v750_v42 = vpack.c.bf16 %v3703_v5, %v3702_v3 }
 0x182   : > { %6504 = vst [vmem:[#allocation6_spill] sm:$0xff] %v4792_v50  ;;  %3935 = vmatmul.mubr.msk.f32.vlgmr.msra.gmra.mrb[4].mxu0 %vm768_vm4, %v4792_v50 }
 0x183   : > { %3910 = vmatprep.subr.bf16.mxu1 %v750_v42 }
 0x184   : > { %3911 = vmatpush3.bf16.msra.mxu1 %v750_v42  ;;  %v930_v42 = vld [vmem:[%s6459_s6] sm:$0xff] }
 0x185   : > { %3912 = vmatprep.subr.bf16.mxu1 %v751_v10 }
 0x187   : > { %v621_v1 = vpop.permute.xlu0 %620 }
 0x188   : > { %v4812_v6 = vadd.f32 %v621_v1, %v606_v60  ;;  %3913 = vmatpush3.bf16.msra.mxu1 %v751_v10  ;;  %v947_v10 = vld [vmem:[%s6460_s7 + $0x8] sm:$0xff] }
 0x189   : > { %v626_v62 = vpop.permute.xlu1 %625 }
 0x18a   : > { %6505 = vst [vmem:[#allocation7_spill] sm:$0xff] %v4812_v6  ;;  %v4814_v2 = vadd.f32 %v626_v62, %v607_v7  ;;  %640 = vrot.lane.b32.xlu1 %v4812_v6, %s6464_s30  ;;  %3937 = vmatprep.mubr.msk.f32.mxu0 %vm768_vm4, %v4812_v6  ;;  %v931_v62 = vld [vmem:[%s6459_s6 + $0x8] sm:$0xff] }
 0x18b   : > { %v962_v8 = vpack.c.bf16 %v931_v62, %v930_v42 }
 0x18c   : > { %6506 = vst [vmem:[#allocation8_spill] sm:$0xff] %v4814_v2  ;;  %642 = vrot.lane.b32.xlu0 %v4814_v2, %s6464_s30  ;;  %3938 = vmatmul.mubr.msk.f32.gmra.mrb[6].mxu0 %vm768_vm4, %v4814_v2  ;;  %v671_v12 = vpop.permute.xlu0 %670 }
 0x18d   : > { %v685_v33 = vmul.f32 %v671_v12, %v4784_v44  ;;  %v949_v12 = vld [vmem:[%s6460_s7 + $0x18] sm:$0xff] }
 0x18e   : > { %636 = vrot.lane.b32.xlu1 %v4784_v44, %s6464_s30  ;;  %v675_v11 = vpop.permute.xlu1 %674 }
 0x18f   : > { %v686_v34 = vmul.f32 %v675_v11, %v4792_v50  ;;  %v950_v11 = vld [vmem:[%s6460_s7 + $0x20] sm:$0xff] }
 0x190   : > { %638 = vrot.lane.b32.xlu0 %v4792_v50, %s6464_s30  ;;  %v695_v14 = vpop.permute.xlu0 %694  ;;  %s6410_s30 = scalar_lea.hbm %s6463_s10, %s3805_s25 }
 0x192   : > { %652 = vrot.lane.b32.xlu1 %v4784_v44, %s4468_s12  ;;  %v691_v13 = vpop.permute.xlu1 %690  ;;  %v5467_v44 = vld [vmem:[%s6456_s3 + $0x60] sm:$0xff] }
 0x193   : > { %6525 = vst [vmem:[#allocation27_spill] sm:$0xff] %v5467_v44 }
 0x194   : > { %654 = vrot.lane.b32.xlu0 %v4792_v50, %s4468_s12  ;;  %v683_v16 = vpop.permute.xlu0 %682 }
 0x195   : > { %v688_v47 = vmul.f32 %v683_v16, %v4814_v2  ;;  %v953_v16 = vld [vmem:[%s6460_s7 + $0x38] sm:$0xff] }
 0x196   : > { %656 = vrot.lane.b32.xlu1 %v4812_v6, %s4468_s12  ;;  %v679_v15 = vpop.permute.xlu1 %678 }
 0x197   : > { %v687_v49 = vmul.f32 %v679_v15, %v4812_v6  ;;  %v952_v15 = vld [vmem:[%s6460_s7 + $0x30] sm:$0xff] }
 0x198   : > { %658 = vrot.lane.b32.xlu0 %v4814_v2, %s4468_s12  ;;  %v703_v18 = vpop.permute.xlu0 %702  ;;  %v5453_v6 = vld [vmem:[%s6456_s3 + $0x50] sm:$0xff]  ;;  %s348_s12 = sand.u32 1, %s4454_s14  }
 0x199   : > { %s3679_s18 = sshll.u32 %s348_s12, 3  ;;  %s3603_s17 = scalar_lea.sflag [#allocation3], %s348_s12 }
 0x19a   : > { %753 = vperm.xlu1 %4171, %v4702_v27   ;;  %v699_v17 = vpop.permute.xlu1 %698  ;;  %s350_s11 = scalar_lea.vmem [#allocation2], %s3679_s18 }
 0x19b   : > { %s3616_s21 = sshll.u32 %s350_s11, 4  ;;  %s6412_s21 = int_to_ptr.vmem [resolvable:$true] %s3616_s21 }
 0x19c   : > { %757 = vperm.xlu0 %4170, %v4696_v26   ;;  %v719_v27 = vpop.permute.xlu0 %718 }
 0x19e   : > { %761 = vperm.xlu1 %4171, %v4748_v52   ;;  %v715_v19 = vpop.permute.xlu1 %714 }
 0x1a0   : > { %765 = vperm.xlu0 %4170, %v4754_v53   ;;  %v727_v26 = vpop.permute.xlu0 %726 }
 0x1a2   : > { %4172 = vset.pattern.permute.xlu1 %v6468_v4  ;;  %v723_v20 = vpop.permute.xlu1 %722 }
 0x1a3   : > { %972 = vperm.xlu1 %4172, %v946_v9  }
 0x1a4   : > { %4173 = vset.pattern.permute.xlu0 %v6468_v4 }
 0x1a5   : > { %977 = vperm.xlu0 %4173, %v947_v10  }
 0x1a7   : > { %992 = vperm.xlu1 %4172, %v950_v11  }
 0x1a9   : > { %987 = vperm.xlu0 %4173, %v949_v12  }
 0x1fc   : > { %v641_v21 = vpop.permute.xlu1 %640 }
 0x1fd   : > { %v4851_v25 = vsel %vm513_vm3, %v641_v21, 0.0 }
 0x1fe   : > { %v643_v52 = vpop.permute.xlu0 %642  ;;  %6509 = vst [vmem:[#allocation11_spill] sm:$0xff] %v4851_v25  ;;  %v707_v38 = vmul.f32 %v699_v17, %v4851_v25 }
 0x1ff   : > { %v4856_v31 = vsel %vm513_vm3, %v643_v52, 0.0 }
 0x200   : > { %v637_v22 = vpop.permute.xlu1 %636  ;;  %6510 = vst [vmem:[#allocation12_spill] sm:$0xff] %v4856_v31  ;;  %v708_v40 = vmul.f32 %v703_v18, %v4856_v31  ;;  %v711_v58 = vadd.f32 %v707_v38, %v687_v49  ;;  %v932_v38 = vld [vmem:[%s6459_s6 + $0x10] sm:$0xff] }
 0x201   : > { %v4845_v53 = vsel %vm513_vm3, %v637_v22, 0.0 }
 0x202   : > { %6507 = vst [vmem:[#allocation9_spill] sm:$0xff] %v4845_v53  ;;  %v639_v23 = vpop.permute.xlu0 %638  ;;  %v705_v28 = vmul.f32 %v691_v13, %v4845_v53  ;;  %v712_v59 = vadd.f32 %v708_v40, %v688_v47  ;;  %v948_v13 = vld [vmem:[%s6460_s7 + $0x10] sm:$0xff]  ;;  %v934_v40 = vld [vmem:[%s6459_s6 + $0x20] sm:$0xff]  ;;  %v937_v47 = vld [vmem:[%s6459_s6 + $0x38] sm:$0xff] }
 0x203   : > { %v4848_v24 = vsel %vm513_vm3, %v639_v23, 0.0  ;;  %982 = vperm.xlu1 %4172, %v948_v13  }
 0x204   : > { %6508 = vst [vmem:[#allocation10_spill] sm:$0xff] %v4848_v24  ;;  %v706_v29 = vmul.f32 %v695_v14, %v4848_v24  ;;  %v653_v30 = vpop.permute.xlu1 %652  ;;  %v709_v41 = vadd.f32 %v705_v28, %v685_v33  ;;  %v951_v14 = vld [vmem:[%s6460_s7 + $0x28] sm:$0xff] }
 0x205   : > { %v665_v32 = vsel %vm664_vm5, %v653_v30, 0.0 }
 0x206   : > { %v729_v35 = vmul.f32 %v715_v19, %v665_v32  ;;  %v655_v37 = vpop.permute.xlu0 %654  ;;  %v710_v43 = vadd.f32 %v706_v29, %v686_v34 }
 0x207   : > { %v666_v39 = vsel %vm664_vm5, %v655_v37, 0.0  ;;  %997 = vperm.xlu1 %4172, %v951_v14  }
 0x208   : > { %v730_v45 = vmul.f32 %v719_v27, %v666_v39  ;;  %v657_v46 = vpop.permute.xlu1 %656  ;;  %v733_v55 = vadd.f32 %v729_v35, %v709_v41  ;;  %v933_v39 = vld [vmem:[%s6459_s6 + $0x18] sm:$0xff]  ;;  %v935_v41 = vld [vmem:[%s6459_s6 + $0x28] sm:$0xff] }
 0x209   : > { %v667_v48 = vsel %vm664_vm5, %v657_v46, 0.0  ;;  %v936_v46 = vld [vmem:[%s6459_s6 + $0x30] sm:$0xff] }
 0x20a   : > { %v731_v51 = vmul.f32 %v723_v20, %v667_v48  ;;  %v659_v54 = vpop.permute.xlu0 %658  ;;  %v734_v56 = vadd.f32 %v730_v45, %v710_v43  ;;  %v963_v43 = vpack.c.bf16 %v933_v39, %v932_v38  ;;  %v964_v45 = vpack.c.bf16 %v935_v41, %v934_v40 }
 0x20b   : > { %v668_v57 = vsel %vm664_vm5, %v659_v54, 0.0  ;;  %1002 = vperm.xlu1 %4172, %v952_v15   ;;  %v965_v48 = vpack.c.bf16 %v937_v47, %v936_v46  ;;  %v939_v54 = vld [vmem:[%s6459_s6 + $0x48] sm:$0xff] }
 0x20c   : > { %v732_v63 = vmul.f32 %v727_v26, %v668_v57  ;;  %v746_v0 = vpack.c.bf16 %v734_v56, %v733_v55  ;;  %v735_v36 = vadd.f32 %v731_v51, %v711_v58  ;;  %v938_v51 = vld [vmem:[%s6459_s6 + $0x40] sm:$0xff]  ;;  %v940_v56 = vld [vmem:[%s6459_s6 + $0x50] sm:$0xff]  ;;  %v941_v57 = vld [vmem:[%s6459_s6 + $0x58] sm:$0xff] }
 0x20d   : > { %v966_v55 = vpack.c.bf16 %v939_v54, %v938_v51  ;;  %v967_v58 = vpack.c.bf16 %v941_v57, %v940_v56 }
 0x20e   : > { %v736_v60 = vadd.f32 %v732_v63, %v712_v59  ;;  %3914 = vmatprep.mubr.msk.bf16.mxu1 %vm768_vm4, %v746_v0 }
 0x20f   : > { %1007 = vperm.xlu1 %4172, %v953_v16  }
 0x210   : > { %v747_v61 = vpack.c.bf16 %v736_v60, %v735_v36 }
 0x212   : > { %3915 = vmatmul.mubr.msk.bf16.vlgmr.msra.gmra.mrb[0].mxu1 %vm768_vm4, %v747_v61 }
 0x213   : > { %3944 = vmatprep.mubr.msk.bf16.mxu1 %vm1030_vm6, %v962_v8 }
 0x219   : > { %v754_v18 = vpop.permute.xlu1 %753 }
 0x21b   : > { %v758_v17 = vpop.permute.xlu0 %757 }
 0x21d   : > { %v762_v52 = vpop.permute.xlu1 %761 }
 0x21f   : > { %v766_v20 = vpop.permute.xlu0 %765 }
 0x222   : > { %v973_v49 = vpop.permute.xlu1 %972 }
 0x226   : > { %v993_v59 = vpop.permute.xlu1 %992 }
 0x255   : > { %v3936_v1 = vpop.f32.mrb[4].mxu0 }
 0x256   : > { %v907_v3 = vpop.f32.mrb[5].mxu0 }
 0x25f   : > { %v3939_v5 = vpop.f32.mrb[6].mxu0 }
 0x260   : > { %v917_v7 = vpop.f32.mrb[7].mxu0 }
 0x282   : > { %v983_v63 = vpop.permute.xlu1 %982 }
 0x286   : > { %v998_v60 = vpop.permute.xlu1 %997 }
 0x28a   : > { %v1003_v8 = vpop.permute.xlu1 %1002 }
 0x2e5   : > { %v3916_v19 = vpop.f32.mrb[0].mxu1 }
 0x2e6   : > { %v809_v27 = vpop.f32.mrb[1].mxu1  ;;  %v4905_v28 = vadd.f32 %v3916_v19, %v762_v52 }
 0x2e7   : > { %v4901_v26 = vadd.f32 %v809_v27, %v754_v18  ;;  %v3917_v21 = vpop.f32.mrb[2].mxu1 }
 0x2e8   : > { %v4903_v22 = vadd.f32 %v3917_v21, %v766_v20  ;;  %v812_v23 = vpop.f32.mrb[3].mxu1  ;;  %v4921_v35 = vadd.f32 %v917_v7, %v4905_v28 }
 0x2e9   : > { %6511 = vst [vmem:[#allocation13_spill] sm:$0xff] %v4901_v26  ;;  %v4907_v29 = vadd.f32 %v812_v23, %v758_v17  ;;  %v4910_v30 = vadd.f32 %v907_v3, %v4901_v26  ;;  %v978_v3 = vpop.permute.xlu0 %977 }
 0x2ea   : > { %6512 = vst [vmem:[#allocation14_spill] sm:$0xff] %v4903_v22  ;;  %v4916_v33 = vadd.f32 %v3939_v5, %v4903_v22  ;;  %6517 = vst [vmem:[#allocation19_spill] sm:$0xff] %v4921_v35 }
 0x2eb   : > { %6513 = vst [vmem:[#allocation15_spill] sm:$0xff] %v4907_v29  ;;  %6514 = vst [vmem:[#allocation16_spill] sm:$0xff] %v4910_v30  ;;  %v4913_v32 = vadd.f32 %v3936_v1, %v4907_v29 }
 0x2ec   : > { %6516 = vst [vmem:[#allocation18_spill] sm:$0xff] %v4916_v33  ;;  %v969_v37 = vpack.c.bf16 %v4916_v33, %v4921_v35  ;;  %v5481_v33 = vld [vmem:[%s6456_s3 + $0x70] sm:$0xff] }
 0x2ed   : > { %6515 = vst [vmem:[#allocation17_spill] sm:$0xff] %v4913_v32  ;;  %v968_v34 = vpack.c.bf16 %v4913_v32, %v4910_v30  ;;  %v988_v52 = vpop.permute.xlu0 %987 }
 0x2ef   : > { %3940 = vmatprep.subr.bf16.mxu1 %v968_v34 }
 0x2f0   : > { %3941 = vmatpush3.bf16.msra.mxu1 %v968_v34 }
 0x2f1   : > { %3942 = vmatprep.subr.bf16.mxu1 %v969_v37 }
 0x2f4   : > { %3943 = vmatpush3.bf16.msra.mxu1 %v969_v37  ;;  %v1008_v37 = vpop.permute.xlu1 %1007 }
 0x2f7   : > { %3945 = vmatmul.mubr.msk.bf16.vlgmr.msra.gmra.mrb[4].mxu1 %vm1030_vm6, %v963_v43 }
 0x2f8   : > { %3948 = vmatprep.mubr.msk.bf16.mxu1 %vm1030_vm6, %v964_v45 }
 0x2ff   : > { %3949 = vmatmul.mubr.msk.bf16.gmra.mrb[8].mxu1 %vm1030_vm6, %v965_v48 }
 0x300   : > { %3952 = vmatprep.mubr.msk.bf16.mxu1 %vm1030_vm6, %v966_v55 }
 0x307   : > { %3953 = vmatmul.mubr.msk.bf16.gmra.mrb[12].mxu1 %vm1030_vm6, %v967_v58 }
 0x3ca   : > { %v3946_v0 = vpop.f32.mrb[4].mxu1 }
 0x3cb   : > { %v1083_v36 = vpop.f32.mrb[5].mxu1  ;;  %v1092_v18 = vadd.f32 %v3946_v0, %v983_v63 }
 0x3cc   : > { %v1084_v61 = vadd.f32 %v1083_v36, %v973_v49  ;;  %v3947_v1 = vpop.f32.mrb[6].mxu1 }
 0x3cd   : > { %v1086_v5 = vpop.f32.mrb[7].mxu1  ;;  %v1132_v21 = vpack.c.bf16 %v1092_v18, %v1092_v18  ;;  %v1095_v23 = vadd.f32 %v3947_v1, %v988_v52  ;;  %v5022_v52 = vld [vmem:[%s6457_s4 + $0x18] sm:$0xff] }
 0x3ce   : > { %v1130_v7 = vpack.c.bf16 %v1084_v61, %v1084_v61  ;;  %v1087_v42 = vadd.f32 %v1086_v5, %v978_v3  ;;  %v4995_v5 = vld [vmem:[%s6457_s4 + $0x10] sm:$0xff] }
 0x3cf   : > { %v1133_v34 = vpack.c.bf16 %v1095_v23, %v1095_v23 }
 0x3d0   : > { %v1131_v62 = vpack.c.bf16 %v1087_v42, %v1087_v42  ;;  %1146 = vxpose.xlu0.c.b16.start.end [1/1] (short) (narrow) %v1130_v7, 64  ;;  %v5000_v42 = vld [vmem:[%s6457_s4] sm:$0xff] }
 0x3d2   : > { %v3950_v9 = vpop.f32.mrb[8].mxu1  ;;  %1242 = vxpose.xlu1.c.b16.start.end [1/1] (short) (narrow) %v1131_v62, 64 }
 0x3d3   : > { %v1108_v10 = vadd.f32 %v3950_v9, %v1003_v8  ;;  %v1099_v11 = vpop.f32.mrb[9].mxu1 }
 0x3d4   : > { %v1100_v12 = vadd.f32 %v1099_v11, %v993_v59  ;;  %v3951_v13 = vpop.f32.mrb[10].mxu1 }
 0x3d5   : > { %v1136_v14 = vpack.c.bf16 %v1108_v10, %v1108_v10  ;;  %v1102_v15 = vpop.f32.mrb[11].mxu1  ;;  %v1111_v39 = vadd.f32 %v3951_v13, %v1008_v37 }
 0x3d6   : > { %v1134_v16 = vpack.c.bf16 %v1100_v12, %v1100_v12  ;;  %v1103_v17 = vadd.f32 %v1102_v15, %v998_v60 }
 0x3d7   : > { %v1367_v19 = vsel %vm395_vm1, %v1136_v14, 0  ;;  %4111 = vmatprep.subr.msk.bf16.mxu1 %vm395_vm1, %v1136_v14  ;;  %v1137_v41 = vpack.c.bf16 %v1111_v39, %v1111_v39 }
 0x3d8   : > { %v1175_v27 = vsel %vm395_vm1, %v1134_v16, 0  ;;  %v1135_v20 = vpack.c.bf16 %v1103_v17, %v1103_v17  ;;  %4109 = vmatprep.subr.msk.bf16.mxu0 %vm395_vm1, %v1134_v16  ;;  %3977 = vmatpush3.bf16.msra.mxu1 %v1367_v19 }
 0x3d9   : > { %3957 = vmatpush3.bf16.msra.mxu0 %v1175_v27  ;;  %v1463_v55 = vsel %vm395_vm1, %v1137_v41, 0 }
 0x3da   : > { %4110 = vmatprep.subr.msk.bf16.mxu0 %vm395_vm1, %v1135_v20  ;;  %v1271_v43 = vsel %vm395_vm1, %v1135_v20, 0  ;;  %v4984_v60 = vpop.f32.mrb[12].mxu1 }
 0x3db   : > { %6518 = vst [vmem:[#allocation20_spill] sm:$0xff] %v4984_v60  ;;  %v4986_v61 = vpop.f32.mrb[13].mxu1 }
 0x3dc   : > { %v4988_v1 = vpop.f32.mrb[14].mxu1 }
 0x3dd   : > { %1338 = vxpose.xlu0.c.b16.start.end [1/1] (short) (narrow) %v1132_v21, 64  ;;  %6519 = vst [vmem:[#allocation21_spill] sm:$0xff] %v4988_v1  ;;  %v4990_v3 = vpop.f32.mrb[15].mxu1  ;;  %v5486_v1 = vld [vmem:[%s6456_s3 + $0x58] sm:$0xff] }
 0x3ea   : > { %1434 = vxpose.xlu0.c.b16.start.end [1/1] (short) (narrow) %v1133_v34, 64 }
 0x436   : > { %v1154_v38 = vpop.trf.xlu0 }
 0x437   : > { %3958 = vmatprep.mubr.msk.bf16.mxu0 %vm388_vm0, %v1154_v38 }
 0x438   : > { %v1250_v46 = vpop.trf.xlu1 }
 0x43a   : > { %v1155_v40 = vpop.trf.xlu0 }
 0x43b   : > { %3959 = vmatmul.mubr.msk.bf16.vlgmr.msra.gmra.mrb[8].mxu0 %vm388_vm0, %v1155_v40 }
 0x43c   : > { %3967 = vmatpush3.bf16.msra.mxu0 %v1271_v43  ;;  %v1251_v49 = vpop.trf.xlu1  ;;  %v5039_v43 = vld [vmem:[%s6457_s4 + $0x8] sm:$0xff] }
 0x43d   : > { %4112 = vmatprep.subr.msk.bf16.mxu0 %vm395_vm1, %v1137_v41 }
 0x43e   : > { %v1156_v45 = vpop.trf.xlu0 }
 0x43f   : > { %3962 = vmatprep.mubr.msk.bf16.mxu0 %vm388_vm0, %v1156_v45 }
 0x440   : > { %v1252_v54 = vpop.trf.xlu1 }
 0x442   : > { %v1157_v47 = vpop.trf.xlu0 }
 0x443   : > { %3963 = vmatmul.mubr.msk.bf16.gmra.mrb[12].mxu0 %vm388_vm0, %v1157_v47 }
 0x444   : > { %3968 = vmatprep.mubr.msk.bf16.mxu0 %vm388_vm0, %v1250_v46  ;;  %v1253_v57 = vpop.trf.xlu1 }
 0x446   : > { %v1346_v48 = vpop.trf.xlu0 }
 0x447   : > { %3978 = vmatprep.mubr.msk.bf16.mxu1 %vm388_vm0, %v1346_v48 }
 0x44a   : > { %v1347_v51 = vpop.trf.xlu0 }
 0x44b   : > { %3969 = vmatmul.mubr.msk.bf16.vlgmr.msra.gmra.mrb[16].mxu0 %vm388_vm0, %v1251_v49  ;;  %3979 = vmatmul.mubr.msk.bf16.vlgmr.msra.gmra.mrb[16].mxu1 %vm388_vm0, %v1347_v51  ;;  %v5054_v49 = vld [vmem:[%s6457_s4 + $0x30] sm:$0xff] }
 0x44c   : > { %3987 = vmatpush3.bf16.msra.mxu0 %v1463_v55  ;;  %3972 = vmatprep.mubr.msk.bf16.mxu0 %vm388_vm0, %v1252_v54 }
 0x44e   : > { %v1348_v56 = vpop.trf.xlu0 }
 0x44f   : > { %3982 = vmatprep.mubr.msk.bf16.mxu1 %vm388_vm0, %v1348_v56 }
 0x452   : > { %v1349_v58 = vpop.trf.xlu0 }
 0x453   : > { %3983 = vmatmul.mubr.msk.bf16.gmra.mrb[20].mxu1 %vm388_vm0, %v1349_v58  ;;  %3973 = vmatmul.mubr.msk.bf16.gmra.mrb[20].mxu0 %vm388_vm0, %v1253_v57 }
 0x456   : > { %v1442_v59 = vpop.trf.xlu0 }
 0x457   : > { %3988 = vmatprep.mubr.msk.bf16.mxu0 %vm388_vm0, %v1442_v59 }
 0x45a   : > { %v1443_v63 = vpop.trf.xlu0 }
 0x45b   : > { %3989 = vmatmul.mubr.msk.bf16.vlgmr.msra.gmra.mrb[24].mxu0 %vm388_vm0, %v1443_v63 }
 0x45e   : > { %v1444_v0 = vpop.trf.xlu0 }
 0x45f   : > { %3992 = vmatprep.mubr.msk.bf16.mxu0 %vm388_vm0, %v1444_v0 }
 0x462   : > { %v1445_v36 = vpop.trf.xlu0 }
 0x463   : > { %3993 = vmatmul.mubr.msk.bf16.gmra.mrb[28].mxu0 %vm388_vm0, %v1445_v36 }
 0x50e   : > { %v3960_v7 = vpop.f32.mrb[8].mxu0 }
 0x50f   : > { %v5003_v62 = vadd.f32 %v3960_v7, %v4995_v5  ;;  %v1211_v8 = vpop.f32.mrb[9].mxu0 }
 0x510   : > { %v3961_v9 = vpop.f32.mrb[10].mxu0  ;;  %v5006_v10 = vadd.f32 %v1211_v8, %v5000_v42 }
 0x511   : > { %v1214_v11 = vpop.f32.mrb[11].mxu0  ;;  %v1536_v12 = vsel %vm768_vm4, %v5003_v62, -inf  ;;  %v5042_v45 = vadd.f32 %v3961_v9, %v5022_v52  ;;  %v5069_v9 = vld [vmem:[%s6457_s4 + $0x38] sm:$0xff] }
 0x512   : > { %1537 = vmax.xlane.f32.xlu1 %v1536_v12  ;;  %v1530_v13 = vsel %vm768_vm4, %v5006_v10, -inf  ;;  %v5047_v47 = vadd.f32 %v1214_v11, %v5039_v43 }
 0x513   : > { %v1539_v57 = vsel %vm768_vm4, %v5042_v45, -inf }
 0x514   : > { %v1533_v36 = vsel %vm768_vm4, %v5047_v47, -inf }
 0x516   : > { %1531 = vmax.xlane.f32.xlu1 %v1530_v13  ;;  %v3964_v14 = vpop.f32.mrb[12].mxu0 }
 0x517   : > { %v1227_v15 = vpop.f32.mrb[13].mxu0 }
 0x518   : > { %v3965_v16 = vpop.f32.mrb[14].mxu0 }
 0x519   : > { %v5012_v17 = vpop.f32.mrb[15].mxu0 }
 0x51e   : > { %v3980_v18 = vpop.f32.mrb[16].mxu1  ;;  %v3970_v19 = vpop.f32.mrb[16].mxu0 }
 0x51f   : > { %v5015_v27 = vadd.f32 %v3980_v18, %v4995_v5  ;;  %v1403_v20 = vpop.f32.mrb[17].mxu1  ;;  %v5017_v21 = vpop.f32.mrb[17].mxu0  ;;  %v5079_v18 = vadd.f32 %v3964_v14, %v5054_v49 }
 0x520   : > { %v3981_v23 = vpop.f32.mrb[18].mxu1  ;;  %v5024_v34 = vpop.f32.mrb[18].mxu0  ;;  %v5027_v37 = vadd.f32 %v1403_v20, %v5000_v42 }
 0x521   : > { %v5030_v38 = vadd.f32 %v3981_v23, %v5022_v52  ;;  %v1406_v39 = vpop.f32.mrb[19].mxu1  ;;  %v1584_v40 = vsel %vm768_vm4, %v5015_v27, -inf  ;;  %v5034_v41 = vpop.f32.mrb[19].mxu0  ;;  %v5082_v23 = vadd.f32 %v3965_v16, %v5069_v9  ;;  %v1548_v14 = vsel %vm768_vm4, %v5079_v18, -inf  ;;  %v5096_v16 = vld [vmem:[%s6457_s4 + $0x28] sm:$0xff] }
 0x522   : > { %1585 = vmax.xlane.f32.xlu0 %v1584_v40  ;;  %v1578_v48 = vsel %vm768_vm4, %v5027_v37, -inf  ;;  %v5057_v55 = vadd.f32 %v1406_v39, %v5039_v43 }
 0x523   : > { %v1587_v46 = vsel %vm768_vm4, %v5030_v38, -inf }
 0x524   : > { %1588 = vmax.xlane.f32.xlu1 %v1587_v46  ;;  %v1581_v12 = vsel %vm768_vm4, %v5057_v55, -inf  ;;  %v1142_v46 = vld [vmem:[%s6457_s4 + $0x20] sm:$0xff] }
 0x526   : > { %1579 = vmax.xlane.f32.xlu0 %v1578_v48  ;;  %v3984_v51 = vpop.f32.mrb[20].mxu1  ;;  %v3974_v54 = vpop.f32.mrb[20].mxu0 }
 0x527   : > { %v5060_v56 = vadd.f32 %v3984_v51, %v5054_v49  ;;  %v1419_v58 = vpop.f32.mrb[21].mxu1  ;;  %v1323_v59 = vpop.f32.mrb[21].mxu0 }
 0x528   : > { %1540 = vmax.xlane.f32.xlu1 %v1539_v57  ;;  %v3985_v63 = vpop.f32.mrb[22].mxu1  ;;  %v3975_v0 = vpop.f32.mrb[22].mxu0  ;;  %v5089_v51 = vadd.f32 %v1419_v58, %v1142_v46  ;;  %v5135_v53 = vadd.f32 %v1323_v59, %v1142_v46 }
 0x529   : > { %v1422_v7 = vpop.f32.mrb[23].mxu1  ;;  %v1326_v8 = vpop.f32.mrb[23].mxu0  ;;  %v5072_v11 = vadd.f32 %v3985_v63, %v5069_v9  ;;  %v1596_v13 = vsel %vm768_vm4, %v5060_v56, -inf  ;;  %v5151_v59 = vadd.f32 %v3975_v0, %v5069_v9 }
 0x52a   : > { %1534 = vmax.xlane.f32.xlu0 %v1533_v36  ;;  %v5099_v63 = vadd.f32 %v1422_v7, %v5096_v16  ;;  %v1551_v36 = vsel %vm768_vm4, %v5082_v23, -inf  ;;  %v1590_v58 = vsel %vm768_vm4, %v5089_v51, -inf  ;;  %v5161_v25 = vadd.f32 %v1326_v8, %v5096_v16 }
 0x52b   : > { %v1599_v39 = vsel %vm768_vm4, %v5072_v11, -inf }
 0x52c   : > { %1582 = vmax.xlane.f32.xlu1 %v1581_v12  ;;  %v5103_v12 = vadd.f32 %v1227_v15, %v1142_v46  ;;  %v1593_v7 = vsel %vm768_vm4, %v5099_v63, -inf  ;;  %v5118_v15 = vadd.f32 %v5017_v21, %v5000_v42  ;;  %v5133_v21 = vadd.f32 %v5024_v34, %v5022_v52 }
 0x52e   : > { %1597 = vmax.xlane.f32.xlu0 %v1596_v13  ;;  %v3990_v20 = vpop.f32.mrb[24].mxu0 }
 0x52f   : > { %v1499_v40 = vpop.f32.mrb[25].mxu0  ;;  %v5148_v34 = vadd.f32 %v3990_v20, %v4995_v5 }
 0x530   : > { %1600 = vmax.xlane.f32.xlu1 %v1599_v39  ;;  %v3991_v48 = vpop.f32.mrb[26].mxu0  ;;  %v5109_v39 = vadd.f32 %v5012_v17, %v5096_v16 }
 0x531   : > { %v1502_v57 = vpop.f32.mrb[27].mxu0 }
 0x532   : > { %1549 = vmax.xlane.f32.xlu0 %v1548_v14  ;;  %v5112_v14 = vadd.f32 %v3970_v19, %v4995_v5  ;;  %v1545_v17 = vsel %vm768_vm4, %v5109_v39, -inf  ;;  %v5125_v19 = vadd.f32 %v3974_v54, %v5054_v49  ;;  %v5141_v54 = vadd.f32 %v5034_v41, %v5039_v43 }
 0x533   : > { %v1608_v41 = vsel %vm768_vm4, %v5148_v34, -inf  ;;  %v1575_v5 = vsel %vm768_vm4, %v5151_v59, -inf }
 0x534   : > { %1552 = vmax.xlane.f32.xlu1 %v1551_v36  ;;  %v1560_v24 = vsel %vm768_vm4, %v5112_v14, -inf }
 0x536   : > { %1591 = vmax.xlane.f32.xlu0 %v1590_v58  ;;  %v3994_v13 = vpop.f32.mrb[28].mxu0  ;;  %v1542_v58 = vsel %vm768_vm4, %v5103_v12, -inf }
 0x537   : > { %v1515_v4 = vpop.f32.mrb[29].mxu0  ;;  %v5168_v20 = vadd.f32 %v3994_v13, %v5054_v49 }
 0x538   : > { %1594 = vmax.xlane.f32.xlu1 %v1593_v7  ;;  %v3995_v36 = vpop.f32.mrb[30].mxu0  ;;  %v1554_v7 = vsel %vm768_vm4, %v5118_v15, -inf }
 0x539   : > { %v1518_v31 = vpop.f32.mrb[31].mxu0  ;;  %v1620_v8 = vsel %vm768_vm4, %v5168_v20, -inf }
 0x53a   : > { %1543 = vmax.xlane.f32.xlu0 %v1542_v58  ;;  %v1572_v58 = vsel %vm768_vm4, %v5125_v19, -inf }
 0x53c   : > { %1546 = vmax.xlane.f32.xlu1 %v1545_v17  ;;  %v1563_v17 = vsel %vm768_vm4, %v5133_v21, -inf }
 0x53e   : > { %1561 = vmax.xlane.f32.xlu0 %v1560_v24  ;;  %v1566_v24 = vsel %vm768_vm4, %v5135_v53, -inf }
 0x540   : > { %1555 = vmax.xlane.f32.xlu1 %v1554_v7  ;;  %v1557_v7 = vsel %vm768_vm4, %v5141_v54, -inf }
 0x542   : > { %1573 = vmax.xlane.f32.xlu0 %v1572_v58  ;;  %v5158_v58 = vadd.f32 %v1499_v40, %v5000_v42  ;;  %v1569_v42 = vsel %vm768_vm4, %v5161_v25, -inf  ;;  %v5177_v40 = vadd.f32 %v1515_v4, %v1142_v46 }
 0x544   : > { %1564 = vmax.xlane.f32.xlu1 %v1563_v17  ;;  %v1602_v0 = vsel %vm768_vm4, %v5158_v58, -inf  ;;  %v5171_v17 = vadd.f32 %v3991_v48, %v5022_v52  ;;  %v1614_v52 = vsel %vm768_vm4, %v5177_v40, -inf  ;;  %v5187_v48 = vadd.f32 %v3995_v36, %v5069_v9 }
 0x546   : > { %1567 = vmax.xlane.f32.xlu0 %v1566_v24  ;;  %v5180_v24 = vadd.f32 %v1502_v57, %v5039_v43  ;;  %v1611_v49 = vsel %vm768_vm4, %v5171_v17, -inf  ;;  %v1623_v46 = vsel %vm768_vm4, %v5187_v48, -inf  ;;  %v5194_v43 = vadd.f32 %v1518_v31, %v5096_v16 }
 0x548   : > { %1558 = vmax.xlane.f32.xlu1 %v1557_v7  ;;  %v1605_v4 = vsel %vm768_vm4, %v5180_v24, -inf  ;;  %v1617_v57 = vsel %vm768_vm4, %v5194_v43, -inf }
 0x54a   : > { %1609 = vmax.xlane.f32.xlu0 %v1608_v41 }
 0x54c   : > { %1576 = vmax.xlane.f32.xlu1 %v1575_v5 }
 0x54e   : > { %1603 = vmax.xlane.f32.xlu0 %v1602_v0 }
 0x550   : > { %1570 = vmax.xlane.f32.xlu1 %v1569_v42 }
 0x552   : > { %1621 = vmax.xlane.f32.xlu0 %v1620_v8 }
 0x554   : > { %1612 = vmax.xlane.f32.xlu1 %v1611_v49 }
 0x556   : > { %1615 = vmax.xlane.f32.xlu0 %v1614_v52 }
 0x558   : > { %1606 = vmax.xlane.f32.xlu1 %v1605_v4 }
 0x55c   : > { %1624 = vmax.xlane.f32.xlu1 %v1623_v46 }
 0x560   : > { %1618 = vmax.xlane.f32.xlu1 %v1617_v57 }
 0x59f   : > { %v1538_v13 = vpop.xlane.xlu1 %1537 }
 0x5a0   : > { %v1628_v9 = vsub.f32 %v5003_v62, %v1538_v13 }
 0x5a2   : > { %v1662_v5 = vmul.f32 1.442695, %v1628_v9 }
 0x5a3   : > { %v1532_v36 = vpop.xlane.xlu1 %1531 }
 0x5a4   : > { %v1626_v52 = vsub.f32 %v5006_v10, %v1532_v36 }
 0x5a6   : > { %v1658_v9 = vmul.f32 1.442695, %v1626_v52 }
 0x5af   : > { %v1586_v7 = vpop.xlane.xlu0 %1585 }
 0x5b0   : > { %v1644_v41 = vsub.f32 %v5015_v27, %v1586_v7 }
 0x5b1   : > { %v1589_v0 = vpop.xlane.xlu1 %1588 }
 0x5b2   : > { %v1694_v42 = vmul.f32 1.442695, %v1644_v41  ;;  %v1645_v8 = vsub.f32 %v5030_v38, %v1589_v0 }
 0x5b3   : > { %v1580_v49 = vpop.xlane.xlu0 %1579 }
 0x5b4   : > { %4207 = vpow2.f32 %v1694_v42  ;;  %v1696_v31 = vmul.f32 1.442695, %v1645_v8  ;;  %v1642_v16 = vsub.f32 %v5027_v37, %v1580_v49 }
 0x5b5   : > { %4209 = vpow2.f32 %v1662_v5  ;;  %v1541_v4 = vpop.xlane.xlu1 %1540 }
 0x5b6   : > { %4211 = vpow2.f32 %v1696_v31  ;;  %v1690_v62 = vmul.f32 1.442695, %v1642_v16  ;;  %v1629_v46 = vsub.f32 %v5042_v45, %v1541_v4 }
 0x5b7   : > { %v1535_v57 = vpop.xlane.xlu0 %1534 }
 0x5b8   : > { %v1664_v27 = vmul.f32 1.442695, %v1629_v46  ;;  %v1627_v13 = vsub.f32 %v5047_v47, %v1535_v57  ;;  %4213 = vpow2.f32 %v1690_v62 }
 0x5b9   : > { %v1583_v38 = vpop.xlane.xlu1 %1582 }
 0x5ba   : > { %4215 = vpow2.f32 %v1664_v27  ;;  %v1643_v7 = vsub.f32 %v5057_v55, %v1583_v38  ;;  %v1660_v37 = vmul.f32 1.442695, %v1627_v13 }
 0x5bb   : > { %v5206_v41 = vpop.xlane.xlu0 %1597  ;;  %4217 = vpow2.f32 %v1658_v9 }
 0x5bc   : > { %v1692_v5 = vmul.f32 1.442695, %v1643_v7 }
 0x5bd   : > { %v5208_v10 = vpop.xlane.xlu1 %1600 }
 0x5be   : > { %v5210_v36 = vpop.eup %4207  ;;  %4219 = vpow2.f32 %v1692_v5 }
 0x5bf   : > { %v5212_v45 = vpop.eup %4209  ;;  %v1550_v0 = vpop.xlane.xlu0 %1549  ;;  %v1776_v47 = vsel %vm768_vm4, %v5210_v36, 0.0  ;;  %4221 = vpow2.f32 %v1660_v37 }
 0x5c0   : > { %v5216_v42 = vpop.eup %4211  ;;  %v1632_v55 = vsub.f32 %v5079_v18, %v1550_v0  ;;  %1777 = vadd.xlane.f32.xlu0 %v1776_v47  ;;  %v1728_v62 = vsel %vm768_vm4, %v5212_v45, 0.0 }
 0x5c1   : > { %v1553_v8 = vpop.xlane.xlu1 %1552  ;;  %v1779_v49 = vsel %vm768_vm4, %v5216_v42, 0.0 }
 0x5c2   : > { %v1670_v31 = vmul.f32 1.442695, %v1632_v55  ;;  %v1633_v16 = vsub.f32 %v5082_v23, %v1553_v8  ;;  %1780 = vadd.xlane.f32.xlu1 %v1779_v49  ;;  %v5222_v52 = vpop.eup %4213 }
 0x5c3   : > { %v1592_v4 = vpop.xlane.xlu0 %1591  ;;  %v1770_v37 = vsel %vm768_vm4, %v5222_v52, 0.0 }
 0x5c4   : > { %v5226_v46 = vpop.eup %4215  ;;  %4223 = vpow2.f32 %v1670_v31  ;;  %v1672_v57 = vmul.f32 1.442695, %v1633_v16  ;;  %v1646_v18 = vsub.f32 %v5089_v51, %v1592_v4  ;;  %1729 = vadd.xlane.f32.xlu0 %v1728_v62 }
 0x5c5   : > { %v1595_v27 = vpop.xlane.xlu1 %1594  ;;  %v1731_v13 = vsel %vm768_vm4, %v5226_v46, 0.0  ;;  %v5232_v38 = vpop.eup %4217 }
 0x5c6   : > { %4225 = vpow2.f32 %v1672_v57  ;;  %v1698_v23 = vmul.f32 1.442695, %v1646_v18  ;;  %v1647_v9 = vsub.f32 %v5099_v63, %v1595_v27  ;;  %1732 = vadd.xlane.f32.xlu1 %v1731_v13  ;;  %v1722_v16 = vsel %vm768_vm4, %v5232_v38, 0.0 }
 0x5c7   : > { %v1544_v7 = vpop.xlane.xlu0 %1543 }
 0x5c8   : > { %v5236_v5 = vpop.eup %4219  ;;  %4227 = vpow2.f32 %v1698_v23  ;;  %v1700_v51 = vmul.f32 1.442695, %v1647_v9  ;;  %v1630_v0 = vsub.f32 %v5103_v12, %v1544_v7  ;;  %1771 = vadd.xlane.f32.xlu0 %v1770_v37 }
 0x5c9   : > { %v1547_v47 = vpop.xlane.xlu1 %1546  ;;  %v1773_v55 = vsel %vm768_vm4, %v5236_v5, 0.0  ;;  %v5241_v8 = vpop.eup %4221 }
 0x5ca   : > { %4229 = vpow2.f32 %v1700_v51  ;;  %v1666_v63 = vmul.f32 1.442695, %v1630_v0  ;;  %v1631_v49 = vsub.f32 %v5109_v39, %v1547_v47  ;;  %1774 = vadd.xlane.f32.xlu1 %v1773_v55  ;;  %v1725_v57 = vsel %vm768_vm4, %v5241_v8, 0.0 }
 0x5cb   : > { %v1562_v31 = vpop.xlane.xlu0 %1561 }
 0x5cc   : > { %4231 = vpow2.f32 %v1666_v63  ;;  %v1668_v4 = vmul.f32 1.442695, %v1631_v49  ;;  %v1636_v12 = vsub.f32 %v5112_v14, %v1562_v31  ;;  %1723 = vadd.xlane.f32.xlu0 %v1722_v16 }
 0x5cd   : > { %v1556_v62 = vpop.xlane.xlu1 %1555 }
 0x5ce   : > { %v5249_v18 = vpop.eup %4223  ;;  %4233 = vpow2.f32 %v1668_v4  ;;  %v1678_v27 = vmul.f32 1.442695, %v1636_v12  ;;  %v1634_v39 = vsub.f32 %v5118_v15, %v1556_v62  ;;  %1726 = vadd.xlane.f32.xlu1 %v1725_v57 }
 0x5cf   : > { %v1574_v13 = vpop.xlane.xlu0 %1573  ;;  %v1740_v23 = vsel %vm768_vm4, %v5249_v18, 0.0 }
 0x5d0   : > { %v5254_v9 = vpop.eup %4225  ;;  %4235 = vpow2.f32 %v1678_v27  ;;  %v1674_v14 = vmul.f32 1.442695, %v1634_v39  ;;  %v1640_v7 = vsub.f32 %v5125_v19, %v1574_v13  ;;  %1741 = vadd.xlane.f32.xlu0 %v1740_v23 }
 0x5d1   : > { %v1565_v37 = vpop.xlane.xlu1 %1564  ;;  %v1743_v51 = vsel %vm768_vm4, %v5254_v9, 0.0 }
 0x5d2   : > { %v5259_v0 = vpop.eup %4227  ;;  %4237 = vpow2.f32 %v1674_v14  ;;  %v1686_v15 = vmul.f32 1.442695, %v1640_v7  ;;  %v1637_v47 = vsub.f32 %v5133_v21, %v1565_v37  ;;  %1744 = vadd.xlane.f32.xlu1 %v1743_v51 }
 0x5d3   : > { %v1568_v55 = vpop.xlane.xlu0 %1567  ;;  %v1782_v63 = vsel %vm768_vm4, %v5259_v0, 0.0 }
 0x5d4   : > { %v5264_v49 = vpop.eup %4229  ;;  %v1680_v31 = vmul.f32 1.442695, %v1637_v47  ;;  %v1638_v19 = vsub.f32 %v5135_v53, %v1568_v55  ;;  %1783 = vadd.xlane.f32.xlu0 %v1782_v63  ;;  %4239 = vpow2.f32 %v1686_v15 }
 0x5d5   : > { %v1559_v16 = vpop.xlane.xlu1 %1558  ;;  %v1785_v4 = vsel %vm768_vm4, %v5264_v49, 0.0 }
 0x5d6   : > { %v5269_v12 = vpop.eup %4231  ;;  %4241 = vpow2.f32 %v1680_v31  ;;  %v1682_v21 = vmul.f32 1.442695, %v1638_v19  ;;  %v1635_v62 = vsub.f32 %v5141_v54, %v1559_v16  ;;  %1786 = vadd.xlane.f32.xlu1 %v1785_v4 }
 0x5d7   : > { %v1610_v57 = vpop.xlane.xlu0 %1609  ;;  %v1734_v27 = vsel %vm768_vm4, %v5269_v12, 0.0 }
 0x5d8   : > { %v5274_v39 = vpop.eup %4233  ;;  %v1676_v53 = vmul.f32 1.442695, %v1635_v62  ;;  %v1652_v13 = vsub.f32 %v5148_v34, %v1610_v57  ;;  %1735 = vadd.xlane.f32.xlu0 %v1734_v27  ;;  %4243 = vpow2.f32 %v1682_v21 }
 0x5d9   : > { %v1577_v23 = vpop.xlane.xlu1 %1576  ;;  %v1737_v14 = vsel %vm768_vm4, %v5274_v39, 0.0 }
 0x5da   : > { %v5279_v7 = vpop.eup %4235  ;;  %4245 = vpow2.f32 %v1676_v53  ;;  %v1710_v54 = vmul.f32 1.442695, %v1652_v13  ;;  %v1641_v37 = vsub.f32 %v5151_v59, %v1577_v23  ;;  %1738 = vadd.xlane.f32.xlu1 %v1737_v14 }
 0x5db   : > { %v1604_v51 = vpop.xlane.xlu0 %1603  ;;  %v1752_v15 = vsel %vm768_vm4, %v5279_v7, 0.0 }
 0x5dc   : > { %v5284_v47 = vpop.eup %4237  ;;  %v1688_v34 = vmul.f32 1.442695, %v1641_v37  ;;  %v1650_v55 = vsub.f32 %v5158_v58, %v1604_v51  ;;  %1753 = vadd.xlane.f32.xlu0 %v1752_v15  ;;  %4247 = vpow2.f32 %v1710_v54 }
 0x5dd   : > { %v1571_v63 = vpop.xlane.xlu1 %1570  ;;  %v1746_v59 = vsel %vm768_vm4, %v5284_v47, 0.0 }
 0x5de   : > { %4249 = vpow2.f32 %v1688_v34  ;;  %v1706_v31 = vmul.f32 1.442695, %v1650_v55  ;;  %v1639_v19 = vsub.f32 %v5161_v25, %v1571_v63  ;;  %v5288_v16 = vpop.eup %4239  ;;  %v6474_v63 = vmov 0.0  }
 0x5df   : > { %v1764_v25 = vsel %vm768_vm4, %v5288_v16, 0.0  ;;  %3996 = vmatprep.subr.bf16.mxu1 %v6474_v63  ;;  %4008 = vmatprep.subr.bf16.mxu0 %v6474_v63 }
 0x5e0   : > { %v5292_v4 = vpop.eup %4241  ;;  %v1684_v21 = vmul.f32 1.442695, %v1639_v19  ;;  %1747 = vadd.xlane.f32.xlu0 %v1746_v59  ;;  %4251 = vpow2.f32 %v1706_v31  ;;  %4004 = vmatprep.mubr.msk.bf16.mxu1 %vm4470_vm7, %v6474_v63 }
 0x5e1   : > { %v1613_v62 = vpop.xlane.xlu1 %1612  ;;  %v1755_v58 = vsel %vm768_vm4, %v5292_v4, 0.0  ;;  %4016 = vmatprep.mubr.msk.bf16.mxu0 %vm4470_vm7, %v6474_v63 }
 0x5e2   : > { %4253 = vpow2.f32 %v1684_v21  ;;  %v1653_v57 = vsub.f32 %v5171_v17, %v1613_v62  ;;  %1756 = vadd.xlane.f32.xlu1 %v1755_v58  ;;  %v5297_v27 = vpop.eup %4243 }
 0x5e3   : > { %v1758_v17 = vsel %vm768_vm4, %v5297_v27, 0.0 }
 0x5e4   : > { %v5301_v53 = vpop.eup %4245  ;;  %v1712_v13 = vmul.f32 1.442695, %v1653_v57  ;;  %1765 = vadd.xlane.f32.xlu0 %v1764_v25  ;;  %v954_v25 = vld [vmem:[%s6460_s7 + $0x40] sm:$0xff] }
 0x5e5   : > { %v1607_v23 = vpop.xlane.xlu1 %1606  ;;  %v1749_v14 = vsel %vm768_vm4, %v5301_v53, 0.0 }
 0x5e6   : > { %4255 = vpow2.f32 %v1712_v13  ;;  %v1651_v54 = vsub.f32 %v5180_v24, %v1607_v23  ;;  %1750 = vadd.xlane.f32.xlu1 %v1749_v14  ;;  %v5306_v37 = vpop.eup %4247  ;;  %v955_v13 = vld [vmem:[%s6460_s7 + $0x48] sm:$0xff]  ;;  %v1622_v23 = vpop.xlane.xlu0 %1621  ;;  %v1649_v14 = vsub.f32 %v5072_v11, %v5208_v10 }
 0x5e7   : > { %v1800_v24 = vsel %vm768_vm4, %v5306_v37, 0.0 }
 0x5e8   : > { %v5310_v51 = vpop.eup %4249  ;;  %v1708_v15 = vmul.f32 1.442695, %v1651_v54  ;;  %1759 = vadd.xlane.f32.xlu0 %v1758_v17  ;;  %v1704_v17 = vmul.f32 1.442695, %v1649_v14 }
 0x5e9   : > { %v1767_v34 = vsel %vm768_vm4, %v5310_v51, 0.0 }
 0x5ea   : > { %4257 = vpow2.f32 %v1708_v15  ;;  %1768 = vadd.xlane.f32.xlu1 %v1767_v34  ;;  %v5314_v55 = vpop.eup %4251  ;;  %v1616_v54 = vpop.xlane.xlu0 %1615 }
 0x5eb   : > { %v1794_v59 = vsel %vm768_vm4, %v5314_v55, 0.0  ;;  %v1654_v15 = vsub.f32 %v5177_v40, %v1616_v54  ;;  %v1625_v34 = vpop.xlane.xlu1 %1624  ;;  %4259 = vpow2.f32 %v1704_v17 }
 0x5ec   : > { %v5320_v31 = vpop.eup %4253  ;;  %1801 = vadd.xlane.f32.xlu0 %v1800_v24  ;;  %v1648_v24 = vsub.f32 %v5060_v56, %v5206_v41 }
 0x5ed   : > { %v1761_v19 = vsel %vm768_vm4, %v5320_v31, 0.0 }
 0x5ee   : > { %1762 = vadd.xlane.f32.xlu1 %v1761_v19  ;;  %v1656_v19 = vsub.f32 %v5168_v20, %v1622_v23 }
 0x5f0   : > { %v5326_v21 = vpop.eup %4255  ;;  %1795 = vadd.xlane.f32.xlu0 %v1794_v59  ;;  %v1714_v59 = vmul.f32 1.442695, %v1654_v15 }
 0x5f1   : > { %v1803_v62 = vsel %vm768_vm4, %v5326_v21, 0.0 }
 0x5f2   : > { %1804 = vadd.xlane.f32.xlu1 %v1803_v62  ;;  %v1702_v62 = vmul.f32 1.442695, %v1648_v24  ;;  %4261 = vpow2.f32 %v1714_v59  ;;  %v957_v59 = vld [vmem:[%s6460_s7 + $0x58] sm:$0xff] }
 0x5f4   : > { %v5330_v58 = vpop.eup %4257  ;;  %4263 = vpow2.f32 %v1702_v62  ;;  %v959_v62 = vld [vmem:[%s6460_s7 + $0x68] sm:$0xff] }
 0x5f5   : > { %v1797_v57 = vsel %vm768_vm4, %v5330_v58, 0.0  ;;  %v5352_v40 = vpop.eup %4259 }
 0x5f6   : > { %1798 = vadd.xlane.f32.xlu1 %v1797_v57  ;;  %v1657_v57 = vsub.f32 %v5187_v48, %v1625_v34  ;;  %6520 = vst [vmem:[#allocation22_spill] sm:$0xff] %v5352_v40  ;;  %v1791_v56 = vsel %vm768_vm4, %v5352_v40, 0.0  ;;  %v5495_v40 = vld [vmem:[%s6456_s3 + $0x68] sm:$0xff] }
 0x5f8   : > { %v1720_v11 = vmul.f32 1.442695, %v1657_v57  ;;  %v958_v57 = vld [vmem:[%s6460_s7 + $0x60] sm:$0xff] }
 0x5fc   : > { %v5356_v20 = vpop.eup %4261 }
 0x5fd   : > { %6521 = vst [vmem:[#allocation23_spill] sm:$0xff] %v5356_v20  ;;  %v1806_v41 = vsel %vm768_vm4, %v5356_v20, 0.0 }
 0x5fe   : > { %v5358_v48 = vpop.eup %4263 }
 0x606   : > { %1012 = vperm.xlu0 %4173, %v954_v25   ;;  %v1619_v25 = vpop.xlane.xlu1 %1618 }
 0x607   : > { %1017 = vperm.xlu1 %4172, %v955_v13   ;;  %v1718_v13 = vmul.f32 1.442695, %v1656_v19  ;;  %v1655_v10 = vsub.f32 %v5194_v43, %v1619_v25  ;;  %v1788_v43 = vsel %vm768_vm4, %v5358_v48, 0.0  ;;  %v956_v19 = vld [vmem:[%s6460_s7 + $0x50] sm:$0xff]  ;;  %v961_v25 = vld [vmem:[%s6460_s7 + $0x78] sm:$0xff] }
 0x609   : > { %4265 = vpow2.f32 %v1718_v13  ;;  %v1716_v14 = vmul.f32 1.442695, %v1655_v10  ;;  %v960_v13 = vld [vmem:[%s6460_s7 + $0x70] sm:$0xff]  ;;  %v5399_v10 = vld [vmem:[%s6456_s3 + $0x8] sm:$0xff] }
 0x60a   : > { %4267 = vpow2.f32 %v1720_v11 }
 0x60b   : > { %4269 = vpow2.f32 %v1716_v14  ;;  %v5404_v14 = vld [vmem:[%s6456_s3] sm:$0xff] }
 0x613   : > { %v5362_v23 = vpop.eup %4265 }
 0x614   : > { %6522 = vst [vmem:[#allocation24_spill] sm:$0xff] %v5362_v23  ;;  %v5366_v54 = vpop.eup %4267  ;;  %v1812_v17 = vsel %vm768_vm4, %v5362_v23, 0.0 }
 0x615   : > { %6523 = vst [vmem:[#allocation25_spill] sm:$0xff] %v5366_v54  ;;  %v1815_v15 = vsel %vm768_vm4, %v5366_v54, 0.0  ;;  %v5372_v34 = vpop.eup %4269 }
 0x616   : > { %6524 = vst [vmem:[#allocation26_spill] sm:$0xff] %v5372_v34  ;;  %v1809_v24 = vsel %vm768_vm4, %v5372_v34, 0.0 }
 0x625   : > { %1792 = vadd.xlane.f32.xlu0 %v1791_v56 }
 0x629   : > { %1807 = vadd.xlane.f32.xlu0 %v1806_v41  ;;  %v4471_v41 = vmov 5  }
 0x62b   : > { %1789 = vadd.xlane.f32.xlu1 %v1788_v43 }
 0x62d   : > { %1813 = vadd.xlane.f32.xlu0 %v1812_v17  ;;  %v5413_v17 = vld [vmem:[%s6456_s3 + $0x10] sm:$0xff] }
 0x62f   : > { %1816 = vadd.xlane.f32.xlu1 %v1815_v15  ;;  %v5418_v15 = vld [vmem:[%s6456_s3 + $0x20] sm:$0xff] }
 0x633   : > { %1810 = vadd.xlane.f32.xlu1 %v1809_v24 }
 0x643   : > { %1022 = vperm.xlu0 %4173, %v956_v19  }
 0x644   : > { %1027 = vperm.xlu1 %4172, %v957_v59   ;;  %v5427_v59 = vld [vmem:[%s6456_s3 + $0x30] sm:$0xff] }
 0x647   : > { %2133 = vperm.xlu0 %4173, %v959_v62   ;;  %v5432_v62 = vld [vmem:[%s6456_s3 + $0x28] sm:$0xff] }
 0x648   : > { %2128 = vperm.xlu1 %4172, %v958_v57  }
 0x64b   : > { %2143 = vperm.xlu0 %4173, %v961_v25  }
 0x64c   : > { %2138 = vperm.xlu1 %4172, %v960_v13   ;;  %v5441_v13 = vld [vmem:[%s6456_s3 + $0x40] sm:$0xff] }
 0x64d   : > { %v5394_v11 = vpop.xlane.xlu0 %1777 }
 0x64f   : > { %v5406_v56 = vpop.xlane.xlu1 %1780  ;;  %4175 = vset.pattern.permute.xlu0 %v4471_v41 }
 0x650   : > { %4174 = vset.pattern.permute.xlu1 %v4471_v41  ;;  %2288 = vperm.xlu0 %4175, %v5399_v10   ;;  %v5446_v41 = vld [vmem:[%s6456_s3 + $0x18] sm:$0xff] }
 0x651   : > { %2283 = vperm.xlu1 %4174, %v5404_v14   ;;  %v1730_v43 = vpop.xlane.xlu0 %1729 }
 0x653   : > { %v1733_v24 = vpop.xlane.xlu1 %1732 }
 0x654   : > { %2293 = vperm.xlu0 %4175, %v5413_v17  }
 0x655   : > { %2307 = vperm.xlu1 %4174, %v5418_v15   ;;  %v5422_v19 = vpop.xlane.xlu0 %1771 }
 0x657   : > { %v5434_v57 = vpop.xlane.xlu1 %1774 }
 0x658   : > { %2317 = vperm.xlu0 %4175, %v5427_v59  }
 0x659   : > { %2312 = vperm.xlu1 %4174, %v5432_v62   ;;  %v1724_v25 = vpop.xlane.xlu0 %1723 }
 0x65a   : > { %4271 = vrcp.f32 %v1724_v25  ;;  %v5458_v25 = vld [vmem:[%s6456_s3 + $0x38] sm:$0xff] }
 0x65b   : > { %v1727_v63 = vpop.xlane.xlu1 %1726 }
 0x65c   : > { %4273 = vrcp.f32 %v1727_v63  ;;  %2335 = vperm.xlu0 %4175, %v5441_v13  }
 0x65d   : > { %2298 = vperm.xlu1 %4174, %v5446_v41   ;;  %v1742_v2 = vpop.xlane.xlu0 %1741  ;;  %4275 = vrcp.f32 %v1733_v24  ;;  %v5472_v24 = vld [vmem:[%s6456_s3 + $0x48] sm:$0xff] }
 0x65e   : > { %4277 = vrcp.f32 %v1730_v43 }
 0x65f   : > { %v1745_v50 = vpop.xlane.xlu1 %1744 }
 0x660   : > { %2345 = vperm.xlu0 %4175, %v5453_v6  }
 0x661   : > { %2322 = vperm.xlu1 %4174, %v5458_v25   ;;  %v5462_v63 = vpop.xlane.xlu0 %1783 }
 0x663   : > { %v5474_v32 = vpop.xlane.xlu1 %1786 }
 0x664   : > { %v4272_v30 = vpop.eup %4271  ;;  %2363 = vperm.xlu0 %4175, %v5467_v44  }
 0x665   : > { %2340 = vperm.xlu1 %4174, %v5472_v24   ;;  %v1736_v43 = vpop.xlane.xlu0 %1735  ;;  %v1850_v54 = vmul.f32 %v4272_v30, %v5232_v38  ;;  %v4472_v38 = vmov 6  }
 0x666   : > { %v4274_v35 = vpop.eup %4273  ;;  %4279 = vrcp.f32 %v1736_v43 }
 0x667   : > { %v1739_v23 = vpop.xlane.xlu1 %1738  ;;  %v1851_v44 = vmul.f32 %v4274_v35, %v5241_v8  ;;  %v4276_v26 = vpop.eup %4275  ;;  %v5506_v8 = vld [vmem:[%s6456_s3 + $0x78] sm:$0xff] }
 0x668   : > { %4281 = vrcp.f32 %v1739_v23  ;;  %2373 = vperm.xlu0 %4175, %v5481_v33   ;;  %v4278_v60 = vpop.eup %4277  ;;  %v1853_v30 = vmul.f32 %v4276_v26, %v5226_v46 }
 0x669   : > { %2350 = vperm.xlu1 %4174, %v5486_v1   ;;  %v1754_v34 = vpop.xlane.xlu0 %1753  ;;  %v1886_v20 = vpack.c.bf16 %v1851_v44, %v1850_v54  ;;  %v1852_v44 = vmul.f32 %v4278_v60, %v5212_v45  ;;  %4283 = vrcp.f32 %v1745_v50 }
 0x66a   : > { %4285 = vrcp.f32 %v1742_v2 }
 0x66b   : > { %v1906_v43 = vsel %vm768_vm4, %v1886_v20, 0  ;;  %v6526_v20 = vmov 0.0   ;;  %v1887_v46 = vpack.c.bf16 %v1853_v30, %v1852_v44 }
 0x66c   : > { %4176 = vset.pattern.permute.xlu0 %v4472_v38  ;;  %3997 = vmatpush3.bf16.xpose.msra.mxu1 %v1906_v43 }
 0x66d   : > { %2368 = vperm.xlu1 %4174, %v5495_v40   ;;  %2454 = vperm.xlu0 %4176, %v5404_v14   ;;  %v1748_v35 = vpop.xlane.xlu0 %1747  ;;  %v1909_v60 = vsel %vm768_vm4, %v1887_v46, 0 }
 0x66e   : > { %3998 = vmatprep.subr.bf16.mxu1 %v6526_v20  ;;  %4287 = vrcp.f32 %v1748_v35 }
 0x66f   : > { %v1757_v26 = vpop.xlane.xlu1 %1756 }
 0x670   : > { %v4280_v23 = vpop.eup %4279 }
 0x671   : > { %2378 = vperm.xlu1 %4174, %v5506_v8   ;;  %2478 = vperm.xlu0 %4176, %v5432_v62   ;;  %v5511_v54 = vpop.xlane.xlu0 %1765  ;;  %v1854_v30 = vmul.f32 %v4280_v23, %v5269_v12 }
 0x672   : > { %v4282_v43 = vpop.eup %4281 }
 0x673   : > { %v1751_v50 = vpop.xlane.xlu1 %1750  ;;  %v1855_v45 = vmul.f32 %v4282_v43, %v5274_v39  ;;  %v4284_v46 = vpop.eup %4283 }
 0x674   : > { %4289 = vrcp.f32 %v1751_v50  ;;  %3999 = vmatpush3.bf16.xpose.msra.mxu1 %v1909_v60  ;;  %v4286_v39 = vpop.eup %4285  ;;  %v1857_v23 = vmul.f32 %v4284_v46, %v5254_v9 }
 0x675   : > { %4177 = vset.pattern.permute.xlu1 %v4472_v38  ;;  %2462 = vperm.xlu0 %4176, %v5413_v17   ;;  %v1760_v2 = vpop.xlane.xlu0 %1759  ;;  %4291 = vrcp.f32 %v1757_v26  ;;  %v1888_v44 = vpack.c.bf16 %v1855_v45, %v1854_v30 }
 0x676   : > { %2458 = vperm.xlu1 %4177, %v5399_v10   ;;  %4000 = vmatprep.subr.bf16.mxu1 %v6526_v20  ;;  %4293 = vrcp.f32 %v5434_v57  ;;  %v4473_v57 = vmov 2  }
 0x677   : > { %v1769_v35 = vpop.xlane.xlu1 %1768  ;;  %4295 = vrcp.f32 %v1754_v34  ;;  %v1912_v26 = vsel %vm768_vm4, %v1888_v44, 0  ;;  %v1856_v34 = vmul.f32 %v4286_v39, %v5249_v18 }
 0x678   : > { %4297 = vrcp.f32 %v5422_v19  ;;  %v4288_v50 = vpop.eup %4287 }
 0x679   : > { %2486 = vperm.xlu0 %4176, %v5458_v25   ;;  %v5524_v43 = vpop.xlane.xlu0 %1801  ;;  %v1889_v60 = vpack.c.bf16 %v1857_v23, %v1856_v34  ;;  %v1858_v9 = vmul.f32 %v4288_v50, %v5284_v47 }
 0x67a   : > { %2474 = vperm.xlu1 %4177, %v5418_v15  }
 0x67b   : > { %v1763_v12 = vpop.xlane.xlu1 %1762 }
 0x67c   : > { %4001 = vmatpush3.bf16.xpose.msra.mxu1 %v1912_v26  ;;  %4299 = vrcp.f32 %v1763_v12 }
 0x67d   : > { %2498 = vperm.xlu0 %4176, %v5441_v13   ;;  %4002 = vmatprep.subr.bf16.mxu1 %v6526_v20  ;;  %4301 = vrcp.f32 %v5406_v56  ;;  %v1796_v18 = vpop.xlane.xlu0 %1795  ;;  %v1915_v56 = vsel %vm768_vm4, %v1889_v60, 0 }
 0x67e   : > { %v4290_v19 = vpop.eup %4289  ;;  %4178 = vset.pattern.permute.xlu1 %v4473_v57  ;;  %4303 = vrcp.f32 %v1760_v2 }
 0x67f   : > { %2638 = vperm.xlu1 %4178, %v5404_v14   ;;  %v1859_v45 = vmul.f32 %v4290_v19, %v5301_v53  ;;  %v4292_v30 = vpop.eup %4291  ;;  %4305 = vrcp.f32 %v5394_v11  ;;  %v1805_v2 = vpop.xlane.xlu1 %1804 }
 0x680   : > { %v4294_v44 = vpop.eup %4293  ;;  %v1861_v47 = vmul.f32 %v4292_v30, %v5292_v4  ;;  %4307 = vrcp.f32 %v1769_v35 }
 0x681   : > { %2510 = vperm.xlu0 %4176, %v5486_v1   ;;  %v1890_v46 = vpack.c.bf16 %v1859_v45, %v1858_v9  ;;  %v4296_v39 = vpop.eup %4295  ;;  %v1867_v53 = vmul.f32 %v4294_v44, %v5236_v5  ;;  %4309 = vrcp.f32 %v5474_v32 }
 0x682   : > { %v4298_v12 = vpop.eup %4297  ;;  %v1860_v23 = vmul.f32 %v4296_v39, %v5279_v7  ;;  %4311 = vrcp.f32 %v5511_v54 }
 0x683   : > { %2658 = vperm.xlu1 %4178, %v5418_v15   ;;  %v1961_v26 = vsel %vm768_vm4, %v1890_v46, 0  ;;  %v1866_v4 = vmul.f32 %v4298_v12, %v5222_v52  ;;  %4313 = vrcp.f32 %v5462_v63  ;;  %v1799_v35 = vpop.xlane.xlu1 %1798 }
 0x684   : > { %4003 = vmatpush3.bf16.xpose.msra.mxu1 %v1915_v56  ;;  %4009 = vmatpush3.bf16.xpose.msra.mxu0 %v1961_v26  ;;  %v1891_v5 = vpack.c.bf16 %v1861_v47, %v1860_v23  ;;  %4315 = vrcp.f32 %v1799_v35 }
 0x685   : > { %2419 = vrot.lane.b32.xlu0 %v4903_v22, %s6527_s26  ;;  %v1013_v11 = vpop.permute.xlu0 %1012  ;;  %4010 = vmatprep.subr.bf16.mxu0 %v6526_v20  ;;  %v1894_v60 = vpack.c.bf16 %v1867_v53, %v1866_v4  ;;  %4317 = vrcp.f32 %v1796_v18 }
 0x686   : > { %v1116_v50 = vadd.f32 %v4986_v61, %v1013_v11  ;;  %4020 = vmatprep.subr.bf16.mxu1 %v6526_v20  ;;  %v4300_v34 = vpop.eup %4299  ;;  %v1964_v32 = vsel %vm768_vm4, %v1891_v5, 0  ;;  %4319 = vrcp.f32 %v1805_v2 }
 0x687   : > { %2662 = vperm.xlu1 %4178, %v5432_v62   ;;  %v4302_v9 = vpop.eup %4301  ;;  %v1863_v52 = vmul.f32 %v4300_v34, %v5320_v31  ;;  %v2016_v54 = vsel %vm768_vm4, %v1894_v60, 0  ;;  %4321 = vrcp.f32 %v5524_v43  ;;  %v1018_v23 = vpop.permute.xlu1 %1017  ;;  %v4474_v60 = vmov 7  }
 0x688   : > { %v1882_v19 = vpack.c.bf16 %v1116_v50, %v1116_v50  ;;  %v4304_v61 = vpop.eup %4303  ;;  %v1869_v63 = vmul.f32 %v4302_v9, %v5216_v42  ;;  %v1119_v50 = vadd.f32 %v4990_v3, %v1018_v23 }
 0x689   : > { %2435 = vrot.lane.b32.xlu0 %v4907_v29, %s6528_s27  ;;  %v4306_v7 = vpop.eup %4305  ;;  %v1862_v45 = vmul.f32 %v4304_v61, %v5297_v27 }
 0x68a   : > { %v1868_v30 = vmul.f32 %v4306_v7, %v5210_v36  ;;  %v4308_v44 = vpop.eup %4307  ;;  %v1883_v5 = vpack.c.bf16 %v1119_v50, %v1119_v50 }
 0x68b   : > { %4179 = vset.pattern.permute.xlu1 %v4472_v38  ;;  %4005 = vmatmul.mubr.msk.bf16.vlgmr.msra.gmra.mrb[24].mxu1 %vm768_vm4, %v1882_v19  ;;  %v1892_v31 = vpack.c.bf16 %v1863_v52, %v1862_v45  ;;  %v4310_v46 = vpop.eup %4309  ;;  %v1865_v56 = vmul.f32 %v4308_v44, %v5310_v51 }
 0x68c   : > { %2466 = vperm.xlu1 %4179, %v5446_v41   ;;  %4011 = vmatpush3.bf16.xpose.msra.mxu0 %v1964_v32  ;;  %v1895_v42 = vpack.c.bf16 %v1869_v63, %v1868_v30  ;;  %v4312_v27 = vpop.eup %4311  ;;  %v1871_v18 = vmul.f32 %v4310_v46, %v5264_v49  ;;  %v6529_v30 = vld [vmem:[#allocation22_spill] sm:$0xff] }
 0x68d   : > { %4021 = vmatpush3.bf16.xpose.msra.mxu1 %v2016_v54  ;;  %2526 = vperm.xlu0 %4176, %v5495_v40   ;;  %v4314_v39 = vpop.eup %4313  ;;  %v1967_v12 = vsel %vm768_vm4, %v1892_v31, 0  ;;  %v1864_v26 = vmul.f32 %v4312_v27, %v5288_v16 }
 0x68e   : > { %4012 = vmatprep.subr.bf16.mxu0 %v6526_v20  ;;  %4022 = vmatprep.subr.bf16.mxu1 %v6526_v20  ;;  %v2019_v36 = vsel %vm768_vm4, %v1895_v42, 0  ;;  %v1870_v47 = vmul.f32 %v4314_v39, %v5259_v0  ;;  %v4316_v53 = vpop.eup %4315  ;;  %v6530_v39 = vld [vmem:[#allocation20_spill] sm:$0xff] }
 0x68f   : > { %4028 = vmatprep.mubr.msk.bf16.mxu1 %vm4470_vm7, %v6526_v20  ;;  %v1893_v51 = vpack.c.bf16 %v1865_v56, %v1864_v26  ;;  %v4318_v49 = vpop.eup %4317  ;;  %v1875_v2 = vmul.f32 %v4316_v53, %v5330_v58 }
 0x690   : > { %2482 = vperm.xlu1 %4179, %v5427_v59   ;;  %v1896_v11 = vpack.c.bf16 %v1871_v18, %v1870_v47  ;;  %v1874_v43 = vmul.f32 %v4318_v49, %v5314_v55  ;;  %v4320_v58 = vpop.eup %4319  ;;  %v6532_v18 = vld [vmem:[#allocation26_spill] sm:$0xff]  ;;  %v6533_v49 = vld [vmem:[#allocation13_spill] sm:$0xff] }
 0x691   : > { %2437 = vrot.lane.b32.xlu0 %v4905_v28, %s6528_s27  ;;  %v1970_v16 = vsel %vm768_vm4, %v1893_v51, 0  ;;  %v4322_v34 = vpop.eup %4321  ;;  %v1877_v55 = vmul.f32 %v4320_v58, %v5326_v21 }
 0x692   : > { %v2022_v0 = vsel %vm768_vm4, %v1896_v11, 0  ;;  %v1898_v4 = vpack.c.bf16 %v1875_v2, %v1874_v43  ;;  %v1876_v19 = vmul.f32 %v4322_v34, %v5306_v37 }
 0x694   : > { %4180 = vset.pattern.permute.xlu1 %v4473_v57  ;;  %4013 = vmatpush3.bf16.xpose.msra.mxu0 %v1967_v12  ;;  %v2071_v3 = vsel %vm768_vm4, %v1898_v4, 0  ;;  %v1899_v9 = vpack.c.bf16 %v1877_v55, %v1876_v19  ;;  %v6537_v55 = vld [vmem:[#allocation27_spill] sm:$0xff] }
 0x695   : > { %4023 = vmatpush3.bf16.xpose.msra.mxu1 %v2019_v36  ;;  %2646 = vperm.xlu1 %4180, %v5413_v17   ;;  %v6531_v36 = vld [vmem:[#allocation23_spill] sm:$0xff] }
 0x696   : > { %4014 = vmatprep.subr.bf16.mxu0 %v6526_v20  ;;  %4024 = vmatprep.subr.bf16.mxu1 %v6526_v20  ;;  %v2074_v21 = vsel %vm768_vm4, %v1899_v9, 0  ;;  %v942_v19 = vld [vmem:[%s6459_s6 + $0x60] sm:$0xff]  ;;  %v943_v9 = vld [vmem:[%s6459_s6 + $0x68] sm:$0xff] }
 0x697   : > { %2530 = vperm.xlu0 %4176, %v5481_v33  }
 0x699   : > { %2666 = vperm.xlu1 %4180, %v5427_v59  }
 0x69b   : > { %4190 = vset.pattern.permute.xlu0 %v4473_v57 }
 0x69c   : > { %4015 = vmatpush3.bf16.xpose.msra.mxu0 %v1970_v16  ;;  %2642 = vperm.xlu0 %4190, %v5399_v10   ;;  %v6534_v16 = vld [vmem:[#allocation25_spill] sm:$0xff] }
 0x69d   : > { %4025 = vmatpush3.bf16.xpose.msra.mxu1 %v2022_v0  ;;  %2670 = vperm.xlu1 %4180, %v5458_v25   ;;  %v6535_v0 = vld [vmem:[#allocation24_spill] sm:$0xff] }
 0x69e   : > { %4032 = vmatprep.subr.bf16.mxu0 %v6526_v20  ;;  %4026 = vmatprep.subr.bf16.mxu1 %v6526_v20 }
 0x6a0   : > { %2650 = vperm.xlu0 %4190, %v5446_v41  }
 0x6a1   : > { %4181 = vset.pattern.permute.xlu1 %v4472_v38 }
 0x6a2   : > { %2502 = vperm.xlu1 %4181, %v5472_v24  }
 0x6a3   : > { %4017 = vmatmul.mubr.msk.bf16.vlgmr.msra.gmra.mrb[32].mxu0 %vm768_vm4, %v1883_v5  ;;  %v6536_v5 = vld [vmem:[#allocation21_spill] sm:$0xff] }
 0x6a4   : > { %4033 = vmatpush3.bf16.xpose.msra.mxu0 %v2071_v3  ;;  %4040 = vmatprep.mubr.msk.bf16.mxu0 %vm4470_vm7, %v6526_v20 }
 0x6a5   : > { %4034 = vmatprep.subr.bf16.mxu0 %v6526_v20  ;;  %2682 = vperm.xlu0 %4190, %v5441_v13  }
 0x6a6   : > { %4182 = vset.pattern.permute.xlu1 %v4474_v60 }
 0x6a7   : > { %2542 = vperm.xlu1 %4182, %v5404_v14  }
 0x6a9   : > { %2694 = vperm.xlu0 %4190, %v5486_v1  }
 0x6ab   : > { %2562 = vperm.xlu1 %4182, %v5418_v15  }
 0x6ac   : > { %4035 = vmatpush3.bf16.xpose.msra.mxu0 %v2074_v21  ;;  %v2122_v21 = vpack.c.bf16 %v943_v9, %v942_v19 }
 0x6ad   : > { %4036 = vmatprep.subr.bf16.mxu0 %v6526_v20  ;;  %2714 = vperm.xlu0 %4190, %v5481_v33  }
 0x6af   : > { %2566 = vperm.xlu1 %4182, %v5432_v62  }
 0x6b1   : > { %4192 = vset.pattern.permute.xlu0 %v4474_v60 }
 0x6b2   : > { %2546 = vperm.xlu0 %4192, %v5399_v10   ;;  %v1793_v37 = vpop.xlane.xlu0 %1792 }
 0x6b3   : > { %4183 = vset.pattern.permute.xlu1 %v4473_v57  ;;  %4323 = vrcp.f32 %v1793_v37 }
 0x6b4   : > { %2686 = vperm.xlu1 %4183, %v5472_v24  }
 0x6b6   : > { %v1808_v7 = vpop.xlane.xlu0 %1807 }
 0x6b8   : > { %4184 = vset.pattern.permute.xlu1 %v4472_v38  ;;  %v1790_v61 = vpop.xlane.xlu1 %1789 }
 0x6b9   : > { %4325 = vrcp.f32 %v1790_v61  ;;  %2506 = vperm.xlu1 %4184, %v5453_v6  }
 0x6ba   : > { %4327 = vrcp.f32 %v1808_v7  ;;  %v1814_v54 = vpop.xlane.xlu0 %1813 }
 0x6bc   : > { %v1817_v35 = vpop.xlane.xlu1 %1816 }
 0x6bd   : > { %4185 = vset.pattern.permute.xlu1 %v4474_v60  ;;  %v4324_v52 = vpop.eup %4323 }
 0x6be   : > { %2550 = vperm.xlu1 %4185, %v5413_v17   ;;  %v1873_v31 = vmul.f32 %v4324_v52, %v6529_v30 }
 0x6c0   : > { %v1811_v32 = vpop.xlane.xlu1 %1810 }
 0x6c1   : > { %4329 = vrcp.f32 %v1811_v32 }
 0x6c2   : > { %2554 = vperm.xlu1 %4185, %v5446_v41   ;;  %4331 = vrcp.f32 %v1817_v35  ;;  %v1023_v42 = vpop.permute.xlu0 %1022 }
 0x6c3   : > { %v4326_v63 = vpop.eup %4325  ;;  %4333 = vrcp.f32 %v1814_v54  ;;  %v1124_v12 = vadd.f32 %v6530_v39, %v1023_v42  ;;  %v944_v42 = vld [vmem:[%s6459_s6 + $0x70] sm:$0xff] }
 0x6c4   : > { %v1872_v45 = vmul.f32 %v4326_v63, %v5358_v48  ;;  %v4328_v27 = vpop.eup %4327  ;;  %v1028_v4 = vpop.permute.xlu1 %1027 }
 0x6c5   : > { %v1878_v48 = vmul.f32 %v4328_v27, %v6531_v36  ;;  %v1884_v51 = vpack.c.bf16 %v1124_v12, %v1124_v12  ;;  %v1127_v34 = vadd.f32 %v6536_v5, %v1028_v4 }
 0x6c6   : > { %2574 = vperm.xlu1 %4185, %v5458_v25   ;;  %v1897_v44 = vpack.c.bf16 %v1873_v31, %v1872_v45 }
 0x6c7   : > { %v1885_v3 = vpack.c.bf16 %v1127_v34, %v1127_v34  ;;  %v2134_v34 = vpop.permute.xlu0 %2133 }
 0x6c8   : > { %v2025_v46 = vsel %vm768_vm4, %v1897_v44, 0 }
 0x6c9   : > { %4027 = vmatpush3.bf16.xpose.msra.mxu1 %v2025_v46  ;;  %v945_v46 = vld [vmem:[%s6459_s6 + $0x78] sm:$0xff] }
 0x6ca   : > { %4186 = vset.pattern.permute.xlu1 %v4473_v57  ;;  %v2123_v36 = vpack.c.bf16 %v945_v46, %v944_v42 }
 0x6cb   : > { %v4330_v56 = vpop.eup %4329  ;;  %2690 = vperm.xlu1 %4186, %v5453_v6   ;;  %v2144_v19 = vpop.permute.xlu0 %2143 }
 0x6cc   : > { %v1879_v26 = vmul.f32 %v4330_v56, %v6532_v18  ;;  %v4332_v47 = vpop.eup %4331 }
 0x6cd   : > { %v4334_v11 = vpop.eup %4333  ;;  %v1881_v2 = vmul.f32 %v4332_v47, %v6534_v16 }
 0x6ce   : > { %v1900_v53 = vpack.c.bf16 %v1879_v26, %v1878_v48  ;;  %v1880_v50 = vmul.f32 %v4334_v11, %v6535_v0  ;;  %v2129_v48 = vpop.permute.xlu1 %2128 }
 0x6cf   : > { %2413 = vrot.lane.b32.xlu1 %v6533_v49, %s6527_s26  ;;  %v5706_v9 = vpop.permute.xlu0 %2288 }
 0x6d0   : > { %4029 = vmatmul.mubr.msk.bf16.vlgmr.msra.gmra.mrb[28].mxu1 %vm768_vm4, %v1884_v51  ;;  %v2077_v23 = vsel %vm768_vm4, %v1900_v53, 0  ;;  %4187 = vset.pattern.permute.xlu1 %v4474_v60  ;;  %v1901_v43 = vpack.c.bf16 %v1881_v2, %v1880_v50 }
 0x6d1   : > { %4037 = vmatpush3.bf16.xpose.msra.mxu0 %v2077_v23  ;;  %4048 = vmatprep.mubr.msk.bf16.mxu1 %vm1030_vm6, %v2122_v21 }
 0x6d2   : > { %4038 = vmatprep.subr.bf16.mxu0 %v6526_v20  ;;  %v2080_v58 = vsel %vm768_vm4, %v1901_v43, 0  ;;  %v2139_v18 = vpop.permute.xlu1 %2138 }
 0x6d3   : > { %2415 = vrot.lane.b32.xlu1 %v4907_v29, %s6527_s26 }
 0x6d6   : > { %v5676_v26 = vpop.permute.xlu1 %2283 }
 0x6d7   : > { %2590 = vperm.xlu1 %4187, %v5472_v24  }
 0x6d9   : > { %4039 = vmatpush3.bf16.xpose.msra.mxu0 %v2080_v58 }
 0x6da   : > { %v5678_v47 = vpop.permute.xlu1 %2307 }
 0x6db   : > { %2417 = vrot.lane.b32.xlu1 %v4905_v28, %s6527_s26 }
 0x6de   : > { %v5680_v51 = vpop.permute.xlu1 %2312 }
 0x6df   : > { %2594 = vperm.xlu1 %4187, %v5453_v6  }
 0x6e0   : > { %4041 = vmatmul.mubr.msk.bf16.vlgmr.msra.gmra.mrb[36].mxu0 %vm768_vm4, %v1885_v3 }
 0x6e2   : > { %v5682_v53 = vpop.permute.xlu1 %2298 }
 0x6e3   : > { %2433 = vrot.lane.b32.xlu1 %v6533_v49, %s6528_s27 }
 0x6e4   : > { %4188 = vset.pattern.permute.xlu1 %v4472_v38 }
 0x6e6   : > { %v5684_v11 = vpop.permute.xlu1 %2322 }
 0x6e7   : > { %2522 = vperm.xlu1 %4188, %v6537_v55  }
 0x6ea   : > { %v5686_v23 = vpop.permute.xlu1 %2340 }
 0x6eb   : > { %4189 = vset.pattern.permute.xlu1 %v4473_v57 }
 0x6ec   : > { %2706 = vperm.xlu1 %4189, %v6537_v55  }
 0x6ee   : > { %v5688_v16 = vpop.permute.xlu1 %2350 }
 0x6f0   : > { %2710 = vperm.xlu1 %4189, %v5495_v40  }
 0x6f2   : > { %v5690_v2 = vpop.permute.xlu1 %2368 }
 0x6f4   : > { %2439 = vrot.lane.b32.xlu1 %v4903_v22, %s6528_s27 }
 0x6f5   : > { %4191 = vset.pattern.permute.xlu1 %v4472_v38 }
 0x6f6   : > { %v5692_v0 = vpop.permute.xlu1 %2378 }
 0x6f8   : > { %2534 = vperm.xlu1 %4191, %v5506_v8  }
 0x6fa   : > { %v5694_v50 = vpop.permute.xlu1 %2458 }
 0x6fb   : > { %6538 = vst [vmem:[#allocation22_spill] sm:$0xff] %v5694_v50  ;;  %v3778_v50 = vld [vmem:[%s6457_s4 + $0xd8] sm:$0xff] }
 0x6fc   : > { %4193 = vset.pattern.permute.xlu1 %v4473_v57 }
 0x6fe   : > { %v5696_v43 = vpop.permute.xlu1 %2474 }
 0x6ff   : > { %6539 = vst [vmem:[#allocation20_spill] sm:$0xff] %v5696_v43 }
 0x702   : > { %v5698_v4 = vpop.permute.xlu1 %2638 }
 0x706   : > { %v5700_v58 = vpop.permute.xlu1 %2658 }
 0x70a   : > { %v5702_v5 = vpop.permute.xlu1 %2662 }
 0x70e   : > { %v5704_v3 = vpop.permute.xlu1 %2466 }
 0x712   : > { %v5708_v21 = vpop.permute.xlu1 %2482 }
 0x75e   : > { %v1951_v37 = vpop.f32.mrb[24].mxu1 }
 0x75f   : > { %v4006_v61 = vpop.f32.mrb[25].mxu1 }
 0x760   : > { %v1954_v7 = vpop.f32.mrb[26].mxu1  ;;  %v5712_v61 = vpop.permute.xlu0 %2293 }
 0x761   : > { %v4007_v35 = vpop.f32.mrb[27].mxu1 }
 0x764   : > { %v5716_v35 = vpop.permute.xlu0 %2317 }
 0x776   : > { %v2006_v38 = vpop.f32.mrb[32].mxu0 }
 0x777   : > { %v2124_v32 = vpack.c.bf16 %v2006_v38, %v1951_v37  ;;  %v4018_v52 = vpop.f32.mrb[33].mxu0  ;;  %v5710_v37 = vpop.permute.xlu1 %2646 }
 0x778   : > { %v2009_v54 = vpop.f32.mrb[34].mxu0 }
 0x779   : > { %v4019_v57 = vpop.f32.mrb[35].mxu0  ;;  %4044 = vmatprep.subr.bf16.mxu1 %v2124_v32 }
 0x77a   : > { %4045 = vmatpush3.bf16.msra.mxu1 %v2124_v32  ;;  %v5720_v32 = vpop.permute.xlu0 %2335 }
 0x77b   : > { %v5714_v7 = vpop.permute.xlu1 %2666 }
 0x77e   : > { %v5727_v46 = vpop.permute.xlu0 %2345 }
 0x77f   : > { %v5718_v38 = vpop.permute.xlu1 %2670 }
 0x7a3   : > { %v2061_v63 = vpop.f32.mrb[28].mxu1 }
 0x7a4   : > { %v4030_v45 = vpop.f32.mrb[29].mxu1 }
 0x7a5   : > { %v2064_v30 = vpop.f32.mrb[30].mxu1  ;;  %v5722_v45 = vpop.permute.xlu1 %2502 }
 0x7a6   : > { %v4031_v31 = vpop.f32.mrb[31].mxu1  ;;  %6540 = vst [vmem:[#allocation23_spill] sm:$0xff] %v5722_v45  ;;  %v6541_v30 = vld [vmem:[#allocation19_spill] sm:$0xff] }
 0x7b3   : > { %v2116_v44 = vpop.f32.mrb[36].mxu0 }
 0x7b4   : > { %v2125_v27 = vpack.c.bf16 %v2116_v44, %v2061_v63  ;;  %v4042_v39 = vpop.f32.mrb[37].mxu0 }
 0x7b5   : > { %v2119_v12 = vpop.f32.mrb[38].mxu0 }
 0x7b6   : > { %v4043_v56 = vpop.f32.mrb[39].mxu0  ;;  %4046 = vmatprep.subr.bf16.mxu1 %v2125_v27  ;;  %v5734_v12 = vpop.permute.xlu1 %2542 }
 0x7b7   : > { %4047 = vmatpush3.bf16.msra.mxu1 %v2125_v27  ;;  %v6542_v27 = vld [vmem:[#allocation18_spill] sm:$0xff]  ;;  %6543 = vst [vmem:[#allocation26_spill] sm:$0xff] %v5734_v12  ;;  %v3777_v12 = vld [vmem:[%s6457_s4 + $0xd0] sm:$0xff] }
 0x7ba   : > { %4049 = vmatmul.mubr.msk.bf16.vlgmr.msra.gmra.mrb[32].mxu1 %vm1030_vm6, %v2123_v36 }
 0x88d   : > { %v4050_v52 = vpop.f32.mrb[32].mxu1 }
 0x88e   : > { %v2195_v54 = vadd.f32 %v4050_v52, %v2139_v18  ;;  %v2186_v57 = vpop.f32.mrb[33].mxu1  ;;  %v5740_v18 = vpop.permute.xlu0 %2363 }
 0x88f   : > { %v4051_v63 = vpop.f32.mrb[34].mxu1  ;;  %v2187_v56 = vadd.f32 %v2186_v57, %v2129_v48 }
 0x890   : > { %v5725_v31 = vadd.f32 %v2195_v54, %v6541_v30  ;;  %v2198_v44 = vadd.f32 %v4051_v63, %v2144_v19  ;;  %v2189_v42 = vpop.f32.mrb[35].mxu1  ;;  %v6544_v19 = vld [vmem:[#allocation16_spill] sm:$0xff]  ;;  %v5747_v54 = vpop.permute.xlu1 %2562  ;;  %v6546_v63 = vld [vmem:[#allocation17_spill] sm:$0xff] }
 0x891   : > { %v2190_v36 = vadd.f32 %v2189_v42, %v2134_v34  ;;  %v5743_v52 = vadd.f32 %v2187_v56, %v6544_v19  ;;  %6545 = vst [vmem:[#allocation25_spill] sm:$0xff] %v5747_v54  ;;  %v4475_v19 = vmov 4  }
 0x892   : > { %v5730_v39 = vadd.f32 %v2198_v44, %v6542_v27  ;;  %2233 = vrot.lane.b32.xlu0 %v5725_v31, %s6527_s26  ;;  %v5756_v48 = vpop.permute.xlu0 %2373 }
 0x893   : > { %v5750_v30 = vadd.f32 %v2190_v36, %v6546_v63  ;;  %v3776_v63 = vld [vmem:[%s6457_s4 + $0xc8] sm:$0xff] }
 0x894   : > { %2235 = vrot.lane.b32.xlu1 %v5730_v39, %s6527_s26  ;;  %v5760_v34 = vpop.permute.xlu1 %2566  ;;  %v2328_v43 = vmul.f32 %v5684_v11, %v5730_v39 }
 0x895   : > { %6547 = vst [vmem:[#allocation24_spill] sm:$0xff] %v5760_v34 }
 0x896   : > { %2259 = vrot.lane.b32.xlu0 %v5725_v31, %s6528_s27  ;;  %v5765_v57 = vpop.permute.xlu0 %2454 }
 0x898   : > { %2261 = vrot.lane.b32.xlu1 %v5730_v39, %s6528_s27  ;;  %v5768_v44 = vpop.permute.xlu1 %2686 }
 0x89a   : > { %2229 = vrot.lane.b32.xlu0 %v5743_v52, %s6527_s26  ;;  %v5773_v42 = vpop.permute.xlu0 %2478 }
 0x89b   : > { %6548 = vst [vmem:[#allocation21_spill] sm:$0xff] %v5773_v42 }
 0x89c   : > { %2231 = vrot.lane.b32.xlu1 %v5750_v30, %s6527_s26  ;;  %v5776_v27 = vpop.permute.xlu1 %2506 }
 0x89d   : > { %6549 = vst [vmem:[#allocation27_spill] sm:$0xff] %v5776_v27 }
 0x89e   : > { %2255 = vrot.lane.b32.xlu0 %v5743_v52, %s6528_s27  ;;  %v5780_v56 = vpop.permute.xlu0 %2462 }
 0x8a0   : > { %2257 = vrot.lane.b32.xlu1 %v5750_v30, %s6528_s27  ;;  %v5782_v36 = vpop.permute.xlu1 %2550 }
 0x8a1   : > { %6550 = vst [vmem:[#allocation19_spill] sm:$0xff] %v5782_v36 }
 0x8a2   : > { %2570 = vperm.xlu0 %4192, %v5427_v59   ;;  %v5792_v45 = vpop.permute.xlu0 %2486 }
 0x8a3   : > { %6551 = vst [vmem:[#allocation18_spill] sm:$0xff] %v5792_v45 }
 0x8a4   : > { %2718 = vperm.xlu1 %4193, %v5506_v8   ;;  %v5794_v54 = vpop.permute.xlu1 %2554 }
 0x8a5   : > { %6552 = vst [vmem:[#allocation16_spill] sm:$0xff] %v5794_v54  ;;  %v3780_v54 = vld [vmem:[%s6457_s4 + $0xe8] sm:$0xff] }
 0x8a6   : > { %2586 = vperm.xlu0 %4192, %v5441_v13  }
 0x8a8   : > { %4194 = vset.pattern.permute.xlu1 %v4474_v60  ;;  %v3775_v60 = vld [vmem:[%s6457_s4 + $0xc0] sm:$0xff] }
 0x8a9   : > { %2610 = vperm.xlu1 %4194, %v6537_v55   ;;  %v2976_v34 = vpack.c.bf16 %v3776_v63, %v3775_v60  ;;  %v5806_v60 = vpop.permute.xlu0 %2498  ;;  %v5808_v63 = vpop.permute.xlu1 %2574 }
 0x8aa   : > { %2598 = vperm.xlu0 %4192, %v5486_v1   ;;  %6553 = vst [vmem:[#allocation17_spill] sm:$0xff] %v5806_v60  ;;  %6554 = vst [vmem:[#allocation28_spill] sm:$0xff] %v5808_v63 }
 0x8ab   : > { %4052 = vmatprep.subr.bf16.mxu1 %v2976_v34 }
 0x8ac   : > { %4053 = vmatpush3.bf16.msra.mxu1 %v2976_v34  ;;  %v3779_v34 = vld [vmem:[%s6457_s4 + $0xe0] sm:$0xff] }
 0x8ad   : > { %2618 = vperm.xlu1 %4194, %v5481_v33   ;;  %v2978_v42 = vpack.c.bf16 %v3780_v54, %v3779_v34  ;;  %v5824_v63 = vpop.permute.xlu0 %2510  ;;  %v5826_v60 = vpop.permute.xlu1 %2690 }
 0x8ae   : > { %2614 = vperm.xlu0 %4192, %v5495_v40   ;;  %6555 = vst [vmem:[#allocation29_spill] sm:$0xff] %v5824_v63 }
 0x8b1   : > { %2622 = vperm.xlu1 %4194, %v5506_v8   ;;  %v5833_v54 = vpop.permute.xlu0 %2419  ;;  %v5835_v34 = vpop.permute.xlu1 %2413 }
 0x8b2   : > { %4195 = vset.pattern.permute.xlu0 %v4475_v19 }
 0x8b3   : > { %2876 = vperm.xlu0 %4195, %v5404_v14  }
 0x8b5   : > { %4196 = vset.pattern.permute.xlu1 %v4475_v19  ;;  %v2977_v19 = vpack.c.bf16 %v3778_v50, %v3777_v12  ;;  %v3781_v50 = vld [vmem:[%s6457_s4 + $0xf0] sm:$0xff]  ;;  %v3782_v12 = vld [vmem:[%s6457_s4 + $0xf8] sm:$0xff] }
 0x8b6   : > { %2880 = vperm.xlu1 %4196, %v5399_v10  }
 0x8b7   : > { %2900 = vperm.xlu0 %4195, %v5432_v62   ;;  %4054 = vmatprep.subr.bf16.mxu1 %v2977_v19 }
 0x8b8   : > { %4055 = vmatpush3.bf16.msra.mxu1 %v2977_v19  ;;  %v2979_v19 = vpack.c.bf16 %v3782_v12, %v3781_v50  ;;  %v5841_v50 = vpop.permute.xlu1 %2415  ;;  %v4476_v12 = vmov 8  }
 0x8b9   : > { %4056 = vmatprep.subr.bf16.mxu1 %v2978_v42 }
 0x8ba   : > { %2896 = vperm.xlu1 %4196, %v5418_v15  }
 0x8bb   : > { %2888 = vperm.xlu0 %4195, %v5446_v41  }
 0x8bc   : > { %4057 = vmatpush3.bf16.msra.mxu1 %v2978_v42  ;;  %v5839_v42 = vpop.permute.xlu0 %2435 }
 0x8bd   : > { %4058 = vmatprep.subr.bf16.mxu1 %v2979_v19 }
 0x8be   : > { %2884 = vperm.xlu1 %4196, %v5413_v17  }
 0x8bf   : > { %2908 = vperm.xlu0 %4195, %v5458_v25  }
 0x8c0   : > { %4059 = vmatpush3.bf16.msra.mxu1 %v2979_v19  ;;  %v5846_v19 = vpop.permute.xlu0 %2526 }
 0x8c1   : > { %4084 = vmatprep.subr.bf16.mxu1 %v6526_v20  ;;  %6556 = vst [vmem:[#allocation30_spill] sm:$0xff] %v5846_v19  ;;  %v5848_v20 = vpop.permute.xlu1 %2590 }
 0x8c2   : > { %2904 = vperm.xlu1 %4196, %v5427_v59   ;;  %6557 = vst [vmem:[#allocation31_spill] sm:$0xff] %v5848_v20 }
 0x8c3   : > { %2924 = vperm.xlu0 %4195, %v5472_v24  }
 0x8c4   : > { %v5853_v29 = vpop.permute.xlu0 %2437 }
 0x8c5   : > { %v5855_v63 = vpop.permute.xlu1 %2417 }
 0x8c6   : > { %2920 = vperm.xlu1 %4196, %v5441_v13  }
 0x8c7   : > { %2932 = vperm.xlu0 %4195, %v5486_v1  }
 0x8ca   : > { %2928 = vperm.xlu1 %4196, %v5453_v6  }
 0x8cb   : > { %2948 = vperm.xlu0 %4195, %v5495_v40  }
 0x8ce   : > { %2944 = vperm.xlu1 %4196, %v6537_v55  }
 0x8cf   : > { %2956 = vperm.xlu0 %4195, %v5506_v8   ;;  %v5862_v8 = vpop.permute.xlu1 %2594 }
 0x8d0   : > { %6559 = vst [vmem:[#allocation33_spill] sm:$0xff] %v5862_v8  ;;  %v5914_v8 = vld [vmem:[%s6458_s5 + $0x3] ss:$0 sm:$0xff] }
 0x8d2   : > { %2952 = vperm.xlu1 %4196, %v5481_v33   ;;  %v5859_v33 = vpop.permute.xlu0 %2530 }
 0x8d3   : > { %4198 = vset.pattern.permute.xlu0 %v4476_v12  ;;  %6558 = vst [vmem:[#allocation32_spill] sm:$0xff] %v5859_v33 }
 0x8d4   : > { %3114 = vperm.xlu0 %4198, %v5399_v10  }
 0x8d6   : > { %4197 = vset.pattern.permute.xlu1 %v4476_v12  ;;  %v5865_v10 = vpop.permute.xlu0 %2642 }
 0x8d7   : > { %3110 = vperm.xlu1 %4197, %v5404_v14   ;;  %v5869_v14 = vpop.permute.xlu1 %2433 }
 0x8d8   : > { %3118 = vperm.xlu0 %4198, %v5413_v17  }
 0x8da   : > { %v5872_v17 = vpop.permute.xlu0 %2650 }
 0x8db   : > { %3130 = vperm.xlu1 %4197, %v5418_v15   ;;  %v5876_v15 = vpop.permute.xlu1 %2522 }
 0x8dc   : > { %3138 = vperm.xlu0 %4198, %v5427_v59   ;;  %6560 = vst [vmem:[#allocation34_spill] sm:$0xff] %v5876_v15 }
 0x8de   : > { %v5878_v59 = vpop.permute.xlu0 %2682 }
 0x8df   : > { %3134 = vperm.xlu1 %4197, %v5432_v62   ;;  %v5881_v62 = vpop.permute.xlu1 %2706 }
 0x8e0   : > { %3154 = vperm.xlu0 %4198, %v5441_v13  }
 0x8e3   : > { %3122 = vperm.xlu1 %4197, %v5446_v41   ;;  %v5886_v13 = vpop.permute.xlu1 %2710 }
 0x8e4   : > { %3162 = vperm.xlu0 %4198, %v5453_v6   ;;  %v5884_v6 = vpop.permute.xlu0 %2694 }
 0x8e7   : > { %3142 = vperm.xlu1 %4197, %v5458_v25   ;;  %v5890_v25 = vpop.permute.xlu1 %2439 }
 0x8e8   : > { %3178 = vperm.xlu0 %4198, %v6537_v55   ;;  %v5888_v41 = vpop.permute.xlu0 %2714 }
 0x8eb   : > { %3158 = vperm.xlu1 %4197, %v5472_v24   ;;  %v5894_v24 = vpop.permute.xlu1 %2534 }
 0x8ec   : > { %v5892_v55 = vpop.permute.xlu0 %2546  ;;  %6562 = vst [vmem:[#allocation36_spill] sm:$0xff] %v5894_v24 }
 0x8ed   : > { %6561 = vst [vmem:[#allocation35_spill] sm:$0xff] %v5892_v55 }
 0x8ef   : > { %3166 = vperm.xlu1 %4197, %v5486_v1   ;;  %v5899_v1 = vld [vmem:[%s6458_s5 + $0x2] ss:$0 sm:$0xff] }
 0x8f3   : > { %3182 = vperm.xlu1 %4197, %v5495_v40  }
 0x904   : > { %v2234_v12 = vpop.permute.xlu0 %2233 }
 0x905   : > { %v2243_v40 = vsel %vm486_vm2, 0.0, %v2234_v12 }
 0x906   : > { %v5903_v19 = vmul.f32 %v5899_v1, %v2243_v40  ;;  %v2236_v20 = vpop.permute.xlu1 %2235  ;;  %v2327_v40 = vmul.f32 %v5716_v35, %v5725_v31 }
 0x907   : > { %v2244_v15 = vsel %vm486_vm2, 0.0, %v2236_v20 }
 0x908   : > { %v2303_v33 = vmul.f32 %v5712_v61, %v5903_v19  ;;  %v5909_v55 = vmul.f32 %v5899_v1, %v2244_v15  ;;  %v2260_v24 = vpop.permute.xlu0 %2259  ;;  %v2655_v11 = vmul.f32 %v5710_v37, %v5903_v19 }
 0x909   : > { %v2269_v12 = vsel %vm513_vm3, %v2260_v24, 0.0 }
 0x90a   : > { %v2304_v20 = vmul.f32 %v5682_v53, %v5909_v55  ;;  %v5922_v27 = vmul.f32 %v5914_v8, %v2269_v12  ;;  %v2262_v61 = vpop.permute.xlu1 %2261  ;;  %v2331_v36 = vadd.f32 %v2327_v40, %v2303_v33  ;;  %v2675_v40 = vmul.f32 %v5714_v7, %v5725_v31 }
 0x90b   : > { %v2270_v15 = vsel %vm513_vm3, %v2262_v61, 0.0 }
 0x90c   : > { %v2355_v49 = vmul.f32 %v5727_v46, %v5922_v27  ;;  %v5930_v24 = vmul.f32 %v5914_v8, %v2270_v15  ;;  %v2230_v35 = vpop.permute.xlu0 %2229  ;;  %v2332_v53 = vadd.f32 %v2328_v43, %v2304_v20 }
 0x90d   : > { %v2241_v45 = vsel %vm486_vm2, 0.0, %v2230_v35 }
 0x90e   : > { %v2359_v22 = vadd.f32 %v2355_v49, %v2331_v36  ;;  %v2356_v12 = vmul.f32 %v5688_v16, %v5930_v24  ;;  %v5936_v61 = vmul.f32 %v5899_v1, %v2241_v45  ;;  %v2232_v33 = vpop.permute.xlu1 %2231  ;;  %v2325_v49 = vmul.f32 %v5678_v47, %v5743_v52 }
 0x90f   : > { %v2242_v46 = vsel %vm486_vm2, 0.0, %v2232_v33  ;;  %v2699_v16 = vmul.f32 %v5826_v60, %v5922_v27  ;;  %v2326_v60 = vmul.f32 %v5680_v51, %v5750_v30 }
 0x910   : > { %v2383_v15 = vadd.f32 %v5756_v48, %v2359_v22  ;;  %v2360_v35 = vadd.f32 %v2356_v12, %v2332_v53  ;;  %v2256_v43 = vpop.permute.xlu0 %2255  ;;  %v2301_v45 = vmul.f32 %v5676_v26, %v5936_v61  ;;  %v5951_v37 = vmul.f32 %v5899_v1, %v2242_v46 }
 0x911   : > { %v2267_v36 = vsel %vm513_vm3, %v2256_v43, 0.0  ;;  %v2673_v22 = vmul.f32 %v5700_v58, %v5743_v52  ;;  %v2653_v47 = vmul.f32 %v5698_v4, %v5936_v61  ;;  %v2679_v53 = vadd.f32 %v2675_v40, %v2655_v11 }
 0x912   : > { %v3766_v20 = vmul.f32 -1.442695, %v2383_v15  ;;  %v2384_v7 = vadd.f32 %v5692_v0, %v2360_v35  ;;  %v2258_v48 = vpop.permute.xlu1 %2257  ;;  %v2302_v26 = vmul.f32 %v5706_v9, %v5951_v37  ;;  %v5964_v12 = vmul.f32 %v5914_v8, %v2267_v36 }
 0x913   : > { %v2654_v0 = vmul.f32 %v5865_v10, %v5951_v37  ;;  %v2268_v58 = vsel %vm513_vm3, %v2258_v48, 0.0  ;;  %v2703_v46 = vadd.f32 %v2699_v16, %v2679_v53  ;;  %v2329_v4 = vadd.f32 %v2325_v49, %v2301_v45 }
 0x914   : > { %4335 = vpow2.f32 %v3766_v20  ;;  %v3767_v33 = vmul.f32 -1.442695, %v2384_v7  ;;  %v2674_v11 = vmul.f32 %v5702_v5, %v5750_v30  ;;  %v2353_v51 = vmul.f32 %v5720_v32, %v5964_v12 }
 0x915   : > { %v2677_v9 = vadd.f32 %v2673_v22, %v2653_v47  ;;  %v2697_v40 = vmul.f32 %v5878_v59, %v5964_v12  ;;  %v5976_v15 = vmul.f32 %v5914_v8, %v2268_v58  ;;  %v2428_v10 = vsel %vm486_vm2, 0.0, %v5833_v54 }
 0x916   : > { %4337 = vpow2.f32 %v3767_v33  ;;  %v2427_v35 = vsel %vm486_vm2, 0.0, %v5855_v63  ;;  %v2330_v49 = vadd.f32 %v2326_v60, %v2302_v26  ;;  %v2357_v43 = vadd.f32 %v2353_v51, %v2329_v4 }
 0x917   : > { %v2678_v5 = vadd.f32 %v2674_v11, %v2654_v0  ;;  %v2701_v16 = vadd.f32 %v2697_v40, %v2677_v9  ;;  %v2354_v32 = vmul.f32 %v5686_v23, %v5976_v15  ;;  %v2698_v45 = vmul.f32 %v5768_v44, %v5976_v15 }
 0x918   : > { %v2381_v59 = vadd.f32 %v5740_v18, %v2357_v43  ;;  %v2723_v36 = vadd.f32 %v5888_v41, %v2703_v46  ;;  %v2432_v63 = vmul.f32 %v5899_v1, %v2428_v10  ;;  %v2431_v22 = vmul.f32 %v5899_v1, %v2427_v35 }
 0x919   : > { %v2721_v20 = vadd.f32 %v5881_v62, %v2701_v16  ;;  %v2358_v54 = vadd.f32 %v2354_v32, %v2330_v49  ;;  %v2702_v7 = vadd.f32 %v2698_v45, %v2678_v5  ;;  %v2656_v44 = vmul.f32 %v5872_v17, %v5909_v55  ;;  %v6563_v49 = vld [vmem:[#allocation14_spill] sm:$0xff]  ;;  %v6565_v5 = vld [vmem:[#allocation13_spill] sm:$0xff]  ;;  %v6566_v16 = vld [vmem:[#allocation20_spill] sm:$0xff] }
 0x91a   : > { %v3764_v47 = vmul.f32 -1.442695, %v2381_v59  ;;  %v2425_v18 = vsel %vm486_vm2, 0.0, %v5835_v34  ;;  %v2676_v62 = vmul.f32 %v5718_v38, %v5730_v39  ;;  %v2700_v41 = vmul.f32 %v5884_v6, %v5930_v24  ;;  %v6567_v59 = vld [vmem:[#allocation19_spill] sm:$0xff] }
 0x91b   : > { %v3768_v48 = vmul.f32 -1.442695, %v2721_v20  ;;  %v2382_v53 = vadd.f32 %v5690_v2, %v2358_v54  ;;  %v2722_v23 = vadd.f32 %v5886_v13, %v2702_v7  ;;  %v3770_v26 = vmul.f32 -1.442695, %v2723_v36  ;;  %v6568_v20 = vld [vmem:[#allocation27_spill] sm:$0xff] }
 0x91c   : > { %4339 = vpow2.f32 %v3764_v47  ;;  %v2446_v13 = vsel %vm513_vm3, %v5839_v42, 0.0  ;;  %v2447_v17 = vsel %vm513_vm3, %v5853_v29, 0.0  ;;  %v2448_v34 = vsel %vm513_vm3, %v5890_v25, 0.0 }
 0x91d   : > { %4341 = vpow2.f32 %v3768_v48  ;;  %v3765_v33 = vmul.f32 -1.442695, %v2382_v53  ;;  %v3769_v2 = vmul.f32 -1.442695, %v2722_v23  ;;  %v2429_v38 = vmul.f32 %v5899_v1, %v2425_v18  ;;  %v6570_v48 = vld [vmem:[#allocation15_spill] sm:$0xff]  ;;  %v6571_v53 = vld [vmem:[#allocation21_spill] sm:$0xff] }
 0x91e   : > { %v4336_v60 = vpop.eup %4335  ;;  %v2471_v6 = vmul.f32 %v5780_v56, %v2431_v22  ;;  %v2680_v46 = vadd.f32 %v2676_v62, %v2656_v44  ;;  %v2472_v4 = vmul.f32 %v5704_v3, %v2432_v63  ;;  %v2491_v11 = vmul.f32 %v5708_v21, %v4905_v28 }
 0x91f   : > { %v2399_v0 = vadd.f32 1.0, %v4336_v60  ;;  %4343 = vpow2.f32 %v3765_v33  ;;  %v2426_v29 = vsel %vm486_vm2, 0.0, %v5841_v50  ;;  %v2452_v25 = vmul.f32 %v5914_v8, %v2448_v34  ;;  %v6564_v50 = vld [vmem:[#allocation18_spill] sm:$0xff] }
 0x920   : > { %v4338_v58 = vpop.eup %4337  ;;  %4345 = vpow2.f32 %v3769_v2  ;;  %v2704_v9 = vadd.f32 %v2700_v41, %v2680_v46  ;;  %v2451_v40 = vmul.f32 %v5914_v8, %v2447_v17  ;;  %v2445_v56 = vsel %vm513_vm3, %v5869_v14, 0.0  ;;  %v6572_v17 = vld [vmem:[#allocation22_spill] sm:$0xff]  ;;  %v6574_v46 = vld [vmem:[#allocation16_spill] sm:$0xff] }
 0x921   : > { %v2571_v42 = vpop.permute.xlu0 %2570  ;;  %v2400_v51 = vadd.f32 1.0, %v4338_v58  ;;  %4347 = vpow2.f32 %v3770_v26  ;;  %v2469_v28 = vmul.f32 %v5765_v57, %v2429_v38  ;;  %v2495_v21 = vadd.f32 %v2491_v11, %v2471_v6  ;;  %v6569_v57 = vld [vmem:[#allocation29_spill] sm:$0xff] }
 0x922   : > { %v2579_v3 = vmul.f32 %v2571_v42, %v5725_v31  ;;  %4349 = vrcp.f32 %v2399_v0  ;;  %v2492_v43 = vmul.f32 %v6564_v50, %v6563_v49  ;;  %v2489_v32 = vmul.f32 %v6566_v16, %v6565_v5  ;;  %v6573_v38 = vld [vmem:[#allocation33_spill] sm:$0xff] }
 0x923   : > { %v2719_v10 = vpop.permute.xlu1 %2718  ;;  %4351 = vrcp.f32 %v2400_v51  ;;  %v2430_v45 = vmul.f32 %v5899_v1, %v2426_v29  ;;  %v2559_v14 = vmul.f32 %v6567_v59, %v5903_v19  ;;  %v2515_v54 = vmul.f32 %v6568_v20, %v2451_v40  ;;  %v6576_v29 = vld [vmem:[#allocation28_spill] sm:$0xff]  ;;  %v6577_v40 = vld [vmem:[#allocation26_spill] sm:$0xff] }
 0x924   : > { %v2724_v35 = vadd.f32 %v2719_v10, %v2704_v9  ;;  %v2449_v7 = vmul.f32 %v5914_v8, %v2445_v56  ;;  %v2516_v63 = vmul.f32 %v6569_v57, %v2452_v25  ;;  %v2490_v23 = vmul.f32 %v6571_v53, %v6570_v48 }
 0x925   : > { %v2587_v36 = vpop.permute.xlu0 %2586  ;;  %v2450_v44 = vmul.f32 %v5914_v8, %v2446_v13  ;;  %v2496_v18 = vadd.f32 %v2492_v43, %v2472_v4  ;;  %v2583_v62 = vadd.f32 %v2579_v3, %v2559_v14  ;;  %v2519_v60 = vadd.f32 %v2515_v54, %v2495_v21  ;;  %v6575_v13 = vld [vmem:[#allocation17_spill] sm:$0xff] }
 0x926   : > { %v3771_v22 = vmul.f32 -1.442695, %v2724_v35  ;;  %v4340_v47 = vpop.eup %4339  ;;  %v2493_v26 = vadd.f32 %v2489_v32, %v2469_v28  ;;  %v2470_v34 = vmul.f32 %v6572_v17, %v2430_v45  ;;  %v2603_v6 = vmul.f32 %v6573_v38, %v5922_v27  ;;  %v6578_v35 = vld [vmem:[#allocation32_spill] sm:$0xff]  ;;  %v6579_v43 = vld [vmem:[#allocation25_spill] sm:$0xff]  ;;  %v6582_v17 = vld [vmem:[#allocation35_spill] sm:$0xff] }
 0x927   : > { %v4342_v41 = vpop.eup %4341  ;;  %v2397_v2 = vadd.f32 1.0, %v4340_v47  ;;  %v2560_v11 = vmul.f32 %v6574_v46, %v5909_v55  ;;  %v2513_v4 = vmul.f32 %v6575_v13, %v2449_v7  ;;  %v2520_v51 = vadd.f32 %v2516_v63, %v2496_v18  ;;  %v6581_v18 = vld [vmem:[#allocation23_spill] sm:$0xff] }
 0x928   : > { %4353 = vpow2.f32 %v3771_v22  ;;  %v2611_v33 = vpop.permute.xlu1 %2610  ;;  %v2737_v0 = vadd.f32 1.0, %v4342_v41  ;;  %v2580_v25 = vmul.f32 %v6576_v29, %v5730_v39  ;;  %v2557_v56 = vmul.f32 %v6577_v40, %v5936_v61  ;;  %v6580_v22 = vld [vmem:[#allocation36_spill] sm:$0xff]  ;;  %v6585_v13 = vld [vmem:[#allocation31_spill] sm:$0xff] }
 0x929   : > { %v2599_v58 = vpop.permute.xlu0 %2598  ;;  %v4344_v42 = vpop.eup %4343  ;;  %4355 = vrcp.f32 %v2397_v2  ;;  %v2607_v10 = vadd.f32 %v2603_v6, %v2583_v62  ;;  %v2539_v49 = vadd.f32 %v6578_v35, %v2519_v60  ;;  %v2577_v5 = vmul.f32 %v6579_v43, %v5743_v52 }
 0x92a   : > { %v4346_v9 = vpop.eup %4345  ;;  %v2604_v3 = vmul.f32 %v2599_v58, %v5930_v24  ;;  %v2398_v28 = vadd.f32 1.0, %v4344_v42  ;;  %4357 = vrcp.f32 %v2737_v0  ;;  %v2601_v45 = vmul.f32 %v2587_v36, %v5964_v12 }
 0x92b   : > { %v4348_v21 = vpop.eup %4347  ;;  %v2738_v50 = vadd.f32 1.0, %v4346_v9  ;;  %v2584_v20 = vadd.f32 %v2580_v25, %v2560_v11  ;;  %v2494_v7 = vadd.f32 %v2490_v23, %v2470_v34  ;;  %v2517_v57 = vadd.f32 %v2513_v4, %v2493_v26  ;;  %v6583_v26 = vld [vmem:[#allocation34_spill] sm:$0xff] }
 0x92c   : > { %v2619_v16 = vpop.permute.xlu1 %2618  ;;  %v4350_v32 = vpop.eup %4349  ;;  %4359 = vrcp.f32 %v2398_v28  ;;  %v2540_v47 = vadd.f32 %v6580_v22, %v2520_v51  ;;  %v2581_v48 = vadd.f32 %v2577_v5, %v2557_v56  ;;  %v2514_v62 = vmul.f32 %v6581_v18, %v2450_v44  ;;  %v6584_v44 = vld [vmem:[#allocation24_spill] sm:$0xff]  ;;  %v6086_v22 = vld [vmem:[%s6456_s3 + $0x70] sm:$0xff] }
 0x92d   : > { %v2627_v59 = vadd.f32 %v2619_v16, %v2607_v10  ;;  %v2615_v14 = vpop.permute.xlu0 %2614  ;;  %v4352_v54 = vpop.eup %4351  ;;  %v2631_v63 = vmul.f32 %v4350_v32, %v2539_v49  ;;  %4361 = vrcp.f32 %v2738_v50  ;;  %v2608_v53 = vadd.f32 %v2604_v3, %v2584_v20  ;;  %v6586_v10 = vld [vmem:[#allocation30_spill] sm:$0xff] }
 0x92e   : > { %v2739_v41 = vadd.f32 1.0, %v4348_v21  ;;  %v2605_v36 = vadd.f32 %v2601_v45, %v2581_v48  ;;  %v2558_v0 = vmul.f32 %v6582_v17, %v5951_v37  ;;  %v2632_v38 = vmul.f32 %v4352_v54, %v2540_v47 }
 0x92f   : > { %v6050_v60 = vadd.f32 %v2631_v63, %v2627_v59  ;;  %v2537_v34 = vadd.f32 %v6583_v26, %v2517_v57  ;;  %v2518_v6 = vadd.f32 %v2514_v62, %v2494_v7  ;;  %v2578_v42 = vmul.f32 %v6584_v44, %v5750_v30  ;;  %v6095_v62 = vld [vmem:[%s6456_s3 + $0x78] sm:$0xff] }
 0x930   : > { %v2623_v2 = vpop.permute.xlu1 %2622  ;;  %v2602_v4 = vmul.f32 %v6585_v13, %v5976_v15  ;;  %4363 = vrcp.f32 %v2739_v41  ;;  %v2625_v25 = vadd.f32 %v2611_v33, %v2605_v36  ;;  %v4477_v36 = vmov 10  }
 0x931   : > { %v2628_v58 = vadd.f32 %v2623_v2, %v2608_v53  ;;  %3073 = vrot.lane.b32.xlu0 %v6050_v60, %s6527_s26  ;;  %v2582_v40 = vadd.f32 %v2578_v42, %v2558_v0  ;;  %v2538_v28 = vadd.f32 %v6586_v10, %v2518_v6  ;;  %v6141_v10 = vld [vmem:[%s6456_s3 + $0x10] sm:$0xff] }
 0x932   : > { %v4354_v23 = vpop.eup %4353  ;;  %v2877_v46 = vpop.permute.xlu0 %2876 }
 0x933   : > { %v2740_v11 = vadd.f32 1.0, %v4354_v23  ;;  %v6061_v51 = vadd.f32 %v2632_v38, %v2628_v58  ;;  %v4356_v29 = vpop.eup %4355  ;;  %v2606_v50 = vadd.f32 %v2602_v4, %v2582_v40 }
 0x934   : > { %v2629_v9 = vmul.f32 %v4356_v29, %v2537_v34  ;;  %v4358_v3 = vpop.eup %4357  ;;  %v6135_v29 = vld [vmem:[%s6456_s3 + $0x18] sm:$0xff] }
 0x935   : > { %4365 = vrcp.f32 %v2740_v11  ;;  %v2881_v56 = vpop.permute.xlu1 %2880  ;;  %3075 = vrot.lane.b32.xlu1 %v6061_v51, %s6527_s26  ;;  %3093 = vrot.lane.b32.xlu0 %v6050_v60, %s6528_s27  ;;  %v2626_v33 = vadd.f32 %v2615_v14, %v2606_v50  ;;  %v6115_v11 = vld [vmem:[%s6456_s3 + $0x8] sm:$0xff] }
 0x936   : > { %v2901_v21 = vpop.permute.xlu0 %2900  ;;  %v4360_v35 = vpop.eup %4359  ;;  %v6068_v49 = vadd.f32 %v2629_v9, %v2625_v25  ;;  %v2892_v48 = vmul.f32 %v2881_v56, %v5951_v37  ;;  %v6103_v37 = vld [vmem:[%s6456_s3] sm:$0xff]  ;;  %v3792_v50 = vld [vmem:[%s6457_s4 + $0x108] sm:$0xff] }
 0x937   : > { %v4362_v43 = vpop.eup %4361  ;;  %v2630_v5 = vmul.f32 %v4360_v35, %v2538_v28  ;;  %v2912_v53 = vmul.f32 %v2901_v21, %v5750_v30  ;;  %v2891_v30 = vmul.f32 %v2877_v46, %v5936_v61  ;;  %v6148_v28 = vld [vmem:[%s6456_s3 + $0x38] sm:$0xff]  ;;  %v3791_v35 = vld [vmem:[%s6457_s4 + $0x100] sm:$0xff] }
 0x938   : > { %v2972_v16 = vpack.c.bf16 %v4362_v43, %v4358_v3  ;;  %v6160_v43 = vld [vmem:[%s6456_s3 + $0x30] sm:$0xff] }
 0x939   : > { %v2897_v32 = vpop.permute.xlu1 %2896  ;;  %3095 = vrot.lane.b32.xlu1 %v6061_v51, %s6528_s27  ;;  %3069 = vrot.lane.b32.xlu0 %v6068_v49, %s6527_s26  ;;  %v6074_v59 = vadd.f32 %v2630_v5, %v2626_v33  ;;  %v2916_v38 = vadd.f32 %v2912_v53, %v2892_v48  ;;  %v3454_v5 = vpack.c.bf16 %v3792_v50, %v3791_v35  ;;  %v6167_v33 = vld [vmem:[%s6456_s3 + $0x48] sm:$0xff]  ;;  %v3797_v53 = vld [vmem:[%s6457_s4 + $0x130] sm:$0xff] }
 0x93a   : > { %v2889_v45 = vpop.permute.xlu0 %2888  ;;  %4060 = vmatprep.mubr.msk.bf16.mxu1 %vm768_vm4, %v2972_v16  ;;  %v4364_v54 = vpop.eup %4363  ;;  %v2911_v41 = vmul.f32 %v2897_v32, %v5743_v52  ;;  %v6587_v16 = vmov 0.0   ;;  %v3793_v32 = vld [vmem:[%s6457_s4 + $0x110] sm:$0xff]  ;;  %v4397_v48 = vld [vmem:[%s6456_s3 + $0x68] sm:$0xff] }
 0x93b   : > { %v2894_v61 = vmul.f32 %v2889_v45, %v5909_v55  ;;  %v6129_v55 = vld [vmem:[%s6456_s3 + $0x20] sm:$0xff]  ;;  %4068 = vmatprep.subr.bf16.mxu0 %v3454_v5  ;;  %v3794_v45 = vld [vmem:[%s6457_s4 + $0x118] sm:$0xff] }
 0x93c   : > { %v2915_v23 = vadd.f32 %v2911_v41, %v2891_v30  ;;  %4069 = vmatpush3.bf16.msra.mxu0 %v3454_v5 }
 0x93d   : > { %v2885_v20 = vpop.permute.xlu1 %2884  ;;  %3071 = vrot.lane.b32.xlu1 %v6074_v59, %s6527_s26  ;;  %3089 = vrot.lane.b32.xlu0 %v6068_v49, %s6528_s27 }
 0x93e   : > { %v2909_v14 = vpop.permute.xlu0 %2908  ;;  %v2893_v0 = vmul.f32 %v2885_v20, %v5903_v19  ;;  %v3455_v20 = vpack.c.bf16 %v3794_v45, %v3793_v32 }
 0x93f   : > { %v4366_v7 = vpop.eup %4365  ;;  %v2914_v26 = vmul.f32 %v2909_v14, %v5730_v39  ;;  %v6187_v14 = vld [vmem:[%s6456_s3 + $0x58] sm:$0xff] }
 0x940   : > { %v2973_v57 = vpack.c.bf16 %v4366_v7, %v4364_v54  ;;  %v6181_v54 = vld [vmem:[%s6456_s3 + $0x40] sm:$0xff]  ;;  %4070 = vmatprep.subr.bf16.mxu0 %v3455_v20 }
 0x941   : > { %v2905_v63 = vpop.permute.xlu1 %2904  ;;  %3091 = vrot.lane.b32.xlu1 %v6074_v59, %s6528_s27  ;;  %3186 = vperm.xlu0 %4198, %v6086_v22   ;;  %v2918_v42 = vadd.f32 %v2914_v26, %v2894_v61  ;;  %v3795_v7 = vld [vmem:[%s6457_s4 + $0x120] sm:$0xff]  ;;  %v4479_v26 = vmov 9  }
 0x942   : > { %4061 = vmatmul.mubr.msk.bf16.vlgmr.msra.gmra.mrb[36].mxu1 %vm768_vm4, %v2973_v57  ;;  %v2925_v47 = vpop.permute.xlu0 %2924  ;;  %v2913_v2 = vmul.f32 %v2905_v63, %v5725_v31  ;;  %v3796_v57 = vld [vmem:[%s6457_s4 + $0x128] sm:$0xff]  ;;  %4071 = vmatpush3.bf16.msra.mxu0 %v3455_v20 }
 0x943   : > { %v2936_v58 = vmul.f32 %v2925_v47, %v5976_v15  ;;  %v3456_v63 = vpack.c.bf16 %v3796_v57, %v3795_v7  ;;  %v6199_v47 = vld [vmem:[%s6456_s3 + $0x50] sm:$0xff] }
 0x944   : > { %v2917_v34 = vadd.f32 %v2913_v2, %v2893_v0  ;;  %v6214_v2 = vld [vmem:[%s6456_s3 + $0x60] sm:$0xff]  ;;  %v6589_v0 = vld [vmem:[#allocation6_spill] sm:$0xff] }
 0x945   : > { %v2921_v18 = vpop.permute.xlu1 %2920  ;;  %3190 = vperm.xlu1 %4197, %v6095_v62   ;;  %4199 = vset.pattern.permute.xlu0 %v4477_v36 }
 0x946   : > { %v2933_v17 = vpop.permute.xlu0 %2932  ;;  %3354 = vperm.xlu0 %4199, %v6103_v37   ;;  %v2935_v52 = vmul.f32 %v2921_v18, %v5964_v12  ;;  %v6122_v12 = vld [vmem:[%s6456_s3 + $0x28] sm:$0xff]  ;;  %4072 = vmatprep.subr.bf16.mxu0 %v3456_v63  ;;  %v3798_v18 = vld [vmem:[%s6457_s4 + $0x138] sm:$0xff] }
 0x947   : > { %v2938_v39 = vmul.f32 %v2933_v17, %v5930_v24  ;;  %v3457_v41 = vpack.c.bf16 %v3798_v18, %v3797_v53  ;;  %4073 = vmatpush3.bf16.msra.mxu0 %v3456_v63  ;;  %v6588_v17 = vld [vmem:[#allocation5_spill] sm:$0xff] }
 0x948   : > { %v2939_v15 = vadd.f32 %v2935_v52, %v2915_v23 }
 0x949   : > { %v2929_v31 = vpop.permute.xlu1 %2928  ;;  %4200 = vset.pattern.permute.xlu1 %v4477_v36  ;;  %v2942_v9 = vadd.f32 %v2938_v39, %v2918_v42  ;;  %4074 = vmatprep.subr.bf16.mxu0 %v3457_v41  ;;  %v4478_v36 = vmov 3  }
 0x94a   : > { %v2937_v6 = vmul.f32 %v2929_v31, %v5922_v27  ;;  %3358 = vperm.xlu1 %4200, %v6115_v11   ;;  %v2949_v19 = vpop.permute.xlu0 %2948  ;;  %3378 = vperm.xlu0 %4199, %v6122_v12   ;;  %v2940_v27 = vadd.f32 %v2936_v58, %v2916_v38  ;;  %v6590_v38 = vld [vmem:[#allocation7_spill] sm:$0xff] }
 0x94b   : > { %4075 = vmatpush3.bf16.msra.mxu0 %v3457_v41 }
 0x94c   : > { %v2941_v46 = vadd.f32 %v2937_v6, %v2917_v34  ;;  %v2960_v13 = vadd.f32 %v2949_v19, %v2940_v27  ;;  %v6591_v6 = vld [vmem:[#allocation8_spill] sm:$0xff] }
 0x94d   : > { %v2945_v44 = vpop.permute.xlu1 %2944 }
 0x94e   : > { %v2959_v4 = vadd.f32 %v2945_v44, %v2939_v15  ;;  %3374 = vperm.xlu1 %4200, %v6129_v55   ;;  %3366 = vperm.xlu0 %4199, %v6135_v29   ;;  %v2957_v24 = vpop.permute.xlu0 %2956 }
 0x94f   : > { %v2962_v56 = vadd.f32 %v2957_v24, %v2942_v9 }
 0x950   : > { %v2974_v25 = vpack.c.bf16 %v2960_v13, %v2959_v4 }
 0x951   : > { %v2953_v40 = vpop.permute.xlu1 %2952 }
 0x952   : > { %v2961_v3 = vadd.f32 %v2953_v40, %v2941_v46  ;;  %3362 = vperm.xlu1 %4200, %v6141_v10   ;;  %4064 = vmatprep.mubr.msk.bf16.mxu1 %vm768_vm4, %v2974_v25 }
 0x953   : > { %3386 = vperm.xlu0 %4199, %v6148_v28   ;;  %v3115_v52 = vpop.permute.xlu0 %3114 }
 0x954   : > { %v2975_v21 = vpack.c.bf16 %v2962_v56, %v2961_v3 }
 0x956   : > { %3382 = vperm.xlu1 %4200, %v6160_v43   ;;  %4065 = vmatmul.mubr.msk.bf16.gmra.mrb[40].mxu1 %vm768_vm4, %v2975_v21  ;;  %v3111_v30 = vpop.permute.xlu1 %3110 }
 0x957   : > { %3402 = vperm.xlu0 %4199, %v6167_v33   ;;  %4088 = vmatprep.mubr.msk.bf16.mxu1 %vm4470_vm7, %v6587_v16  ;;  %v6239_v23 = vpop.permute.xlu0 %3118 }
 0x95a   : > { %3398 = vperm.xlu1 %4200, %v6181_v54   ;;  %v3131_v58 = vpop.permute.xlu1 %3130 }
 0x95b   : > { %3410 = vperm.xlu0 %4199, %v6187_v14   ;;  %v3139_v19 = vpop.permute.xlu0 %3138 }
 0x95e   : > { %3406 = vperm.xlu1 %4200, %v6199_v47   ;;  %v3135_v31 = vpop.permute.xlu1 %3134 }
 0x95f   : > { %3426 = vperm.xlu0 %4199, %v4397_v48   ;;  %v3155_v39 = vpop.permute.xlu0 %3154  ;;  %v3146_v32 = vmul.f32 %v3135_v31, %v6074_v59 }
 0x962   : > { %3422 = vperm.xlu1 %4200, %v6214_v2   ;;  %v6241_v34 = vpop.permute.xlu1 %3122 }
 0x963   : > { %3434 = vperm.xlu0 %4199, %v6095_v62  }
 0x966   : > { %3430 = vperm.xlu1 %4200, %v6086_v22   ;;  %v6247_v61 = vpop.permute.xlu1 %3142 }
 0x967   : > { %4202 = vset.pattern.permute.xlu0 %v4478_v36 }
 0x968   : > { %2792 = vperm.xlu0 %4202, %v6115_v11  }
 0x96a   : > { %4201 = vset.pattern.permute.xlu1 %v4478_v36  ;;  %v3159_v27 = vpop.permute.xlu1 %3158 }
 0x96b   : > { %2788 = vperm.xlu1 %4201, %v6103_v37  }
 0x96c   : > { %2832 = vperm.xlu0 %4202, %v6181_v54  }
 0x96e   : > { %v3167_v15 = vpop.permute.xlu1 %3166 }
 0x96f   : > { %2808 = vperm.xlu1 %4201, %v6129_v55  }
 0x970   : > { %2751 = vrot.lane.b32.xlu0 %v6588_v17, %s6527_s26 }
 0x972   : > { %v3183_v46 = vpop.permute.xlu1 %3182 }
 0x973   : > { %2812 = vperm.xlu1 %4201, %v6122_v12  }
 0x974   : > { %2796 = vperm.xlu0 %4202, %v6141_v10  }
 0x977   : > { %2836 = vperm.xlu1 %4201, %v6167_v33  }
 0x978   : > { %2816 = vperm.xlu0 %4202, %v6160_v43  }
 0x97b   : > { %2753 = vrot.lane.b32.xlu1 %v6589_v0, %s6527_s26 }
 0x97c   : > { %2840 = vperm.xlu0 %4202, %v6199_v47  }
 0x97f   : > { %2800 = vperm.xlu1 %4201, %v6135_v29  }
 0x980   : > { %2856 = vperm.xlu0 %4202, %v6214_v2  }
 0x983   : > { %2820 = vperm.xlu1 %4201, %v6148_v28  }
 0x984   : > { %2755 = vrot.lane.b32.xlu0 %v6590_v38, %s6527_s26 }
 0x987   : > { %2844 = vperm.xlu1 %4201, %v6187_v14  }
 0x988   : > { %2864 = vperm.xlu0 %4202, %v6086_v22  }
 0x98b   : > { %2860 = vperm.xlu1 %4201, %v4397_v48  }
 0x98c   : > { %4203 = vset.pattern.permute.xlu0 %v4479_v26 }
 0x98d   : > { %3266 = vperm.xlu0 %4203, %v6103_v37   ;;  %v3163_v37 = vpop.permute.xlu0 %3162 }
 0x98f   : > { %2757 = vrot.lane.b32.xlu1 %v6591_v6, %s6527_s26 }
 0x991   : > { %3290 = vperm.xlu0 %4203, %v6122_v12   ;;  %v3179_v12 = vpop.permute.xlu0 %3178 }
 0x993   : > { %2868 = vperm.xlu1 %4201, %v6095_v62  }
 0x995   : > { %3314 = vperm.xlu0 %4203, %v6167_v33  }
 0x997   : > { %4204 = vset.pattern.permute.xlu1 %v4479_v26 }
 0x998   : > { %3270 = vperm.xlu1 %4204, %v6115_v11  }
 0x999   : > { %3278 = vperm.xlu0 %4203, %v6135_v29  }
 0x99c   : > { %3286 = vperm.xlu1 %4204, %v6129_v55  }
 0x99d   : > { %3298 = vperm.xlu0 %4203, %v6148_v28  }
 0x9a0   : > { %3310 = vperm.xlu1 %4204, %v6181_v54  }
 0x9a1   : > { %3322 = vperm.xlu0 %4203, %v6187_v14  }
 0x9a3   : > { %v3074_v44 = vpop.permute.xlu0 %3073 }
 0x9a4   : > { %3274 = vperm.xlu1 %4204, %v6141_v10   ;;  %v3145_v10 = vmul.f32 %v3131_v58, %v6068_v49  ;;  %v3083_v21 = vsel %vm486_vm2, 0.0, %v3074_v44 }
 0x9a5   : > { %3338 = vperm.xlu0 %4203, %v4397_v48   ;;  %v6285_v54 = vmul.f32 %v5899_v1, %v3083_v21 }
 0x9a7   : > { %v3076_v42 = vpop.permute.xlu1 %3075  ;;  %v3094_v11 = vpop.permute.xlu0 %3093 }
 0x9a8   : > { %3294 = vperm.xlu1 %4204, %v6160_v43   ;;  %v3103_v45 = vsel %vm513_vm3, %v3094_v11, 0.0  ;;  %v3084_v14 = vsel %vm486_vm2, 0.0, %v3076_v42 }
 0x9a9   : > { %v6294_v18 = vmul.f32 %v5899_v1, %v3084_v14 }
 0x9ab   : > { %v3096_v13 = vpop.permute.xlu1 %3095  ;;  %v3070_v4 = vpop.permute.xlu0 %3069  ;;  %v3128_v26 = vmul.f32 %v6241_v34, %v6294_v18 }
 0x9ac   : > { %3318 = vperm.xlu1 %4204, %v6199_v47   ;;  %v3081_v55 = vsel %vm486_vm2, 0.0, %v3070_v4  ;;  %v6290_v47 = vmul.f32 %v5914_v8, %v3103_v45  ;;  %v3104_v48 = vsel %vm513_vm3, %v3096_v13, 0.0 }
 0x9ad   : > { %v6262_v29 = vmul.f32 %v5899_v1, %v3081_v55 }
 0x9ae   : > { %v3171_v31 = vmul.f32 %v3163_v37, %v6290_v47 }
 0x9af   : > { %v3072_v24 = vpop.permute.xlu1 %3071  ;;  %v3125_v25 = vmul.f32 %v3111_v30, %v6262_v29  ;;  %v3090_v40 = vpop.permute.xlu0 %3089  ;;  %v6299_v30 = vmul.f32 %v5914_v8, %v3104_v48 }
 0x9b0   : > { %v3082_v9 = vsel %vm486_vm2, 0.0, %v3072_v24  ;;  %3334 = vperm.xlu1 %4204, %v6214_v2   ;;  %v3101_v3 = vsel %vm513_vm3, %v3090_v40, 0.0  ;;  %v3127_v2 = vmul.f32 %v6239_v23, %v6285_v54 }
 0x9b1   : > { %v6268_v56 = vmul.f32 %v5899_v1, %v3082_v9  ;;  %v6273_v28 = vmul.f32 %v5914_v8, %v3101_v3  ;;  %v3149_v43 = vadd.f32 %v3145_v10, %v3125_v25  ;;  %v3172_v23 = vmul.f32 %v3167_v15, %v6299_v30 }
 0x9b3   : > { %v3126_v35 = vmul.f32 %v3115_v52, %v6268_v56  ;;  %v3092_v50 = vpop.permute.xlu1 %3091  ;;  %v3169_v5 = vmul.f32 %v3155_v39, %v6273_v28  ;;  %v3147_v52 = vmul.f32 %v3139_v19, %v6050_v60 }
 0x9b4   : > { %v3102_v33 = vsel %vm513_vm3, %v3092_v50, 0.0 }
 0x9b5   : > { %v6282_v20 = vmul.f32 %v5914_v8, %v3102_v33  ;;  %v3173_v7 = vadd.f32 %v3169_v5, %v3149_v43  ;;  %v3150_v57 = vadd.f32 %v3146_v32, %v3126_v35  ;;  %v3151_v1 = vadd.f32 %v3147_v52, %v3127_v2 }
 0x9b7   : > { %v3170_v63 = vmul.f32 %v3159_v27, %v6282_v20  ;;  %v3193_v53 = vadd.f32 %v3179_v12, %v3173_v7  ;;  %v3148_v27 = vmul.f32 %v6247_v61, %v6061_v51  ;;  %v3175_v12 = vadd.f32 %v3171_v31, %v3151_v1 }
 0x9b9   : > { %v3174_v41 = vadd.f32 %v3170_v63, %v3150_v57  ;;  %v3787_v36 = vmul.f32 -1.442695, %v3193_v53  ;;  %v3152_v44 = vadd.f32 %v3148_v27, %v3128_v26 }
 0x9bb   : > { %v3194_v58 = vadd.f32 %v3183_v46, %v3174_v41  ;;  %4367 = vpow2.f32 %v3787_v36  ;;  %v3176_v42 = vadd.f32 %v3172_v23, %v3152_v44 }
 0x9bd   : > { %v3788_v39 = vmul.f32 -1.442695, %v3194_v58 }
 0x9bf   : > { %4369 = vpow2.f32 %v3788_v39 }
 0x9c0   : > { %v3187_v8 = vpop.permute.xlu0 %3186 }
 0x9c1   : > { %v3195_v46 = vadd.f32 %v3187_v8, %v3175_v12 }
 0x9c3   : > { %v3789_v19 = vmul.f32 -1.442695, %v3195_v46 }
 0x9c4   : > { %v3191_v11 = vpop.permute.xlu1 %3190 }
 0x9c5   : > { %v3196_v37 = vadd.f32 %v3191_v11, %v3176_v42  ;;  %v4368_v13 = vpop.eup %4367  ;;  %4371 = vpow2.f32 %v3789_v19  ;;  %v3355_v4 = vpop.permute.xlu0 %3354 }
 0x9c6   : > { %v3209_v34 = vadd.f32 1.0, %v4368_v13  ;;  %v3369_v41 = vmul.f32 %v3355_v4, %v6262_v29 }
 0x9c7   : > { %v3790_v55 = vmul.f32 -1.442695, %v3196_v37 }
 0x9c9   : > { %v4370_v24 = vpop.eup %4369  ;;  %v3359_v25 = vpop.permute.xlu1 %3358  ;;  %4373 = vpow2.f32 %v3790_v55 }
 0x9ca   : > { %v3210_v9 = vadd.f32 1.0, %v4370_v24  ;;  %v3379_v61 = vpop.permute.xlu0 %3378  ;;  %4375 = vrcp.f32 %v3209_v34  ;;  %v3370_v57 = vmul.f32 %v3359_v25, %v6268_v56 }
 0x9cb   : > { %v3390_v63 = vmul.f32 %v3379_v61, %v6074_v59 }
 0x9cc   : > { %4377 = vrcp.f32 %v3210_v9 }
 0x9cd   : > { %v3375_v15 = vpop.permute.xlu1 %3374  ;;  %v3394_v31 = vadd.f32 %v3390_v63, %v3370_v57  ;;  %v6337_v63 = vld [vmem:[%s6458_s5 + $0x1] ss:$0 sm:$0xff] }
 0x9ce   : > { %v3367_v40 = vpop.permute.xlu0 %3366  ;;  %v3389_v48 = vmul.f32 %v3375_v15, %v6068_v49 }
 0x9cf   : > { %v4372_v3 = vpop.eup %4371  ;;  %v3372_v56 = vmul.f32 %v3367_v40, %v6294_v18 }
 0x9d0   : > { %v3211_v21 = vadd.f32 1.0, %v4372_v3  ;;  %v3393_v26 = vadd.f32 %v3389_v48, %v3369_v41 }
 0x9d1   : > { %v3363_v10 = vpop.permute.xlu1 %3362 }
 0x9d2   : > { %v3387_v35 = vpop.permute.xlu0 %3386  ;;  %4379 = vrcp.f32 %v3211_v21  ;;  %v3371_v59 = vmul.f32 %v3363_v10, %v6285_v54 }
 0x9d3   : > { %v4374_v50 = vpop.eup %4373  ;;  %v3392_v58 = vmul.f32 %v3387_v35, %v6061_v51 }
 0x9d4   : > { %v4376_v43 = vpop.eup %4375  ;;  %v3212_v5 = vadd.f32 1.0, %v4374_v50 }
 0x9d5   : > { %v3383_v33 = vpop.permute.xlu1 %3382  ;;  %v3396_v12 = vadd.f32 %v3392_v58, %v3372_v56  ;;  %v6593_v56 = vld [vmem:[#allocation9_spill] sm:$0xff] }
 0x9d6   : > { %v4378_v32 = vpop.eup %4377  ;;  %v3403_v45 = vpop.permute.xlu0 %3402  ;;  %4381 = vrcp.f32 %v3212_v5  ;;  %v3391_v39 = vmul.f32 %v3383_v33, %v6050_v60 }
 0x9d7   : > { %v3450_v14 = vpack.c.bf16 %v4378_v32, %v4376_v43  ;;  %v3414_v2 = vmul.f32 %v3403_v45, %v6282_v20  ;;  %v6327_v43 = vld [vmem:[%s6458_s5] ss:$0 sm:$0xff] }
 0x9d8   : > { %v3395_v8 = vadd.f32 %v3391_v39, %v3371_v59  ;;  %v2783_v59 = vmul.f32 %v6337_v63, %v6593_v56 }
 0x9d9   : > { %v3399_v7 = vpop.permute.xlu1 %3398  ;;  %4076 = vmatprep.mubr.msk.bf16.mxu0 %vm768_vm4, %v3450_v14  ;;  %v3418_v20 = vadd.f32 %v3414_v2, %v3394_v31 }
 0x9da   : > { %v3411_v53 = vpop.permute.xlu0 %3410  ;;  %v3413_v36 = vmul.f32 %v3399_v7, %v6273_v28 }
 0x9db   : > { %v3416_v27 = vmul.f32 %v3411_v53, %v6299_v30 }
 0x9dc   : > { %v4380_v49 = vpop.eup %4379  ;;  %v3417_v23 = vadd.f32 %v3413_v36, %v3393_v26  ;;  %v6592_v36 = vld [vmem:[#allocation11_spill] sm:$0xff] }
 0x9dd   : > { %v3407_v52 = vpop.permute.xlu1 %3406  ;;  %v3420_v11 = vadd.f32 %v3416_v27, %v3396_v12  ;;  %v2785_v58 = vmul.f32 %v6337_v63, %v6592_v36  ;;  %v6594_v12 = vld [vmem:[#allocation10_spill] sm:$0xff] }
 0x9de   : > { %v3427_v1 = vpop.permute.xlu0 %3426  ;;  %v3415_v29 = vmul.f32 %v3407_v52, %v6290_v47 }
 0x9df   : > { %v3438_v44 = vadd.f32 %v3427_v1, %v3418_v20 }
 0x9e0   : > { %v4382_v28 = vpop.eup %4381  ;;  %v3419_v54 = vadd.f32 %v3415_v29, %v3395_v8 }
 0x9e1   : > { %v3423_v51 = vpop.permute.xlu1 %3422  ;;  %v3451_v60 = vpack.c.bf16 %v4382_v28, %v4380_v49 }
 0x9e2   : > { %v3437_v46 = vadd.f32 %v3423_v51, %v3417_v23  ;;  %v3435_v42 = vpop.permute.xlu0 %3434  ;;  %v2784_v51 = vmul.f32 %v6337_v63, %v6594_v12 }
 0x9e3   : > { %4077 = vmatmul.mubr.msk.bf16.vlgmr.msra.gmra.mrb[40].mxu0 %vm768_vm4, %v3451_v60  ;;  %v3440_v37 = vadd.f32 %v3435_v42, %v3420_v11 }
 0x9e4   : > { %v3452_v19 = vpack.c.bf16 %v3438_v44, %v3437_v46  ;;  %v6595_v46 = vld [vmem:[#allocation12_spill] sm:$0xff] }
 0x9e5   : > { %v3431_v18 = vpop.permute.xlu1 %3430  ;;  %v2786_v42 = vmul.f32 %v6337_v63, %v6595_v46 }
 0x9e6   : > { %v3439_v30 = vadd.f32 %v3431_v18, %v3419_v54  ;;  %4080 = vmatprep.mubr.msk.bf16.mxu0 %vm768_vm4, %v3452_v19 }
 0x9e7   : > { %v2793_v47 = vpop.permute.xlu0 %2792 }
 0x9e8   : > { %v3453_v13 = vpack.c.bf16 %v3440_v37, %v3439_v30 }
 0x9ea   : > { %v2789_v4 = vpop.permute.xlu1 %2788 }
 0x9eb   : > { %v2833_v34 = vpop.permute.xlu0 %2832  ;;  %4081 = vmatmul.mubr.msk.bf16.gmra.mrb[44].mxu0 %vm768_vm4, %v3453_v13 }
 0x9ec   : > { %v2847_v28 = vmul.f32 %v2833_v34, %v2783_v59 }
 0x9ee   : > { %v2809_v55 = vpop.permute.xlu1 %2808 }
 0x9ef   : > { %v2752_v24 = vpop.permute.xlu0 %2751  ;;  %v2823_v31 = vmul.f32 %v2809_v55, %v6588_v17 }
 0x9f0   : > { %v2763_v5 = vsel %vm486_vm2, 0.0, %v2752_v24 }
 0x9f1   : > { %v2773_v7 = vmul.f32 %v6327_v43, %v2763_v5 }
 0x9f2   : > { %v2813_v25 = vpop.permute.xlu1 %2812 }
 0x9f3   : > { %v2797_v9 = vpop.permute.xlu0 %2796  ;;  %v2803_v2 = vmul.f32 %v2789_v4, %v2773_v7  ;;  %v2824_v49 = vmul.f32 %v2813_v25, %v6589_v0 }
 0x9f5   : > { %v2827_v27 = vadd.f32 %v2823_v31, %v2803_v2 }
 0x9f6   : > { %v2837_v61 = vpop.permute.xlu1 %2836 }
 0x9f7   : > { %v2817_v15 = vpop.permute.xlu0 %2816  ;;  %v2848_v19 = vmul.f32 %v2837_v61, %v2784_v51  ;;  %v2851_v11 = vadd.f32 %v2847_v28, %v2827_v27 }
 0x9f8   : > { %v2825_v53 = vmul.f32 %v2817_v15, %v6590_v38 }
 0x9fa   : > { %v2754_v40 = vpop.permute.xlu1 %2753 }
 0x9fb   : > { %v2841_v3 = vpop.permute.xlu0 %2840  ;;  %v2764_v45 = vsel %vm486_vm2, 0.0, %v2754_v40 }
 0x9fc   : > { %v2774_v48 = vmul.f32 %v6327_v43, %v2764_v45  ;;  %v2849_v39 = vmul.f32 %v2841_v3, %v2785_v58 }
 0x9fe   : > { %v2801_v10 = vpop.permute.xlu1 %2800  ;;  %v2804_v26 = vmul.f32 %v2793_v47, %v2774_v48  ;;  %v3551_v48 = vld [vmem:[%s6462_s9] sm:$0xff] }
 0x9ff   : > { %v2857_v21 = vpop.permute.xlu0 %2856 }
 0xa00   : > { %v2828_v8 = vadd.f32 %v2824_v49, %v2804_v26  ;;  %v2871_v47 = vadd.f32 %v2857_v21, %v2851_v11 }
 0xa02   : > { %v2821_v35 = vpop.permute.xlu1 %2820  ;;  %v2852_v13 = vadd.f32 %v2848_v19, %v2828_v8 }
 0xa03   : > { %v2756_v50 = vpop.permute.xlu0 %2755  ;;  %v2826_v44 = vmul.f32 %v2821_v35, %v6591_v6 }
 0xa04   : > { %v2765_v33 = vsel %vm486_vm2, 0.0, %v2756_v50 }
 0xa05   : > { %v2775_v32 = vmul.f32 %v6327_v43, %v2765_v33 }
 0xa06   : > { %v2845_v14 = vpop.permute.xlu1 %2844 }
 0xa07   : > { %v2805_v57 = vmul.f32 %v2797_v9, %v2775_v32  ;;  %v2865_v54 = vpop.permute.xlu0 %2864  ;;  %v2850_v18 = vmul.f32 %v2845_v14, %v2786_v42 }
 0xa09   : > { %v2829_v52 = vadd.f32 %v2825_v53, %v2805_v57  ;;  %v6596_v57 = vmov 0  }
 0xa0a   : > { %v2861_v41 = vpop.permute.xlu1 %2860 }
 0xa0b   : > { %v2853_v20 = vadd.f32 %v2849_v39, %v2829_v52  ;;  %v2872_v25 = vadd.f32 %v2861_v41, %v2852_v13 }
 0xa0c   : > { %v3267_v41 = vpop.permute.xlu0 %3266 }
 0xa0d   : > { %v2873_v37 = vadd.f32 %v2865_v54, %v2853_v20 }
 0xa0e   : > { %v2758_v1 = vpop.permute.xlu1 %2757 }
 0xa0f   : > { %v2766_v29 = vsel %vm486_vm2, 0.0, %v2758_v1 }
 0xa10   : > { %v2776_v23 = vmul.f32 %v6327_v43, %v2766_v29  ;;  %v3291_v36 = vpop.permute.xlu0 %3290 }
 0xa12   : > { %v2806_v60 = vmul.f32 %v2801_v10, %v2776_v23  ;;  %v2869_v9 = vpop.permute.xlu1 %2868 }
 0xa14   : > { %v2830_v30 = vadd.f32 %v2826_v44, %v2806_v60  ;;  %v3315_v52 = vpop.permute.xlu0 %3314 }
 0xa15   : > { %v4062_v4 = vpop.f32.mrb[36].mxu1 }
 0xa16   : > { %v2854_v34 = vadd.f32 %v2850_v18, %v2830_v30  ;;  %v3059_v55 = vmul.f32 %v4062_v4, %v2873_v37  ;;  %v3026_v24 = vpop.f32.mrb[37].mxu1 }
 0xa17   : > { %v3057_v15 = vmul.f32 %v3026_v24, %v2871_v47  ;;  %v4063_v40 = vpop.f32.mrb[38].mxu1  ;;  %v3271_v53 = vpop.permute.xlu1 %3270 }
 0xa18   : > { %v2874_v3 = vadd.f32 %v2869_v9, %v2854_v34  ;;  %v3029_v35 = vpop.f32.mrb[39].mxu1  ;;  %v3279_v26 = vpop.permute.xlu0 %3278 }
 0xa19   : > { %v3058_v50 = vmul.f32 %v3029_v35, %v2872_v25 }
 0xa1a   : > { %v3060_v10 = vmul.f32 %v4063_v40, %v2874_v3 }
 0xa1b   : > { %v3287_v2 = vpop.permute.xlu1 %3286 }
 0xa1c   : > { %v3299_v39 = vpop.permute.xlu0 %3298 }
 0xa1f   : > { %v3311_v58 = vpop.permute.xlu1 %3310 }
 0xa20   : > { %v3323_v1 = vpop.permute.xlu0 %3322 }
 0xa23   : > { %v3275_v31 = vpop.permute.xlu1 %3274 }
 0xa24   : > { %v3339_v59 = vpop.permute.xlu0 %3338 }
 0xa29   : > { %v4066_v61 = vpop.f32.mrb[40].mxu1 }
 0xa2a   : > { %v6354_v5 = vadd.f32 %v4066_v61, %v3059_v55  ;;  %v3042_v33 = vpop.f32.mrb[41].mxu1 }
 0xa2b   : > { %v3061_v32 = vadd.f32 %v3057_v15, %v3042_v33  ;;  %v4067_v45 = vpop.f32.mrb[42].mxu1 }
 0xa2c   : > { %v6356_v21 = vadd.f32 %v4067_v45, %v3060_v10  ;;  %v3045_v14 = vpop.f32.mrb[43].mxu1  ;;  %3229 = vrot.lane.b32.xlu1 %v6354_v5, %s6527_s26 }
 0xa2d   : > { %v3062_v7 = vadd.f32 %v3058_v50, %v3045_v14  ;;  %v3301_v37 = vmul.f32 %v3287_v2, %v3061_v32 }
 0xa2e   : > { %3231 = vrot.lane.b32.xlu0 %v6356_v21, %s6527_s26 }
 0xa2f   : > { %v3302_v24 = vmul.f32 %v3291_v36, %v3062_v7 }
 0xa30   : > { %3249 = vrot.lane.b32.xlu1 %v6354_v5, %s6528_s27 }
 0xa32   : > { %3251 = vrot.lane.b32.xlu0 %v6356_v21, %s6528_s27 }
 0xa34   : > { %3225 = vrot.lane.b32.xlu1 %v3061_v32, %s6527_s26 }
 0xa36   : > { %3227 = vrot.lane.b32.xlu0 %v3062_v7, %s6527_s26  ;;  %s4400_s26 = scalar_lea.vmem %s6412_s21, 128 }
 0xa37   : > { %p4401_p11 = scmp.ne.s32.totalorder %s6412_s21, %s4400_s26 }
 0xa38   : > { %3245 = vrot.lane.b32.xlu1 %v3061_v32, %s6528_s27 }
 0xa39   : > { %p4402_p12 = pnand %p4401_p11, %p4574_p5 }
 0xa3a   : > { %3247 = vrot.lane.b32.xlu0 %v3062_v7, %s6528_s27 }
 0xa3b   : > { %p4403_p13 = pneg %p4402_p12 }
 0xa3c   : > { %3342 = vperm.xlu1 %4204, %v6086_v22   ;;  %v3295_v22 = vpop.permute.xlu1 %3294 }
 0xa3d   : > { %v3303_v32 = vmul.f32 %v3295_v22, %v6354_v5 }
 0xa3e   : > { %3346 = vperm.xlu0 %4203, %v6095_v62  }
 0xa40   : > { %4205 = vset.pattern.permute.xlu1 %v6596_v57  ;;  %v3319_v62 = vpop.permute.xlu1 %3318 }
 0xa41   : > { %3554 = vperm.xlu1 %4205, %v3551_v48   ;;  %v3304_v48 = vmul.f32 %v3299_v39, %v6356_v21 }
 0xa42   : > { %4206 = vset.pattern.permute.xlu0 %v6596_v57 }
 0xa44   : > { %v3335_v56 = vpop.permute.xlu1 %3334 }
 0xa9e   : > { %v3230_v49 = vpop.permute.xlu1 %3229 }
 0xa9f   : > { %v3239_v11 = vsel %vm486_vm2, 0.0, %v3230_v49 }
 0xaa0   : > { %v3232_v27 = vpop.permute.xlu0 %3231  ;;  %v3243_v55 = vmul.f32 %v6327_v43, %v3239_v11 }
 0xaa1   : > { %v3240_v47 = vsel %vm486_vm2, 0.0, %v3232_v27 }
 0xaa2   : > { %v3250_v29 = vpop.permute.xlu1 %3249  ;;  %v3244_v40 = vmul.f32 %v6327_v43, %v3240_v47  ;;  %v3283_v10 = vmul.f32 %v3275_v31, %v3243_v55 }
 0xaa3   : > { %v3259_v13 = vsel %vm513_vm3, %v3250_v29, 0.0 }
 0xaa4   : > { %v3252_v20 = vpop.permute.xlu0 %3251  ;;  %v3263_v3 = vmul.f32 %v6337_v63, %v3259_v13  ;;  %v3284_v45 = vmul.f32 %v3279_v26, %v3244_v40  ;;  %v3307_v2 = vadd.f32 %v3303_v32, %v3283_v10 }
 0xaa5   : > { %v3260_v25 = vsel %vm513_vm3, %v3252_v20, 0.0 }
 0xaa6   : > { %v3226_v23 = vpop.permute.xlu1 %3225  ;;  %v3264_v61 = vmul.f32 %v6337_v63, %v3260_v25  ;;  %v3327_v14 = vmul.f32 %v3319_v62, %v3263_v3  ;;  %v3308_v31 = vadd.f32 %v3304_v48, %v3284_v45 }
 0xaa7   : > { %v3237_v28 = vsel %vm486_vm2, 0.0, %v3226_v23 }
 0xaa8   : > { %v3228_v12 = vpop.permute.xlu0 %3227  ;;  %v3241_v51 = vmul.f32 %v6327_v43, %v3237_v28  ;;  %v3331_v49 = vadd.f32 %v3327_v14, %v3307_v2 }
 0xaa9   : > { %v3238_v8 = vsel %vm486_vm2, 0.0, %v3228_v12 }
 0xaaa   : > { %v3246_v44 = vpop.permute.xlu1 %3245  ;;  %v3242_v46 = vmul.f32 %v6327_v43, %v3238_v8  ;;  %v3281_v54 = vmul.f32 %v3267_v41, %v3241_v51 }
 0xaab   : > { %v3257_v42 = vsel %vm513_vm3, %v3246_v44, 0.0 }
 0xaac   : > { %v3261_v60 = vmul.f32 %v6337_v63, %v3257_v42  ;;  %v3248_v19 = vpop.permute.xlu0 %3247  ;;  %v3282_v4 = vmul.f32 %v3271_v53, %v3242_v46  ;;  %v3305_v9 = vadd.f32 %v3301_v37, %v3281_v54  ;;  %v3328_v53 = vmul.f32 %v3323_v1, %v3264_v61 }
 0xaad   : > { %v3258_v18 = vsel %vm513_vm3, %v3248_v19, 0.0  ;;  %v3547_v19 = vld [vmem:[%s6461_s8] sm:$0xff] }
 0xaae   : > { %v3262_v30 = vmul.f32 %v6337_v63, %v3258_v18  ;;  %v3325_v34 = vmul.f32 %v3311_v58, %v3261_v60  ;;  %v3306_v35 = vadd.f32 %v3302_v24, %v3282_v4  ;;  %v3332_v20 = vadd.f32 %v3328_v53, %v3308_v31  ;;  %v4399_v18 = vld [vmem:[%s4607_s28] sm:$0xff]  ;;  %s4480_s28 = smov [#allocation2]  }
 0xaaf   : > { %v3548_v11 = vpack.c.bf16 %v3547_v19, %v3547_v19  ;;  %s4404_s27 = sshll.u32 %s4480_s28, 4  ;;  %s4405_s27 = int_to_ptr.vmem [resolvable:$false] %s4404_s27 }
 0xab0   : > { %v3326_v15 = vmul.f32 %v3315_v52, %v3262_v30  ;;  %v3329_v50 = vadd.f32 %v3325_v34, %v3305_v9  ;;  %s4406_s18 = scalar_lea.vmem %s4405_s27, 256  ;;  %p4407_p0 = scmp.lt.s32.totalorder %s6412_s21, %s4405_s27 }
 0xab1   : > { %p4408_p1 = scmp.lt.s32.totalorder %s4406_s18, %s4400_s26 }
 0xab2   : > { %v3330_v33 = vadd.f32 %v3326_v15, %v3306_v35  ;;  %v3349_v7 = vadd.f32 %v3335_v56, %v3329_v50 }
 0xab3   : > { %p4409_p2 = por %p4408_p1, %p4407_p0 }
 0xab4   : > { %v3350_v58 = vadd.f32 %v3339_v59, %v3330_v33 }
 0xab5   : > { %p4410_p3 = pnand %p4409_p2, %p4403_p13 }
 0xab6   : > { %v4078_v57 = vpop.f32.mrb[40].mxu0 }
 0xab7   : > { %v3504_v41 = vpop.f32.mrb[41].mxu0 }
 0xab8   : > { %v3535_v43 = vmul.f32 %v3504_v41, %v3349_v7  ;;  %v4079_v36 = vpop.f32.mrb[42].mxu0 }
 0xab9   : > { %v3507_v52 = vpop.f32.mrb[43].mxu0 }
 0xaba   : > { %v3536_v27 = vmul.f32 %v3507_v52, %v3350_v58 }
 0xabb   : > { %v3343_v63 = vpop.permute.xlu1 %3342 }
 0xabc   : > { %v3351_v29 = vadd.f32 %v3343_v63, %v3331_v49 }
 0xabd   : > { %v3347_v5 = vpop.permute.xlu0 %3346 }
 0xabe   : > { %v3352_v26 = vadd.f32 %v3347_v5, %v3332_v20  ;;  %v3537_v22 = vmul.f32 %v4078_v57, %v3351_v29  ;;  %v4082_v62 = vpop.f32.mrb[44].mxu0 }
 0xabf   : > { %v3520_v23 = vpop.f32.mrb[45].mxu0 }
 0xac0   : > { %v3541_v56 = vadd.f32 %v4082_v62, %v3537_v22  ;;  %v3538_v21 = vmul.f32 %v4079_v36, %v3352_v26  ;;  %v3539_v39 = vadd.f32 %v3535_v43, %v3520_v23  ;;  %v4083_v1 = vpop.f32.mrb[46].mxu0 }
 0xac1   : > { %v3523_v12 = vpop.f32.mrb[47].mxu0 }
 0xac2   : > { %v3542_v28 = vadd.f32 %v4083_v1, %v3538_v21  ;;  %v3540_v59 = vadd.f32 %v3536_v27, %v3523_v12  ;;  %v3545_v51 = vadd.f32 %v3541_v56, %v6590_v38  ;;  %v3543_v44 = vadd.f32 %v3539_v39, %v6588_v17  ;;  %v3555_v38 = vpop.permute.xlu1 %3554 }
 0xac4   : > { %v3546_v8 = vadd.f32 %v3542_v28, %v6591_v6  ;;  %v3544_v46 = vadd.f32 %v3540_v59, %v6589_v0 }
 0xac6   : > { %v3550_v42 = vpack.c.bf16 %v3546_v8, %v3545_v51  ;;  %v3549_v60 = vpack.c.bf16 %v3544_v46, %v3543_v44 }
 0xac8   : > { %4085 = vmatpush3.bf16.msra.mxu1 %v3549_v60 }
 0xac9   : > { %4086 = vmatprep.subr.bf16.mxu1 %v6587_v16 }
 0xacc   : > { %4087 = vmatpush3.bf16.msra.mxu1 %v3550_v42 }
 0xacf   : > { %4089 = vmatmul.mubr.msk.bf16.vlgmr.msra.gmra.mrb[44].mxu1 %vm1030_vm6, %v3548_v11 }
 0xba2   : > { %v3594_v17 = vpop.f32.mrb[44].mxu1 }
 0xba3   : > { %v4090_v0 = vpop.f32.mrb[45].mxu1  ;;  %v3595_v6 = vadd.f32 %v3594_v17, %v3555_v38 }
 0xba4   : > { %v3597_v54 = vpop.f32.mrb[46].mxu1 }
 0xba5   : > { %v3600_v37 = vadd.f32 %v4399_v18, %v3595_v6  ;;  %v4091_v30 = vpop.f32.mrb[47].mxu1 }
 0xba7   : > { %3601 = vst.msk [vmem:[%s350_s11] sm:$0xff] %vm768_vm4, %v3600_v37 }
 0xba8   : > { %4413 = shalt.err (!%p4410_p3)
}
 0xba9   : > { %s4414_s12 = scalar_lea.hbm %s6410_s30, 128  ;;  %s4418_s20 = scalar_lea.hbm %s6463_s10, 256 }
 0xbaa   : > { %p4415_p4 = scmp.ne.s32.totalorder %s6410_s30, %s4414_s12  ;;  %p4419_p9 = scmp.lt.u32.totalorder %s6410_s30, %s6463_s10 }
 0xbab   : > { %p4420_p10 = scmp.lt.u32.totalorder %s4418_s20, %s4414_s12  ;;  %p4422_p12 = scmp.lt.u32.totalorder %s4414_s12, %s6410_s30 }
 0xbac   : > { %p4416_p7 = pnand %p4415_p4, %p4574_p5 }
 0xbad   : > { %p4421_p11 = por %p4420_p10, %p4419_p9 }
 0xbae   : > { %p4417_p8 = pneg %p4416_p7 }
 0xbaf   : > { %p4423_p13 = por %p4422_p12, %p4421_p11 }
 0xbb1   : > { %p4424_p0 = pnand %p4423_p13, %p4417_p8 }
 0xbb3   : > { %4427 = shalt.err (!%p4424_p0)
}
 0xbb4   : > { %4113 = dma.vmem_to_hbm [thread:$0]  (%p4574_p5), %s6412_s21, 128, %s6410_s30, %s3603_s17  }
 0xbb5 PF: > { %p4119_p1 = scmp.ge.s32.totalorder %s4462_s16, 2  ;;  %s3628_s26 = sand.u32 1, %s4450_s13  }
 0xbb6   : > { %s3629_s27 = scalar_lea.sflag [#allocation3], %s3628_s26 }
 0xbb7   : > { %p4116_p2 = pnand %p4119_p1, %p4578_p6 }
 0xbb9   : > { %4445 = dma.done.wait (!%p4116_p2), %s3629_s27, 128  }
 0xbba   : > { %4447 = vsyncadd (!%p4116_p2), %s3629_s27, 4294967168  ;;  %p20_p3 = scmp.ge.s32.totalorder %s4561_s19, 4   ;;  %s6597_s13 = smov %s4454_s14 }
 0xbbb   : > { %s6598_s14 = smov %s4458_s15  ;;  %s6599_s15 = smov %s4572_s22 }
 0xbbc   : > { %s6600_s16 = smov %s4561_s19  ;;  %22 = sbr.rel (!%p20_p3) target bundleno = 3 (0x3), region = 105 }
 0xbc3   :  { %3634 = vsyncpa [#allocation3], 1 }
 0xbc4   :  { %3636 = vsyncpa [#allocation3 + $0x1], 1 }

</bundles_post_ra>
